<compile_context>
chip_gen: v7x
topology: tpu7x:2x2x1
jax: 0.10.0
libtpu: 0.0.40
codegen_flags: <defaults>
</compile_context>

<pallas_src>
import jax
import jax.numpy as jnp
from jax import lax
from jax.experimental import pallas as pl
from jax.experimental.pallas import tpu as pltpu


# ---------------------------------------------------------------------------
# Tiling helpers
# ---------------------------------------------------------------------------
def _round_up(a, b):
    return ((a + b - 1) // b) * b


def _largest_aligned_divisor(n, cap, align=128):
    """Largest multiple of `align` that divides n and is <= cap (>= align)."""
    best = align
    t = align
    top = min(cap, n)
    while t <= top:
        if n % t == 0:
            best = t
        t += align
    return best


# ---------------------------------------------------------------------------
# Kernel 1: hidden layer   h = relu(Â @ (X @ W1) + b1)
#   grid = (row blocks, k blocks). X k-tile is projected to H1 lanes in-kernel
#   (free compute, 2x MXU lane fill on the Â matmul, half the streamed X bytes),
#   then the wide Â matmul accumulates in an f32 VMEM scratch.
# ---------------------------------------------------------------------------
def gcn_hidden_kernel(a_ref, x_ref, w1_ref, b1_ref, h_ref, acc_ref):
    k = pl.program_id(1)

    @pl.when(k == 0)
    def _():
        acc_ref[...] = jnp.zeros_like(acc_ref)

    xw = jnp.dot(x_ref[...], w1_ref[...],
                 preferred_element_type=jnp.float32).astype(jnp.bfloat16)
    acc_ref[...] += jnp.dot(a_ref[...], xw,
                            preferred_element_type=jnp.float32)

    @pl.when(k == pl.num_programs(1) - 1)
    def _():
        h = jnp.maximum(acc_ref[...] + b1_ref[...], 0.0)
        h_ref[...] = h.astype(h_ref.dtype)            # bf16 for stage 2


# ---------------------------------------------------------------------------
# Kernel 2: fused heads   [mu | logvar] = (Â @ h) @ [Wmu | Wlv] + [bmu | blv]
#   One Â pass for both heads, single packed (TM, 2*h2) output slab.
# ---------------------------------------------------------------------------
def gcn_heads_kernel(a_ref, h_ref, wcat_ref, bcat_ref, heads_ref, acc_ref):
    k = pl.program_id(1)

    @pl.when(k == 0)
    def _():
        acc_ref[...] = jnp.zeros_like(acc_ref)

    acc_ref[...] += jnp.dot(a_ref[...], h_ref[...],
                            preferred_element_type=jnp.float32)

    @pl.when(k == pl.num_programs(1) - 1)
    def _():
        ah = acc_ref[...].astype(jnp.bfloat16)
        heads_ref[...] = (jnp.dot(ah, wcat_ref[...],
                                  preferred_element_type=jnp.float32)
                          + bcat_ref[...])


# ---------------------------------------------------------------------------
# Kernel 3: decoder   logits[i_blk, j_blk] = z[i_blk] @ z[j_blk].T
#   dot_general contracts the lane axis (no transpose through the XLU).
#   f32 accumulation on the MXU, bf16 output store (halves the N^2 HBM write).
# ---------------------------------------------------------------------------
def decoder_kernel(zi_ref, zj_ref, logits_ref):
    acc = lax.dot_general(
        zi_ref[...], zj_ref[...],
        dimension_numbers=(((1,), (1,)), ((), ())),
        preferred_element_type=jnp.float32)
    logits_ref[...] = acc.astype(logits_ref.dtype)


# ---------------------------------------------------------------------------
# Plain-JAX glue: PyG GCNConv normalization  Â = D^{-1/2} (A + I) D^{-1/2}
# ---------------------------------------------------------------------------
def normalized_adjacency(edge_index, num_nodes):
    src, dst = edge_index
    adj = jnp.zeros((num_nodes, num_nodes), jnp.float32)
    adj = adj.at[src, dst].set(1.0)
    adj = adj + jnp.eye(num_nodes, dtype=jnp.float32)          # self loops
    deg = jnp.sum(adj, axis=1)
    d_inv_sqrt = jnp.where(deg > 0, lax.rsqrt(deg), 0.0)
    return adj * d_inv_sqrt[:, None] * d_inv_sqrt[None, :]


# ---------------------------------------------------------------------------
# Wrapper (jit this: the Â normalize / bf16-cast / pad then fuse into one pass)
# ---------------------------------------------------------------------------
def vgae_forward(x, edge_index, w1, b1, wmu, bmu, wlv, blv):
    """Full VGAE forward (eval mode). Returns (logits[bf16], mu[f32], logvar[f32])."""
    n, d_in = x.shape
    h1 = w1.shape[1]
    h2 = wmu.shape[1]
    f32, bf16 = jnp.float32, jnp.bfloat16

    # ---- tile selection --------------------------------------------------
    # TM: row block on the 'parallel' grid axis -> keep >= 2 blocks when possible
    #     (v7x megacore); grow TK, not TM, when N is small.
    # TK: k-reduction block, as large as possible (<= 1024) to amortize the
    #     fixed per-grid-step overhead against the HBM pipe.
    # TBJ: decoder lane tile (lane-dense bf16 output stores).
    n_p = _round_up(n, 256)
    tm_cap = 512 if n_p >= 2048 else max(128, n_p // 2)
    TM = _largest_aligned_divisor(n_p, cap=tm_cap)
    TK = _largest_aligned_divisor(n_p, cap=1024)
    TBJ = _largest_aligned_divisor(n_p, cap=1024)
    pad = n_p - n
    gi, gk, gj = n_p // TM, n_p // TK, n_p // TBJ

    # Â is produced directly as padded bf16 (fuses with its producer under jit;
    # no standalone pad+cast pass over an already-materialized f32 Â).
    a_p = jnp.pad(normalized_adjacency(edge_index, n).astype(bf16),
                  ((0, pad), (0, pad)))
    x_p = jnp.pad(x, ((0, pad), (0, 0))).astype(bf16)

    w1_b = w1.astype(bf16)
    b1_f = b1.reshape(1, h1).astype(f32)
    wcat = jnp.concatenate([wmu, wlv], axis=1).astype(bf16)        # (h1, 2*h2)
    bcat = jnp.concatenate([bmu, blv]).reshape(1, 2 * h2).astype(f32)

    vmem_limit = 48 << 20          # per-step working set is only a few MiB
    resident = lambda arr: pl.BlockSpec(arr.shape, lambda i, k: (0, 0))
    gcn_params = pltpu.CompilerParams(
        dimension_semantics=("parallel", "arbitrary"),
        vmem_limit_bytes=vmem_limit)

    # --- stage 1: hidden features ------------------------------------------
    h = pl.pallas_call(
        gcn_hidden_kernel,
        out_shape=jax.ShapeDtypeStruct((n_p, h1), bf16),
        grid=(gi, gk),
        in_specs=[
            pl.BlockSpec((TM, TK), lambda i, k: (i, k)),     # Â tile
            pl.BlockSpec((TK, d_in), lambda i, k: (k, 0)),   # X k-tile
            resident(w1_b),
            resident(b1_f),
        ],
        out_specs=pl.BlockSpec((TM, h1), lambda i, k: (i, 0)),
        scratch_shapes=[pltpu.VMEM((TM, h1), f32)],
        compiler_params=gcn_params,
    )(a_p, x_p, w1_b, b1_f)

    # --- stage 2: fused mu / logvar heads -----------------------------------
    heads = pl.pallas_call(
        gcn_heads_kernel,
        out_shape=jax.ShapeDtypeStruct((n_p, 2 * h2), f32),
        grid=(gi, gk),
        in_specs=[
            pl.BlockSpec((TM, TK), lambda i, k: (i, k)),     # Â tile
            pl.BlockSpec((TK, h1), lambda i, k: (k, 0)),     # h k-tile
            resident(wcat),
            resident(bcat),
        ],
        out_specs=pl.BlockSpec((TM, 2 * h2), lambda i, k: (i, 0)),
        scratch_shapes=[pltpu.VMEM((TM, h1), f32)],
        compiler_params=gcn_params,
    )(a_p, h, wcat, bcat)

    mu = heads[:n, :h2]
    logvar = heads[:n, h2:]

    # --- stage 3: decoder ----------------------------------------------------
    # TODO(synk): training-mode reparameterize (z = mu + eps * exp(0.5*logvar))
    # via pltpu.prng_seed / pltpu.stateful_normal; eval mode (z = mu) here.
    # Padded rows are explicitly zeroed (they would otherwise equal the bias).
    valid = (jnp.arange(n_p) < n)[:, None]
    z = jnp.where(valid, heads[:, :h2], 0.0).astype(bf16)

    logits = pl.pallas_call(
        decoder_kernel,
        out_shape=jax.ShapeDtypeStruct((n_p, n_p), bf16),    # bf16 halves N^2 write
        grid=(gi, gj),
        in_specs=[
            pl.BlockSpec((TM, h2), lambda i, j: (i, 0)),
            pl.BlockSpec((TBJ, h2), lambda i, j: (j, 0)),
        ],
        out_specs=pl.BlockSpec((TM, TBJ), lambda i, j: (i, j)),
        compiler_params=pltpu.CompilerParams(
            dimension_semantics=("parallel", "parallel"),
            vmem_limit_bytes=vmem_limit),
    )(z, z)

    return logits[:n, :n], mu, logvar


def glorot(key, shape):
    fan_in, fan_out = shape
    limit = jnp.sqrt(6.0 / (fan_in + fan_out))
    return jax.random.uniform(key, shape, jnp.float32, -limit, limit)


if __name__ == "__main__":
    # Ring graph of 384 nodes: not a tile multiple, so the padding path and the
    # multi-row-block (gi=2) grid are exercised.
    num_nodes = 384
    input_dim = 16
    hidden_dim1 = 32
    hidden_dim2 = 16

    key = jax.random.PRNGKey(0)
    k_x, k_w1, k_wmu, k_wlv = jax.random.split(key, 4)

    x = jax.random.normal(k_x, (num_nodes, input_dim), jnp.float32)

    # Ring graph edges, made undirected (both directions) like to_undirected().
    i = jnp.arange(num_nodes)
    j = (i + 1) % num_nodes
    edge_index = jnp.stack([jnp.concatenate([i, j]),
                            jnp.concatenate([j, i])], axis=0)

    # Deterministic parameters (GCNConv: weight (in, out), bias (out,)).
    w1 = glorot(k_w1, (input_dim, hidden_dim1))
    b1 = jnp.zeros((hidden_dim1,), jnp.float32)
    wmu = glorot(k_wmu, (hidden_dim1, hidden_dim2))
    bmu = jnp.zeros((hidden_dim2,), jnp.float32)
    wlv = glorot(k_wlv, (hidden_dim1, hidden_dim2))
    blv = jnp.zeros((hidden_dim2,), jnp.float32)

    fwd = jax.jit(vgae_forward)
    logits, mu, logvar = fwd(x, edge_index, w1, b1, wmu, bmu, wlv, blv)
    jax.block_until_ready((logits, mu, logvar))

    # Precision-matched pure-JAX reference (bf16 MXU operands, f32 accumulation),
    # mirroring the kernel's op order / casts.
    bf = lambda t: t.astype(jnp.bfloat16)
    a_hat = normalized_adjacency(edge_index, num_nodes)
    xw_ref = bf(jnp.dot(bf(x), bf(w1), preferred_element_type=jnp.float32))
    h_ref = jnp.maximum(
        jnp.dot(bf(a_hat), xw_ref, preferred_element_type=jnp.float32) + b1[None, :],
        0.0)
    ah_ref = jnp.dot(bf(a_hat), bf(h_ref), preferred_element_type=jnp.float32)
    wcat_ref = jnp.concatenate([wmu, wlv], axis=1)
    bcat_ref = jnp.concatenate([bmu, blv])[None, :]
    heads_ref = (jnp.dot(bf(ah_ref), bf(wcat_ref), preferred_element_type=jnp.float32)
                 + bcat_ref)
    mu_ref = heads_ref[:, :hidden_dim2]
    lv_ref = heads_ref[:, hidden_dim2:]
    z_ref = bf(mu_ref)
    logits_ref = lax.dot_general(z_ref, z_ref, (((1,), (1,)), ((), ())),
                                 preferred_element_type=jnp.float32)

    assert jnp.allclose(mu, mu_ref, rtol=2e-2, atol=2e-2), "mu mismatch"
    assert jnp.allclose(logvar, lv_ref, rtol=2e-2, atol=2e-2), "logvar mismatch"
    assert jnp.allclose(logits.astype(jnp.float32), logits_ref,
                        rtol=2e-2, atol=2e-2), "logits mismatch"

    print("KERNEL_OK")
</pallas_src>

<mosaic_0001>
module attributes {stable_mosaic.version = 11 : i64} {
  func.func @gcn_hidden_kernel(%arg0: i32, %arg1: i32, %arg2: memref<256x512xbf16, #tpu.memory_space<vmem>>, %arg3: memref<512x16xbf16, #tpu.memory_space<vmem>>, %arg4: memref<16x32xbf16, #tpu.memory_space<vmem>>, %arg5: memref<1x32xf32, #tpu.memory_space<vmem>>, %arg6: memref<256x32xbf16, #tpu.memory_space<vmem>>, %arg7: memref<256x32xf32, #tpu.memory_space<vmem>>) attributes {dimension_semantics = [#tpu.dimension_semantics<parallel>, #tpu.dimension_semantics<arbitrary>], iteration_bounds = array<i64: 2, 1>, scalar_prefetch = 0 : i64, scratch_operands = 1 : i64, tpu.core_type = #tpu.core_type<tc>, window_params = [{transform_indices = @transform_0, window_bounds = array<i64: 256, 512>}, {transform_indices = @transform_1, window_bounds = array<i64: 512, 16>}, {pipeline_mode = #tpu.pipeline_mode<synchronous>, transform_indices = @transform_2, window_bounds = array<i64: 16, 32>}, {pipeline_mode = #tpu.pipeline_mode<synchronous>, transform_indices = @transform_3, window_bounds = array<i64: 1, 32>}, {transform_indices = @transform_4, window_bounds = array<i64: 256, 32>}]} {
    %c0_i32 = arith.constant 0 : i32
    %0 = arith.cmpi eq, %arg1, %c0_i32 : i32
    %1 = arith.extui %0 : i1 to i32
    %c0_i32_0 = arith.constant 0 : i32
    %2 = arith.cmpi ne, %1, %c0_i32_0 : i32
    scf.if %2 {
      %cst_13 = arith.constant 0.000000e+00 : f32
      %15 = vector.broadcast %cst_13 : f32 to vector<256x32xf32>
      %c0_14 = arith.constant 0 : index
      %c0_15 = arith.constant 0 : index
      %16 = vector.load %arg7[%c0_14, %c0_15] : memref<256x32xf32, #tpu.memory_space<vmem>>, vector<256x32xf32>
      tpu.vector_store %arg7[%c0_14, %c0_15], %15 {strides = array<i32>} : memref<256x32xf32, #tpu.memory_space<vmem>>, vector<256x32xf32>,
    } else {
    }
    %c0 = arith.constant 0 : index
    %c0_1 = arith.constant 0 : index
    %3 = vector.load %arg3[%c0, %c0_1] : memref<512x16xbf16, #tpu.memory_space<vmem>>, vector<512x16xbf16>
    %c0_2 = arith.constant 0 : index
    %c0_3 = arith.constant 0 : index
    %4 = vector.load %arg4[%c0_2, %c0_3] : memref<16x32xbf16, #tpu.memory_space<vmem>>, vector<16x32xbf16>
    %cst = arith.constant dense<0.000000e+00> : vector<512x32xf32>
    %5 = tpu.matmul %3, %4, %cst {dimension_numbers = #tpu.dot_dimension_numbers<[1], [0], [0], [1], [0, 0, 1, 1], [], []>} : vector<512x16xbf16>, vector<16x32xbf16>, vector<512x32xf32> -> vector<512x32xf32>
    %6 = arith.truncf %5 : vector<512x32xf32> to vector<512x32xbf16>
    %c0_4 = arith.constant 0 : index
    %c0_5 = arith.constant 0 : index
    %7 = vector.load %arg7[%c0_4, %c0_5] : memref<256x32xf32, #tpu.memory_space<vmem>>, vector<256x32xf32>
    %c0_6 = arith.constant 0 : index
    %c0_7 = arith.constant 0 : index
    %8 = vector.load %arg2[%c0_6, %c0_7] : memref<256x512xbf16, #tpu.memory_space<vmem>>, vector<256x512xbf16>
    %cst_8 = arith.constant dense<0.000000e+00> : vector<256x32xf32>
    %9 = tpu.matmul %8, %6, %cst_8 {dimension_numbers = #tpu.dot_dimension_numbers<[1], [0], [0], [1], [0, 0, 1, 1], [], []>} : vector<256x512xbf16>, vector<512x32xbf16>, vector<256x32xf32> -> vector<256x32xf32>
    %10 = arith.addf %7, %9 : vector<256x32xf32>
    %c0_9 = arith.constant 0 : index
    %c0_10 = arith.constant 0 : index
    %11 = vector.load %arg7[%c0_9, %c0_10] : memref<256x32xf32, #tpu.memory_space<vmem>>, vector<256x32xf32>
    tpu.vector_store %arg7[%c0_9, %c0_10], %10 {strides = array<i32>} : memref<256x32xf32, #tpu.memory_space<vmem>>, vector<256x32xf32>,
    %c0_i32_11 = arith.constant 0 : i32
    %12 = arith.cmpi eq, %arg1, %c0_i32_11 : i32
    %13 = arith.extui %12 : i1 to i32
    %c0_i32_12 = arith.constant 0 : i32
    %14 = arith.cmpi ne, %13, %c0_i32_12 : i32
    scf.if %14 {
      %c0_13 = arith.constant 0 : index
      %c0_14 = arith.constant 0 : index
      %15 = vector.load %arg7[%c0_13, %c0_14] : memref<256x32xf32, #tpu.memory_space<vmem>>, vector<256x32xf32>
      %c0_15 = arith.constant 0 : index
      %c0_16 = arith.constant 0 : index
      %16 = vector.load %arg5[%c0_15, %c0_16] : memref<1x32xf32, #tpu.memory_space<vmem>>, vector<1x32xf32>
      %17 = vector.broadcast %16 : vector<1x32xf32> to vector<256x32xf32>
      %18 = arith.addf %15, %17 : vector<256x32xf32>
      %cst_17 = arith.constant 0.000000e+00 : f32
      %19 = vector.broadcast %cst_17 : f32 to vector<256x32xf32>
      %20 = arith.maximumf %18, %19 : vector<256x32xf32>
      %21 = arith.truncf %20 : vector<256x32xf32> to vector<256x32xbf16>
      %c0_18 = arith.constant 0 : index
      %c0_19 = arith.constant 0 : index
      %22 = vector.load %arg6[%c0_18, %c0_19] : memref<256x32xbf16, #tpu.memory_space<vmem>>, vector<256x32xbf16>
      tpu.vector_store %arg6[%c0_18, %c0_19], %21 {strides = array<i32>} : memref<256x32xbf16, #tpu.memory_space<vmem>>, vector<256x32xbf16>,
    } else {
    }
    return
  }
  func.func @transform_0(%arg0: i32, %arg1: i32) -> (i32, i32) {
    %c0_i32 = arith.constant 0 : i32
    return %arg0, %arg1 : i32, i32
  }
  func.func @transform_1(%arg0: i32, %arg1: i32) -> (i32, i32) {
    %c0_i32 = arith.constant 0 : i32
    %c0_i32_0 = arith.constant 0 : i32
    return %arg1, %c0_i32 : i32, i32
  }
  func.func @transform_2(%arg0: i32, %arg1: i32) -> (i32, i32) {
    %c0_i32 = arith.constant 0 : i32
    %c0_i32_0 = arith.constant 0 : i32
    %c0_i32_1 = arith.constant 0 : i32
    return %c0_i32, %c0_i32_0 : i32, i32
  }
  func.func @transform_3(%arg0: i32, %arg1: i32) -> (i32, i32) {
    %c0_i32 = arith.constant 0 : i32
    %c0_i32_0 = arith.constant 0 : i32
    %c0_i32_1 = arith.constant 0 : i32
    return %c0_i32, %c0_i32_0 : i32, i32
  }
  func.func @transform_4(%arg0: i32, %arg1: i32) -> (i32, i32) {
    %c0_i32 = arith.constant 0 : i32
    %c0_i32_0 = arith.constant 0 : i32
    return %arg0, %c0_i32 : i32, i32
  }
}

module attributes {stable_mosaic.version = 11 : i64} {
  func.func @gcn_heads_kernel(%arg0: i32, %arg1: i32, %arg2: memref<256x512xbf16, #tpu.memory_space<vmem>>, %arg3: memref<512x32xbf16, #tpu.memory_space<vmem>>, %arg4: memref<32x32xbf16, #tpu.memory_space<vmem>>, %arg5: memref<1x32xf32, #tpu.memory_space<vmem>>, %arg6: memref<256x32xf32, #tpu.memory_space<vmem>>, %arg7: memref<256x32xf32, #tpu.memory_space<vmem>>) attributes {dimension_semantics = [#tpu.dimension_semantics<parallel>, #tpu.dimension_semantics<arbitrary>], iteration_bounds = array<i64: 2, 1>, scalar_prefetch = 0 : i64, scratch_operands = 1 : i64, tpu.core_type = #tpu.core_type<tc>, window_params = [{transform_indices = @transform_0, window_bounds = array<i64: 256, 512>}, {transform_indices = @transform_1, window_bounds = array<i64: 512, 32>}, {pipeline_mode = #tpu.pipeline_mode<synchronous>, transform_indices = @transform_2, window_bounds = array<i64: 32, 32>}, {pipeline_mode = #tpu.pipeline_mode<synchronous>, transform_indices = @transform_3, window_bounds = array<i64: 1, 32>}, {transform_indices = @transform_4, window_bounds = array<i64: 256, 32>}]} {
    %c0_i32 = arith.constant 0 : i32
    %0 = arith.cmpi eq, %arg1, %c0_i32 : i32
    %1 = arith.extui %0 : i1 to i32
    %c0_i32_0 = arith.constant 0 : i32
    %2 = arith.cmpi ne, %1, %c0_i32_0 : i32
    scf.if %2 {
      %cst_10 = arith.constant 0.000000e+00 : f32
      %12 = vector.broadcast %cst_10 : f32 to vector<256x32xf32>
      %c0_11 = arith.constant 0 : index
      %c0_12 = arith.constant 0 : index
      %13 = vector.load %arg7[%c0_11, %c0_12] : memref<256x32xf32, #tpu.memory_space<vmem>>, vector<256x32xf32>
      tpu.vector_store %arg7[%c0_11, %c0_12], %12 {strides = array<i32>} : memref<256x32xf32, #tpu.memory_space<vmem>>, vector<256x32xf32>,
    } else {
    }
    %c0 = arith.constant 0 : index
    %c0_1 = arith.constant 0 : index
    %3 = vector.load %arg7[%c0, %c0_1] : memref<256x32xf32, #tpu.memory_space<vmem>>, vector<256x32xf32>
    %c0_2 = arith.constant 0 : index
    %c0_3 = arith.constant 0 : index
    %4 = vector.load %arg2[%c0_2, %c0_3] : memref<256x512xbf16, #tpu.memory_space<vmem>>, vector<256x512xbf16>
    %c0_4 = arith.constant 0 : index
    %c0_5 = arith.constant 0 : index
    %5 = vector.load %arg3[%c0_4, %c0_5] : memref<512x32xbf16, #tpu.memory_space<vmem>>, vector<512x32xbf16>
    %cst = arith.constant dense<0.000000e+00> : vector<256x32xf32>
    %6 = tpu.matmul %4, %5, %cst {dimension_numbers = #tpu.dot_dimension_numbers<[1], [0], [0], [1], [0, 0, 1, 1], [], []>} : vector<256x512xbf16>, vector<512x32xbf16>, vector<256x32xf32> -> vector<256x32xf32>
    %7 = arith.addf %3, %6 : vector<256x32xf32>
    %c0_6 = arith.constant 0 : index
    %c0_7 = arith.constant 0 : index
    %8 = vector.load %arg7[%c0_6, %c0_7] : memref<256x32xf32, #tpu.memory_space<vmem>>, vector<256x32xf32>
    tpu.vector_store %arg7[%c0_6, %c0_7], %7 {strides = array<i32>} : memref<256x32xf32, #tpu.memory_space<vmem>>, vector<256x32xf32>,
    %c0_i32_8 = arith.constant 0 : i32
    %9 = arith.cmpi eq, %arg1, %c0_i32_8 : i32
    %10 = arith.extui %9 : i1 to i32
    %c0_i32_9 = arith.constant 0 : i32
    %11 = arith.cmpi ne, %10, %c0_i32_9 : i32
    scf.if %11 {
      %c0_10 = arith.constant 0 : index
      %c0_11 = arith.constant 0 : index
      %12 = vector.load %arg7[%c0_10, %c0_11] : memref<256x32xf32, #tpu.memory_space<vmem>>, vector<256x32xf32>
      %13 = arith.truncf %12 : vector<256x32xf32> to vector<256x32xbf16>
      %c0_12 = arith.constant 0 : index
      %c0_13 = arith.constant 0 : index
      %14 = vector.load %arg4[%c0_12, %c0_13] : memref<32x32xbf16, #tpu.memory_space<vmem>>, vector<32x32xbf16>
      %cst_14 = arith.constant dense<0.000000e+00> : vector<256x32xf32>
      %15 = tpu.matmul %13, %14, %cst_14 {dimension_numbers = #tpu.dot_dimension_numbers<[1], [0], [0], [1], [0, 0, 1, 1], [], []>} : vector<256x32xbf16>, vector<32x32xbf16>, vector<256x32xf32> -> vector<256x32xf32>
      %c0_15 = arith.constant 0 : index
      %c0_16 = arith.constant 0 : index
      %16 = vector.load %arg5[%c0_15, %c0_16] : memref<1x32xf32, #tpu.memory_space<vmem>>, vector<1x32xf32>
      %17 = vector.broadcast %16 : vector<1x32xf32> to vector<256x32xf32>
      %18 = arith.addf %15, %17 : vector<256x32xf32>
      %c0_17 = arith.constant 0 : index
      %c0_18 = arith.constant 0 : index
      %19 = vector.load %arg6[%c0_17, %c0_18] : memref<256x32xf32, #tpu.memory_space<vmem>>, vector<256x32xf32>
      tpu.vector_store %arg6[%c0_17, %c0_18], %18 {strides = array<i32>} : memref<256x32xf32, #tpu.memory_space<vmem>>, vector<256x32xf32>,
    } else {
    }
    return
  }
  func.func @transform_0(%arg0: i32, %arg1: i32) -> (i32, i32) {
    %c0_i32 = arith.constant 0 : i32
    return %arg0, %arg1 : i32, i32
  }
  func.func @transform_1(%arg0: i32, %arg1: i32) -> (i32, i32) {
    %c0_i32 = arith.constant 0 : i32
    %c0_i32_0 = arith.constant 0 : i32
    return %arg1, %c0_i32 : i32, i32
  }
  func.func @transform_2(%arg0: i32, %arg1: i32) -> (i32, i32) {
    %c0_i32 = arith.constant 0 : i32
    %c0_i32_0 = arith.constant 0 : i32
    %c0_i32_1 = arith.constant 0 : i32
    return %c0_i32, %c0_i32_0 : i32, i32
  }
  func.func @transform_3(%arg0: i32, %arg1: i32) -> (i32, i32) {
    %c0_i32 = arith.constant 0 : i32
    %c0_i32_0 = arith.constant 0 : i32
    %c0_i32_1 = arith.constant 0 : i32
    return %c0_i32, %c0_i32_0 : i32, i32
  }
  func.func @transform_4(%arg0: i32, %arg1: i32) -> (i32, i32) {
    %c0_i32 = arith.constant 0 : i32
    %c0_i32_0 = arith.constant 0 : i32
    return %arg0, %c0_i32 : i32, i32
  }
}

module attributes {stable_mosaic.version = 11 : i64} {
  func.func @decoder_kernel(%arg0: i32, %arg1: i32, %arg2: memref<256x16xbf16, #tpu.memory_space<vmem>>, %arg3: memref<512x16xbf16, #tpu.memory_space<vmem>>, %arg4: memref<256x512xbf16, #tpu.memory_space<vmem>>) attributes {dimension_semantics = [#tpu.dimension_semantics<parallel>, #tpu.dimension_semantics<parallel>], iteration_bounds = array<i64: 2, 1>, scalar_prefetch = 0 : i64, scratch_operands = 0 : i64, tpu.core_type = #tpu.core_type<tc>, window_params = [{transform_indices = @transform_0, window_bounds = array<i64: 256, 16>}, {transform_indices = @transform_1, window_bounds = array<i64: 512, 16>}, {transform_indices = @transform_2, window_bounds = array<i64: 256, 512>}]} {
    %c0 = arith.constant 0 : index
    %c0_0 = arith.constant 0 : index
    %0 = vector.load %arg2[%c0, %c0_0] : memref<256x16xbf16, #tpu.memory_space<vmem>>, vector<256x16xbf16>
    %c0_1 = arith.constant 0 : index
    %c0_2 = arith.constant 0 : index
    %1 = vector.load %arg3[%c0_1, %c0_2] : memref<512x16xbf16, #tpu.memory_space<vmem>>, vector<512x16xbf16>
    %cst = arith.constant dense<0.000000e+00> : vector<256x512xf32>
    %2 = tpu.matmul %0, %1, %cst {dimension_numbers = #tpu.dot_dimension_numbers<[1], [1], [0], [0], [0, 0, 1, 0], [], []>} : vector<256x16xbf16>, vector<512x16xbf16>, vector<256x512xf32> -> vector<256x512xf32>
    %3 = arith.truncf %2 : vector<256x512xf32> to vector<256x512xbf16>
    %c0_3 = arith.constant 0 : index
    %c0_4 = arith.constant 0 : index
    %4 = vector.load %arg4[%c0_3, %c0_4] : memref<256x512xbf16, #tpu.memory_space<vmem>>, vector<256x512xbf16>
    tpu.vector_store %arg4[%c0_3, %c0_4], %3 {strides = array<i32>} : memref<256x512xbf16, #tpu.memory_space<vmem>>, vector<256x512xbf16>,
    return
  }
  func.func @transform_0(%arg0: i32, %arg1: i32) -> (i32, i32) {
    %c0_i32 = arith.constant 0 : i32
    %c0_i32_0 = arith.constant 0 : i32
    return %arg0, %c0_i32 : i32, i32
  }
  func.func @transform_1(%arg0: i32, %arg1: i32) -> (i32, i32) {
    %c0_i32 = arith.constant 0 : i32
    %c0_i32_0 = arith.constant 0 : i32
    return %arg1, %c0_i32 : i32, i32
  }
  func.func @transform_2(%arg0: i32, %arg1: i32) -> (i32, i32) {
    %c0_i32 = arith.constant 0 : i32
    return %arg0, %arg1 : i32, i32
  }
}

</mosaic_0001>

<bundles_post_ra>
// kernel: vgae_forward.5
= control target key start
LH: loop header
LB: loop body
LE: loop exit
PB: predicated region body
PF: predicated region fallthrough
CT: control target
= control target key end

     0   :  { %s2054_s9 = smov 0   ;;  %s2056_s10 = smov 0   ;;  %s2370_s0 = inlined_call_operand.vmem [shape: bf16[512,16], index: 0, kind: input, shape index: {}, may-alias: {0,1}]   ;;  %s2371_s1 = inlined_call_operand.vmem [shape: bf16[512,16], index: 1, kind: input, shape index: {}, may-alias: {0,1}]   ;;  %s2372_s2 = inlined_call_operand.vmem [shape: bf16[512,512], index: 2, kind: output, shape index: {}]  }
   0x1   :  { %s2058_s11 = smov 0  }
   0x2 LB: > { %s24_s12 = sadd.s32 1, %s2033_s10  ;;  %p1614_p0 = scmp.ge.s32.totalorder %s2037_s11, 1  ;;  %s2037_s11 = sphi %s2058_s11, %s12_s11   ;;  %s2033_s10 = sphi %s2056_s10, %s2374_s10   ;;  %s2029_s9 = sphi %s2054_s9, %s2373_s9  }
   0x3   : > { %p26_p1 = scmp.ge.s32.totalorder %s24_s12, 2  ;;  %p138_p2 = scmp.lt.s32.totalorder %s2037_s11, 3 }
   0x5   : > { %s2376_s12 = smov (%p26_p1, %s24_s12), 0  ;;  %p139_p3 = pnand %p1614_p0, %p138_p2 }
   0x6   : > { %v1967_v0 = vld [vmem:[%s2371_s1 + $0x40] sm:$0xff] (!%p139_p3)   ;;  %vm531_vm0 = vcmask (!%p139_p3), 130048   ;;  %v1971_v5 = vld [vmem:[%s2371_s1 + $0x48] sm:$0xff] (!%p139_p3)   ;;  %v1975_v11 = vld [vmem:[%s2371_s1 + $0x50] sm:$0xff] (!%p139_p3)   ;;  %s1615_s7 = sshll.u32 (!%p139_p3), %s2029_s9, 5 }
   0x7   : > { %142 = sbr.rel (%p139_p3) target bundleno = 412 (0x19c), region = 28  ;;  %v1968_v1 = vld [vmem:[%s2371_s1 + $0xc0] sm:$0xff] (!%p139_p3)   ;;  %1927 = vmatprep.subr.msk.bf16.mxu0 (!%p139_p3), %vm531_vm0, %v1967_v0  ;;  %v1972_v7 = vld [vmem:[%s2371_s1 + $0xc8] sm:$0xff] (!%p139_p3)   ;;  %v1976_v13 = vld [vmem:[%s2371_s1 + $0xd0] sm:$0xff] (!%p139_p3)   ;;  %p171_p4 = scmp.lt.s32.totalorder (!%p139_p3), %s1615_s7, 63 }
   0x8   : > { %v1969_v2 = vld [vmem:[%s2371_s1] sm:$0xff] (!%p139_p3)   ;;  %1935 = vmatprep.subr.msk.bf16.mxu1 (!%p139_p3), %vm531_vm0, %v1968_v1  ;;  %v1973_v8 = vld [vmem:[%s2371_s1 + $0x8] sm:$0xff] (!%p139_p3)   ;;  %v1977_v14 = vld [vmem:[%s2371_s1 + $0x10] sm:$0xff] (!%p139_p3)  }
   0x9   : > { %v1970_v3 = vld [vmem:[%s2371_s1 + $0x80] sm:$0xff] (!%p139_p3)   ;;  %v581_v4 = vsel (!%p139_p3), %vm531_vm0, %v1969_v2, 0  ;;  %v1974_v9 = vld [vmem:[%s2371_s1 + $0x88] sm:$0xff] (!%p139_p3)   ;;  %v584_v10 = vsel (!%p139_p3), %vm531_vm0, %v1973_v8, 0  ;;  %v1978_v15 = vld [vmem:[%s2371_s1 + $0x90] sm:$0xff] (!%p139_p3)   ;;  %v587_v16 = vsel (!%p139_p3), %vm531_vm0, %v1977_v14, 0 }
   0xa   : > { %1832 = vmatpush3.bf16.xpose.msra.mxu0 (!%p139_p3), %v581_v4  ;;  %v629_v6 = vsel (!%p139_p3), %vm531_vm0, %v1970_v3, 0  ;;  %v632_v12 = vsel (!%p139_p3), %vm531_vm0, %v1974_v9, 0  ;;  %v1979_v17 = vld [vmem:[%s2371_s1 + $0x58] sm:$0xff] (!%p139_p3)   ;;  %v635_v18 = vsel (!%p139_p3), %vm531_vm0, %v1978_v15, 0  ;;  %v1983_v23 = vld [vmem:[%s2371_s1 + $0x60] sm:$0xff] (!%p139_p3)   ;;  %v1987_v30 = vld [vmem:[%s2371_s1 + $0x68] sm:$0xff] (!%p139_p3)  }
   0xb   : > { %1880 = vmatpush3.bf16.xpose.msra.mxu1 (!%p139_p3), %v629_v6  ;;  %1928 = vmatprep.subr.msk.bf16.mxu0 (!%p139_p3), %vm531_vm0, %v1971_v5  ;;  %v1980_v19 = vld [vmem:[%s2371_s1 + $0xd8] sm:$0xff] (!%p139_p3)   ;;  %v1984_v25 = vld [vmem:[%s2371_s1 + $0xe0] sm:$0xff] (!%p139_p3)   ;;  %v1988_v32 = vld [vmem:[%s2371_s1 + $0xe8] sm:$0xff] (!%p139_p3)  }
   0xc   : > { %1936 = vmatprep.subr.msk.bf16.mxu1 (!%p139_p3), %vm531_vm0, %v1972_v7  ;;  %v1981_v20 = vld [vmem:[%s2371_s1 + $0x18] sm:$0xff] (!%p139_p3)   ;;  %v1985_v26 = vld [vmem:[%s2371_s1 + $0x20] sm:$0xff] (!%p139_p3)   ;;  %v1989_v33 = vld [vmem:[%s2371_s1 + $0x28] sm:$0xff] (!%p139_p3)  }
   0xd   : > { %v1982_v21 = vld [vmem:[%s2371_s1 + $0x98] sm:$0xff] (!%p139_p3)   ;;  %v590_v22 = vsel (!%p139_p3), %vm531_vm0, %v1981_v20, 0  ;;  %v1986_v27 = vld [vmem:[%s2371_s1 + $0xa0] sm:$0xff] (!%p139_p3)   ;;  %v593_v29 = vsel (!%p139_p3), %vm531_vm0, %v1985_v26, 0  ;;  %v1990_v34 = vld [vmem:[%s2371_s1 + $0xa8] sm:$0xff] (!%p139_p3)   ;;  %v596_v35 = vsel (!%p139_p3), %vm531_vm0, %v1989_v33, 0 }
   0xe   : > { %s2378_s7 = smov (!%p171_p4, %s1615_s7), 63  ;;  %v638_v24 = vsel %vm531_vm0, %v1982_v21, 0  ;;  %v641_v31 = vsel %vm531_vm0, %v1986_v27, 0  ;;  %v1991_v36 = vld [vmem:[%s2371_s1 + $0x70] sm:$0xff]   ;;  %v644_v37 = vsel %vm531_vm0, %v1990_v34, 0  ;;  %v1995_v42 = vld [vmem:[%s2371_s1 + $0x78] sm:$0xff]  }
   0xf   : > { %s1616_s21 = sshll.u32 %s2378_s7, 2  ;;  %v1992_v38 = vld [vmem:[%s2371_s1 + $0xf0] sm:$0xff]   ;;  %v1996_v44 = vld [vmem:[%s2371_s1 + $0xf8] sm:$0xff]   ;;  %s1766_s6 = sshll.u32 %s2378_s7, 4 }
  0x10   : > { %s2151_s28 = scalar_lea.vmem %s2370_s0, %s1616_s21  ;;  %v1993_v39 = vld [vmem:[%s2371_s1 + $0x30] sm:$0xff]   ;;  %v1997_v45 = vld [vmem:[%s2371_s1 + $0x38] sm:$0xff]   ;;  %s2295_s14 = scalar_lea.vmem %s2372_s2, %s1766_s6 }
  0x11   : > { %v1999_v28 = vld [vmem:[%s2151_s28] sm:$0xff]   ;;  %v1994_v40 = vld [vmem:[%s2371_s1 + $0xb0] sm:$0xff]   ;;  %v599_v41 = vsel %vm531_vm0, %v1993_v39, 0  ;;  %v1998_v46 = vld [vmem:[%s2371_s1 + $0xb8] sm:$0xff]   ;;  %v602_v47 = vsel %vm531_vm0, %v1997_v45, 0 }
  0x12   : > { %1834 = vmatpush3.bf16.xpose.msra.mxu0 %v584_v10  ;;  %1847 = vmatprep.mubr.msk.bf16.mxu0 %vm531_vm0, %v1999_v28  ;;  %v647_v43 = vsel %vm531_vm0, %v1994_v40, 0  ;;  %v650_v48 = vsel %vm531_vm0, %v1998_v46, 0  ;;  %v2000_v49 = vld [vmem:[%s2151_s28 + $0x8] sm:$0xff]   ;;  %v2001_v50 = vld [vmem:[%s2151_s28 + $0x10] sm:$0xff]   ;;  %v2002_v51 = vld [vmem:[%s2151_s28 + $0x18] sm:$0xff]  }
  0x13   : > { %1882 = vmatpush3.bf16.xpose.msra.mxu1 %v632_v12  ;;  %1929 = vmatprep.subr.msk.bf16.mxu0 %vm531_vm0, %v1975_v11  ;;  %v2003_v52 = vld [vmem:[%s2151_s28 + $0x20] sm:$0xff]   ;;  %v2004_v53 = vld [vmem:[%s2151_s28 + $0x28] sm:$0xff]   ;;  %v2005_v54 = vld [vmem:[%s2151_s28 + $0x30] sm:$0xff]  }
  0x14   : > { %1937 = vmatprep.subr.msk.bf16.mxu1 %vm531_vm0, %v1976_v13  ;;  %1895 = vmatprep.mubr.msk.bf16.mxu1 %vm531_vm0, %v1999_v28  ;;  %v2006_v55 = vld [vmem:[%s2151_s28 + $0x38] sm:$0xff]   ;;  %v2007_v56 = vld [vmem:[%s2151_s28 + $0x40] sm:$0xff]   ;;  %v2008_v57 = vld [vmem:[%s2151_s28 + $0x48] sm:$0xff]  }
  0x15   : > { %v2009_v58 = vld [vmem:[%s2151_s28 + $0x50] sm:$0xff]   ;;  %v2010_v59 = vld [vmem:[%s2151_s28 + $0x58] sm:$0xff]   ;;  %v2011_v60 = vld [vmem:[%s2151_s28 + $0x60] sm:$0xff]  }
  0x16   : > { %v2012_v61 = vld [vmem:[%s2151_s28 + $0x68] sm:$0xff]   ;;  %v2013_v62 = vld [vmem:[%s2151_s28 + $0x70] sm:$0xff]   ;;  %v2014_v63 = vld [vmem:[%s2151_s28 + $0x78] sm:$0xff]  }
  0x1a   : > { %1836 = vmatpush3.bf16.xpose.msra.mxu0 %v587_v16 }
  0x1b   : > { %1884 = vmatpush3.bf16.xpose.msra.mxu1 %v635_v18  ;;  %1930 = vmatprep.subr.msk.bf16.mxu0 %vm531_vm0, %v1979_v17 }
  0x1c   : > { %1938 = vmatprep.subr.msk.bf16.mxu1 %vm531_vm0, %v1980_v19 }
  0x22   : > { %1838 = vmatpush3.bf16.xpose.msra.mxu0 %v590_v22 }
  0x23   : > { %1886 = vmatpush3.bf16.xpose.msra.mxu1 %v638_v24  ;;  %1931 = vmatprep.subr.msk.bf16.mxu0 %vm531_vm0, %v1983_v23 }
  0x24   : > { %1939 = vmatprep.subr.msk.bf16.mxu1 %vm531_vm0, %v1984_v25 }
  0x2a   : > { %1840 = vmatpush3.bf16.xpose.msra.mxu0 %v593_v29 }
  0x2b   : > { %1888 = vmatpush3.bf16.xpose.msra.mxu1 %v641_v31  ;;  %1932 = vmatprep.subr.msk.bf16.mxu0 %vm531_vm0, %v1987_v30 }
  0x2c   : > { %1940 = vmatprep.subr.msk.bf16.mxu1 %vm531_vm0, %v1988_v32 }
  0x32   : > { %1842 = vmatpush3.bf16.xpose.msra.mxu0 %v596_v35 }
  0x33   : > { %1890 = vmatpush3.bf16.xpose.msra.mxu1 %v644_v37  ;;  %1933 = vmatprep.subr.msk.bf16.mxu0 %vm531_vm0, %v1991_v36 }
  0x34   : > { %1941 = vmatprep.subr.msk.bf16.mxu1 %vm531_vm0, %v1992_v38 }
  0x3a   : > { %1844 = vmatpush3.bf16.xpose.msra.mxu0 %v599_v41 }
  0x3b   : > { %1892 = vmatpush3.bf16.xpose.msra.mxu1 %v647_v43  ;;  %1934 = vmatprep.subr.msk.bf16.mxu0 %vm531_vm0, %v1995_v42 }
  0x3c   : > { %1942 = vmatprep.subr.msk.bf16.mxu1 %vm531_vm0, %v1996_v44 }
  0x42   : > { %1846 = vmatpush3.bf16.xpose.msra.mxu0 %v602_v47 }
  0x43   : > { %1894 = vmatpush3.bf16.xpose.msra.mxu1 %v650_v48 }
  0x49   : > { %1848 = vmatmul.mubr.msk.bf16.vlgmr.msra.gmra.mrb[0].mxu0 %vm531_vm0, %v1999_v28 }
  0x4a   : > { %1896 = vmatmul.mubr.msk.bf16.vlgmr.msra.gmra.mrb[0].mxu1 %vm531_vm0, %v1999_v28  ;;  %1849 = vmatprep.mubr.msk.bf16.mxu0 %vm531_vm0, %v2000_v49 }
  0x4b   : > { %1897 = vmatprep.mubr.msk.bf16.mxu1 %vm531_vm0, %v2000_v49 }
  0x51   : > { %1850 = vmatmul.mubr.msk.bf16.gmra.mrb[4].mxu0 %vm531_vm0, %v2000_v49 }
  0x52   : > { %1898 = vmatmul.mubr.msk.bf16.gmra.mrb[4].mxu1 %vm531_vm0, %v2000_v49  ;;  %1851 = vmatprep.mubr.msk.bf16.mxu0 %vm531_vm0, %v2001_v50 }
  0x53   : > { %1899 = vmatprep.mubr.msk.bf16.mxu1 %vm531_vm0, %v2001_v50 }
  0x59   : > { %1852 = vmatmul.mubr.msk.bf16.gmra.mrb[8].mxu0 %vm531_vm0, %v2001_v50 }
  0x5a   : > { %1900 = vmatmul.mubr.msk.bf16.gmra.mrb[8].mxu1 %vm531_vm0, %v2001_v50  ;;  %1853 = vmatprep.mubr.msk.bf16.mxu0 %vm531_vm0, %v2002_v51 }
  0x5b   : > { %1901 = vmatprep.mubr.msk.bf16.mxu1 %vm531_vm0, %v2002_v51 }
  0x61   : > { %1854 = vmatmul.mubr.msk.bf16.gmra.mrb[12].mxu0 %vm531_vm0, %v2002_v51 }
  0x62   : > { %1902 = vmatmul.mubr.msk.bf16.gmra.mrb[12].mxu1 %vm531_vm0, %v2002_v51  ;;  %1855 = vmatprep.mubr.msk.bf16.mxu0 %vm531_vm0, %v2003_v52 }
  0x63   : > { %1903 = vmatprep.mubr.msk.bf16.mxu1 %vm531_vm0, %v2003_v52 }
  0x69   : > { %1856 = vmatmul.mubr.msk.bf16.gmra.mrb[16].mxu0 %vm531_vm0, %v2003_v52 }
  0x6a   : > { %1904 = vmatmul.mubr.msk.bf16.gmra.mrb[16].mxu1 %vm531_vm0, %v2003_v52  ;;  %1857 = vmatprep.mubr.msk.bf16.mxu0 %vm531_vm0, %v2004_v53 }
  0x6b   : > { %1905 = vmatprep.mubr.msk.bf16.mxu1 %vm531_vm0, %v2004_v53 }
  0x71   : > { %1858 = vmatmul.mubr.msk.bf16.gmra.mrb[20].mxu0 %vm531_vm0, %v2004_v53 }
  0x72   : > { %1906 = vmatmul.mubr.msk.bf16.gmra.mrb[20].mxu1 %vm531_vm0, %v2004_v53  ;;  %1859 = vmatprep.mubr.msk.bf16.mxu0 %vm531_vm0, %v2005_v54 }
  0x73   : > { %1907 = vmatprep.mubr.msk.bf16.mxu1 %vm531_vm0, %v2005_v54 }
  0x79   : > { %1860 = vmatmul.mubr.msk.bf16.gmra.mrb[24].mxu0 %vm531_vm0, %v2005_v54 }
  0x7a   : > { %1908 = vmatmul.mubr.msk.bf16.gmra.mrb[24].mxu1 %vm531_vm0, %v2005_v54  ;;  %1861 = vmatprep.mubr.msk.bf16.mxu0 %vm531_vm0, %v2006_v55 }
  0x7b   : > { %1909 = vmatprep.mubr.msk.bf16.mxu1 %vm531_vm0, %v2006_v55 }
  0x81   : > { %1862 = vmatmul.mubr.msk.bf16.gmra.mrb[28].mxu0 %vm531_vm0, %v2006_v55 }
  0x82   : > { %1910 = vmatmul.mubr.msk.bf16.gmra.mrb[28].mxu1 %vm531_vm0, %v2006_v55  ;;  %1863 = vmatprep.mubr.msk.bf16.mxu0 %vm531_vm0, %v2007_v56 }
  0x83   : > { %1911 = vmatprep.mubr.msk.bf16.mxu1 %vm531_vm0, %v2007_v56 }
  0x89   : > { %1864 = vmatmul.mubr.msk.bf16.gmra.mrb[32].mxu0 %vm531_vm0, %v2007_v56 }
  0x8a   : > { %1912 = vmatmul.mubr.msk.bf16.gmra.mrb[32].mxu1 %vm531_vm0, %v2007_v56  ;;  %1865 = vmatprep.mubr.msk.bf16.mxu0 %vm531_vm0, %v2008_v57 }
  0x8b   : > { %1913 = vmatprep.mubr.msk.bf16.mxu1 %vm531_vm0, %v2008_v57 }
  0x91   : > { %1866 = vmatmul.mubr.msk.bf16.gmra.mrb[36].mxu0 %vm531_vm0, %v2008_v57 }
  0x92   : > { %1914 = vmatmul.mubr.msk.bf16.gmra.mrb[36].mxu1 %vm531_vm0, %v2008_v57  ;;  %1867 = vmatprep.mubr.msk.bf16.mxu0 %vm531_vm0, %v2009_v58 }
  0x93   : > { %1915 = vmatprep.mubr.msk.bf16.mxu1 %vm531_vm0, %v2009_v58 }
  0x99   : > { %1868 = vmatmul.mubr.msk.bf16.gmra.mrb[40].mxu0 %vm531_vm0, %v2009_v58 }
  0x9a   : > { %1916 = vmatmul.mubr.msk.bf16.gmra.mrb[40].mxu1 %vm531_vm0, %v2009_v58  ;;  %1869 = vmatprep.mubr.msk.bf16.mxu0 %vm531_vm0, %v2010_v59 }
  0x9b   : > { %1917 = vmatprep.mubr.msk.bf16.mxu1 %vm531_vm0, %v2010_v59 }
  0xa1   : > { %1870 = vmatmul.mubr.msk.bf16.gmra.mrb[44].mxu0 %vm531_vm0, %v2010_v59 }
  0xa2   : > { %1918 = vmatmul.mubr.msk.bf16.gmra.mrb[44].mxu1 %vm531_vm0, %v2010_v59  ;;  %1871 = vmatprep.mubr.msk.bf16.mxu0 %vm531_vm0, %v2011_v60 }
  0xa3   : > { %1919 = vmatprep.mubr.msk.bf16.mxu1 %vm531_vm0, %v2011_v60 }
  0xa9   : > { %1872 = vmatmul.mubr.msk.bf16.gmra.mrb[48].mxu0 %vm531_vm0, %v2011_v60 }
  0xaa   : > { %1920 = vmatmul.mubr.msk.bf16.gmra.mrb[48].mxu1 %vm531_vm0, %v2011_v60  ;;  %1873 = vmatprep.mubr.msk.bf16.mxu0 %vm531_vm0, %v2012_v61 }
  0xab   : > { %1921 = vmatprep.mubr.msk.bf16.mxu1 %vm531_vm0, %v2012_v61 }
  0xb1   : > { %1874 = vmatmul.mubr.msk.bf16.gmra.mrb[52].mxu0 %vm531_vm0, %v2012_v61 }
  0xb2   : > { %1922 = vmatmul.mubr.msk.bf16.gmra.mrb[52].mxu1 %vm531_vm0, %v2012_v61  ;;  %1875 = vmatprep.mubr.msk.bf16.mxu0 %vm531_vm0, %v2013_v62 }
  0xb3   : > { %1923 = vmatprep.mubr.msk.bf16.mxu1 %vm531_vm0, %v2013_v62 }
  0xb9   : > { %1876 = vmatmul.mubr.msk.bf16.gmra.mrb[56].mxu0 %vm531_vm0, %v2013_v62 }
  0xba   : > { %1924 = vmatmul.mubr.msk.bf16.gmra.mrb[56].mxu1 %vm531_vm0, %v2013_v62  ;;  %1877 = vmatprep.mubr.msk.bf16.mxu0 %vm531_vm0, %v2014_v63 }
  0xbb   : > { %1925 = vmatprep.mubr.msk.bf16.mxu1 %vm531_vm0, %v2014_v63 }
  0xc1   : > { %1878 = vmatmul.mubr.msk.bf16.gmra.mrb[60].mxu0 %vm531_vm0, %v2014_v63 }
  0xc2   : > { %1926 = vmatmul.mubr.msk.bf16.gmra.mrb[60].mxu1 %vm531_vm0, %v2014_v63 }
 0x11c   : > { %v710_v0 = vpop.f32.mrb[0].mxu0 }
 0x11d   : > { %v903_v1 = vpop.f32.mrb[0].mxu1  ;;  %v712_v2 = vpop.f32.mrb[1].mxu0 }
 0x11e   : > { %v1767_v3 = vpack.c.bf16 %v712_v2, %v710_v0  ;;  %v905_v4 = vpop.f32.mrb[1].mxu1  ;;  %v714_v5 = vpop.f32.mrb[2].mxu0 }
 0x11f   : > { %v1768_v6 = vpack.c.bf16 %v905_v4, %v903_v1  ;;  %v907_v7 = vpop.f32.mrb[2].mxu1  ;;  %v716_v8 = vpop.f32.mrb[3].mxu0 }
 0x120   : > { %1446 = vst [vmem:[%s2295_s14] sm:$0xff] %v1767_v3  ;;  %v1769_v9 = vpack.c.bf16 %v716_v8, %v714_v5  ;;  %v909_v10 = vpop.f32.mrb[3].mxu1 }
 0x121   : > { %1447 = vst [vmem:[%s2295_s14 + $0x8] sm:$0xff] %v1768_v6  ;;  %v1770_v11 = vpack.c.bf16 %v909_v10, %v907_v7 }
 0x122   : > { %1448 = vst [vmem:[%s2295_s14 + $0x10] sm:$0xff] %v1769_v9 }
 0x123   : > { %1449 = vst [vmem:[%s2295_s14 + $0x18] sm:$0xff] %v1770_v11 }
 0x124   : > { %v720_v12 = vpop.f32.mrb[4].mxu0 }
 0x125   : > { %v913_v13 = vpop.f32.mrb[4].mxu1  ;;  %v722_v14 = vpop.f32.mrb[5].mxu0 }
 0x126   : > { %v1771_v15 = vpack.c.bf16 %v722_v14, %v720_v12  ;;  %v915_v16 = vpop.f32.mrb[5].mxu1  ;;  %v724_v17 = vpop.f32.mrb[6].mxu0 }
 0x127   : > { %v1772_v18 = vpack.c.bf16 %v915_v16, %v913_v13  ;;  %v917_v19 = vpop.f32.mrb[6].mxu1  ;;  %v726_v20 = vpop.f32.mrb[7].mxu0 }
 0x128   : > { %1450 = vst [vmem:[%s2295_s14 + $0x20] sm:$0xff] %v1771_v15  ;;  %v1773_v21 = vpack.c.bf16 %v726_v20, %v724_v17  ;;  %v919_v22 = vpop.f32.mrb[7].mxu1 }
 0x129   : > { %1451 = vst [vmem:[%s2295_s14 + $0x28] sm:$0xff] %v1772_v18  ;;  %v1774_v23 = vpack.c.bf16 %v919_v22, %v917_v19 }
 0x12a   : > { %1452 = vst [vmem:[%s2295_s14 + $0x30] sm:$0xff] %v1773_v21 }
 0x12b   : > { %1453 = vst [vmem:[%s2295_s14 + $0x38] sm:$0xff] %v1774_v23 }
 0x12c   : > { %v730_v24 = vpop.f32.mrb[8].mxu0 }
 0x12d   : > { %v923_v25 = vpop.f32.mrb[8].mxu1  ;;  %v732_v26 = vpop.f32.mrb[9].mxu0 }
 0x12e   : > { %v1775_v27 = vpack.c.bf16 %v732_v26, %v730_v24  ;;  %v925_v28 = vpop.f32.mrb[9].mxu1  ;;  %v734_v29 = vpop.f32.mrb[10].mxu0 }
 0x12f   : > { %v1776_v30 = vpack.c.bf16 %v925_v28, %v923_v25  ;;  %v927_v31 = vpop.f32.mrb[10].mxu1  ;;  %v736_v32 = vpop.f32.mrb[11].mxu0 }
 0x130   : > { %1454 = vst [vmem:[%s2295_s14 + $0x40] sm:$0xff] %v1775_v27  ;;  %v1777_v33 = vpack.c.bf16 %v736_v32, %v734_v29  ;;  %v929_v34 = vpop.f32.mrb[11].mxu1 }
 0x131   : > { %1455 = vst [vmem:[%s2295_s14 + $0x48] sm:$0xff] %v1776_v30  ;;  %v1778_v35 = vpack.c.bf16 %v929_v34, %v927_v31 }
 0x132   : > { %1456 = vst [vmem:[%s2295_s14 + $0x50] sm:$0xff] %v1777_v33 }
 0x133   : > { %1457 = vst [vmem:[%s2295_s14 + $0x58] sm:$0xff] %v1778_v35 }
 0x134   : > { %v740_v36 = vpop.f32.mrb[12].mxu0 }
 0x135   : > { %v933_v37 = vpop.f32.mrb[12].mxu1  ;;  %v742_v38 = vpop.f32.mrb[13].mxu0 }
 0x136   : > { %v1779_v39 = vpack.c.bf16 %v742_v38, %v740_v36  ;;  %v935_v40 = vpop.f32.mrb[13].mxu1  ;;  %v744_v41 = vpop.f32.mrb[14].mxu0 }
 0x137   : > { %v1780_v42 = vpack.c.bf16 %v935_v40, %v933_v37  ;;  %v937_v43 = vpop.f32.mrb[14].mxu1  ;;  %v746_v44 = vpop.f32.mrb[15].mxu0 }
 0x138   : > { %1458 = vst [vmem:[%s2295_s14 + $0x60] sm:$0xff] %v1779_v39  ;;  %v1781_v45 = vpack.c.bf16 %v746_v44, %v744_v41  ;;  %v939_v46 = vpop.f32.mrb[15].mxu1 }
 0x139   : > { %1459 = vst [vmem:[%s2295_s14 + $0x68] sm:$0xff] %v1780_v42  ;;  %v1782_v47 = vpack.c.bf16 %v939_v46, %v937_v43 }
 0x13a   : > { %1460 = vst [vmem:[%s2295_s14 + $0x70] sm:$0xff] %v1781_v45 }
 0x13b   : > { %1461 = vst [vmem:[%s2295_s14 + $0x78] sm:$0xff] %v1782_v47 }
 0x13c   : > { %v750_v48 = vpop.f32.mrb[16].mxu0 }
 0x13d   : > { %v943_v49 = vpop.f32.mrb[16].mxu1  ;;  %v752_v50 = vpop.f32.mrb[17].mxu0 }
 0x13e   : > { %v1783_v51 = vpack.c.bf16 %v752_v50, %v750_v48  ;;  %v945_v52 = vpop.f32.mrb[17].mxu1  ;;  %v754_v53 = vpop.f32.mrb[18].mxu0 }
 0x13f   : > { %v1784_v54 = vpack.c.bf16 %v945_v52, %v943_v49  ;;  %v947_v55 = vpop.f32.mrb[18].mxu1  ;;  %v756_v56 = vpop.f32.mrb[19].mxu0 }
 0x140   : > { %1462 = vst [vmem:[%s2295_s14 + $0x80] sm:$0xff] %v1783_v51  ;;  %v1785_v57 = vpack.c.bf16 %v756_v56, %v754_v53  ;;  %v949_v58 = vpop.f32.mrb[19].mxu1 }
 0x141   : > { %1463 = vst [vmem:[%s2295_s14 + $0x88] sm:$0xff] %v1784_v54  ;;  %v1786_v59 = vpack.c.bf16 %v949_v58, %v947_v55 }
 0x142   : > { %1464 = vst [vmem:[%s2295_s14 + $0x90] sm:$0xff] %v1785_v57 }
 0x143   : > { %1465 = vst [vmem:[%s2295_s14 + $0x98] sm:$0xff] %v1786_v59 }
 0x144   : > { %v760_v60 = vpop.f32.mrb[20].mxu0 }
 0x145   : > { %v953_v61 = vpop.f32.mrb[20].mxu1  ;;  %v762_v62 = vpop.f32.mrb[21].mxu0 }
 0x146   : > { %v1787_v63 = vpack.c.bf16 %v762_v62, %v760_v60  ;;  %v955_v0 = vpop.f32.mrb[21].mxu1  ;;  %v764_v1 = vpop.f32.mrb[22].mxu0 }
 0x147   : > { %v1788_v2 = vpack.c.bf16 %v955_v0, %v953_v61  ;;  %v957_v3 = vpop.f32.mrb[22].mxu1  ;;  %v766_v4 = vpop.f32.mrb[23].mxu0 }
 0x148   : > { %1466 = vst [vmem:[%s2295_s14 + $0xa0] sm:$0xff] %v1787_v63  ;;  %v1789_v5 = vpack.c.bf16 %v766_v4, %v764_v1  ;;  %v959_v6 = vpop.f32.mrb[23].mxu1 }
 0x149   : > { %1467 = vst [vmem:[%s2295_s14 + $0xa8] sm:$0xff] %v1788_v2  ;;  %v1790_v7 = vpack.c.bf16 %v959_v6, %v957_v3 }
 0x14a   : > { %1468 = vst [vmem:[%s2295_s14 + $0xb0] sm:$0xff] %v1789_v5 }
 0x14b   : > { %1469 = vst [vmem:[%s2295_s14 + $0xb8] sm:$0xff] %v1790_v7 }
 0x14c   : > { %v770_v8 = vpop.f32.mrb[24].mxu0 }
 0x14d   : > { %v963_v9 = vpop.f32.mrb[24].mxu1  ;;  %v772_v10 = vpop.f32.mrb[25].mxu0 }
 0x14e   : > { %v1791_v11 = vpack.c.bf16 %v772_v10, %v770_v8  ;;  %v965_v12 = vpop.f32.mrb[25].mxu1  ;;  %v774_v13 = vpop.f32.mrb[26].mxu0 }
 0x14f   : > { %v1792_v14 = vpack.c.bf16 %v965_v12, %v963_v9  ;;  %v967_v15 = vpop.f32.mrb[26].mxu1  ;;  %v776_v16 = vpop.f32.mrb[27].mxu0 }
 0x150   : > { %1470 = vst [vmem:[%s2295_s14 + $0xc0] sm:$0xff] %v1791_v11  ;;  %v1793_v17 = vpack.c.bf16 %v776_v16, %v774_v13  ;;  %v969_v18 = vpop.f32.mrb[27].mxu1 }
 0x151   : > { %1471 = vst [vmem:[%s2295_s14 + $0xc8] sm:$0xff] %v1792_v14  ;;  %v1794_v19 = vpack.c.bf16 %v969_v18, %v967_v15 }
 0x152   : > { %1472 = vst [vmem:[%s2295_s14 + $0xd0] sm:$0xff] %v1793_v17 }
 0x153   : > { %1473 = vst [vmem:[%s2295_s14 + $0xd8] sm:$0xff] %v1794_v19 }
 0x154   : > { %v780_v20 = vpop.f32.mrb[28].mxu0 }
 0x155   : > { %v973_v21 = vpop.f32.mrb[28].mxu1  ;;  %v782_v22 = vpop.f32.mrb[29].mxu0 }
 0x156   : > { %v1795_v23 = vpack.c.bf16 %v782_v22, %v780_v20  ;;  %v975_v24 = vpop.f32.mrb[29].mxu1  ;;  %v784_v25 = vpop.f32.mrb[30].mxu0 }
 0x157   : > { %v1796_v26 = vpack.c.bf16 %v975_v24, %v973_v21  ;;  %v977_v27 = vpop.f32.mrb[30].mxu1  ;;  %v786_v28 = vpop.f32.mrb[31].mxu0 }
 0x158   : > { %1474 = vst [vmem:[%s2295_s14 + $0xe0] sm:$0xff] %v1795_v23  ;;  %v1797_v29 = vpack.c.bf16 %v786_v28, %v784_v25  ;;  %v979_v30 = vpop.f32.mrb[31].mxu1 }
 0x159   : > { %1475 = vst [vmem:[%s2295_s14 + $0xe8] sm:$0xff] %v1796_v26  ;;  %v1798_v31 = vpack.c.bf16 %v979_v30, %v977_v27 }
 0x15a   : > { %1476 = vst [vmem:[%s2295_s14 + $0xf0] sm:$0xff] %v1797_v29 }
 0x15b   : > { %1477 = vst [vmem:[%s2295_s14 + $0xf8] sm:$0xff] %v1798_v31 }
 0x15c   : > { %v790_v32 = vpop.f32.mrb[32].mxu0 }
 0x15d   : > { %v983_v33 = vpop.f32.mrb[32].mxu1  ;;  %v792_v34 = vpop.f32.mrb[33].mxu0 }
 0x15e   : > { %v1799_v35 = vpack.c.bf16 %v792_v34, %v790_v32  ;;  %v985_v36 = vpop.f32.mrb[33].mxu1  ;;  %v794_v37 = vpop.f32.mrb[34].mxu0 }
 0x15f   : > { %v1800_v38 = vpack.c.bf16 %v985_v36, %v983_v33  ;;  %v987_v39 = vpop.f32.mrb[34].mxu1  ;;  %v796_v40 = vpop.f32.mrb[35].mxu0 }
 0x160   : > { %1478 = vst [vmem:[%s2295_s14 + $0x100] sm:$0xff] %v1799_v35  ;;  %v1801_v41 = vpack.c.bf16 %v796_v40, %v794_v37  ;;  %v989_v42 = vpop.f32.mrb[35].mxu1 }
 0x161   : > { %1479 = vst [vmem:[%s2295_s14 + $0x108] sm:$0xff] %v1800_v38  ;;  %v1802_v43 = vpack.c.bf16 %v989_v42, %v987_v39 }
 0x162   : > { %1480 = vst [vmem:[%s2295_s14 + $0x110] sm:$0xff] %v1801_v41 }
 0x163   : > { %1481 = vst [vmem:[%s2295_s14 + $0x118] sm:$0xff] %v1802_v43 }
 0x164   : > { %v800_v44 = vpop.f32.mrb[36].mxu0 }
 0x165   : > { %v993_v45 = vpop.f32.mrb[36].mxu1  ;;  %v802_v46 = vpop.f32.mrb[37].mxu0 }
 0x166   : > { %v1803_v47 = vpack.c.bf16 %v802_v46, %v800_v44  ;;  %v995_v48 = vpop.f32.mrb[37].mxu1  ;;  %v804_v49 = vpop.f32.mrb[38].mxu0 }
 0x167   : > { %v1804_v50 = vpack.c.bf16 %v995_v48, %v993_v45  ;;  %v997_v51 = vpop.f32.mrb[38].mxu1  ;;  %v806_v52 = vpop.f32.mrb[39].mxu0 }
 0x168   : > { %1482 = vst [vmem:[%s2295_s14 + $0x120] sm:$0xff] %v1803_v47  ;;  %v1805_v53 = vpack.c.bf16 %v806_v52, %v804_v49  ;;  %v999_v54 = vpop.f32.mrb[39].mxu1 }
 0x169   : > { %1483 = vst [vmem:[%s2295_s14 + $0x128] sm:$0xff] %v1804_v50  ;;  %v1806_v55 = vpack.c.bf16 %v999_v54, %v997_v51 }
 0x16a   : > { %1484 = vst [vmem:[%s2295_s14 + $0x130] sm:$0xff] %v1805_v53 }
 0x16b   : > { %1485 = vst [vmem:[%s2295_s14 + $0x138] sm:$0xff] %v1806_v55 }
 0x16c   : > { %v810_v56 = vpop.f32.mrb[40].mxu0 }
 0x16d   : > { %v1003_v57 = vpop.f32.mrb[40].mxu1  ;;  %v812_v58 = vpop.f32.mrb[41].mxu0 }
 0x16e   : > { %v1807_v59 = vpack.c.bf16 %v812_v58, %v810_v56  ;;  %v1005_v60 = vpop.f32.mrb[41].mxu1  ;;  %v814_v61 = vpop.f32.mrb[42].mxu0 }
 0x16f   : > { %v1808_v62 = vpack.c.bf16 %v1005_v60, %v1003_v57  ;;  %v1007_v63 = vpop.f32.mrb[42].mxu1  ;;  %v816_v0 = vpop.f32.mrb[43].mxu0 }
 0x170   : > { %1486 = vst [vmem:[%s2295_s14 + $0x140] sm:$0xff] %v1807_v59  ;;  %v1809_v1 = vpack.c.bf16 %v816_v0, %v814_v61  ;;  %v1009_v2 = vpop.f32.mrb[43].mxu1 }
 0x171   : > { %1487 = vst [vmem:[%s2295_s14 + $0x148] sm:$0xff] %v1808_v62  ;;  %v1810_v3 = vpack.c.bf16 %v1009_v2, %v1007_v63 }
 0x172   : > { %1488 = vst [vmem:[%s2295_s14 + $0x150] sm:$0xff] %v1809_v1 }
 0x173   : > { %1489 = vst [vmem:[%s2295_s14 + $0x158] sm:$0xff] %v1810_v3 }
 0x174   : > { %v820_v4 = vpop.f32.mrb[44].mxu0 }
 0x175   : > { %v1013_v5 = vpop.f32.mrb[44].mxu1  ;;  %v822_v6 = vpop.f32.mrb[45].mxu0 }
 0x176   : > { %v1811_v7 = vpack.c.bf16 %v822_v6, %v820_v4  ;;  %v1015_v8 = vpop.f32.mrb[45].mxu1  ;;  %v824_v9 = vpop.f32.mrb[46].mxu0 }
 0x177   : > { %v1812_v10 = vpack.c.bf16 %v1015_v8, %v1013_v5  ;;  %v1017_v11 = vpop.f32.mrb[46].mxu1  ;;  %v826_v12 = vpop.f32.mrb[47].mxu0 }
 0x178   : > { %1490 = vst [vmem:[%s2295_s14 + $0x160] sm:$0xff] %v1811_v7  ;;  %v1813_v13 = vpack.c.bf16 %v826_v12, %v824_v9  ;;  %v1019_v14 = vpop.f32.mrb[47].mxu1 }
 0x179   : > { %1491 = vst [vmem:[%s2295_s14 + $0x168] sm:$0xff] %v1812_v10  ;;  %v1814_v15 = vpack.c.bf16 %v1019_v14, %v1017_v11 }
 0x17a   : > { %1492 = vst [vmem:[%s2295_s14 + $0x170] sm:$0xff] %v1813_v13 }
 0x17b   : > { %1493 = vst [vmem:[%s2295_s14 + $0x178] sm:$0xff] %v1814_v15 }
 0x17c   : > { %v830_v16 = vpop.f32.mrb[48].mxu0 }
 0x17d   : > { %v1023_v17 = vpop.f32.mrb[48].mxu1  ;;  %v832_v18 = vpop.f32.mrb[49].mxu0 }
 0x17e   : > { %v1815_v19 = vpack.c.bf16 %v832_v18, %v830_v16  ;;  %v1025_v20 = vpop.f32.mrb[49].mxu1  ;;  %v834_v21 = vpop.f32.mrb[50].mxu0 }
 0x17f   : > { %v1816_v22 = vpack.c.bf16 %v1025_v20, %v1023_v17  ;;  %v1027_v23 = vpop.f32.mrb[50].mxu1  ;;  %v836_v24 = vpop.f32.mrb[51].mxu0 }
 0x180   : > { %1494 = vst [vmem:[%s2295_s14 + $0x180] sm:$0xff] %v1815_v19  ;;  %v1817_v25 = vpack.c.bf16 %v836_v24, %v834_v21  ;;  %v1029_v26 = vpop.f32.mrb[51].mxu1 }
 0x181   : > { %1495 = vst [vmem:[%s2295_s14 + $0x188] sm:$0xff] %v1816_v22  ;;  %v1818_v27 = vpack.c.bf16 %v1029_v26, %v1027_v23 }
 0x182   : > { %1496 = vst [vmem:[%s2295_s14 + $0x190] sm:$0xff] %v1817_v25 }
 0x183   : > { %1497 = vst [vmem:[%s2295_s14 + $0x198] sm:$0xff] %v1818_v27 }
 0x184   : > { %v840_v28 = vpop.f32.mrb[52].mxu0 }
 0x185   : > { %v1033_v29 = vpop.f32.mrb[52].mxu1  ;;  %v842_v30 = vpop.f32.mrb[53].mxu0 }
 0x186   : > { %v1819_v31 = vpack.c.bf16 %v842_v30, %v840_v28  ;;  %v1035_v32 = vpop.f32.mrb[53].mxu1  ;;  %v844_v33 = vpop.f32.mrb[54].mxu0 }
 0x187   : > { %v1820_v34 = vpack.c.bf16 %v1035_v32, %v1033_v29  ;;  %v1037_v35 = vpop.f32.mrb[54].mxu1  ;;  %v846_v36 = vpop.f32.mrb[55].mxu0 }
 0x188   : > { %1498 = vst [vmem:[%s2295_s14 + $0x1a0] sm:$0xff] %v1819_v31  ;;  %v1821_v37 = vpack.c.bf16 %v846_v36, %v844_v33  ;;  %v1039_v38 = vpop.f32.mrb[55].mxu1 }
 0x189   : > { %1499 = vst [vmem:[%s2295_s14 + $0x1a8] sm:$0xff] %v1820_v34  ;;  %v1822_v39 = vpack.c.bf16 %v1039_v38, %v1037_v35 }
 0x18a   : > { %1500 = vst [vmem:[%s2295_s14 + $0x1b0] sm:$0xff] %v1821_v37 }
 0x18b   : > { %1501 = vst [vmem:[%s2295_s14 + $0x1b8] sm:$0xff] %v1822_v39 }
 0x18c   : > { %v850_v40 = vpop.f32.mrb[56].mxu0 }
 0x18d   : > { %v1043_v41 = vpop.f32.mrb[56].mxu1  ;;  %v852_v42 = vpop.f32.mrb[57].mxu0 }
 0x18e   : > { %v1823_v43 = vpack.c.bf16 %v852_v42, %v850_v40  ;;  %v1045_v44 = vpop.f32.mrb[57].mxu1  ;;  %v854_v45 = vpop.f32.mrb[58].mxu0 }
 0x18f   : > { %v1824_v46 = vpack.c.bf16 %v1045_v44, %v1043_v41  ;;  %v1047_v47 = vpop.f32.mrb[58].mxu1  ;;  %v856_v48 = vpop.f32.mrb[59].mxu0 }
 0x190   : > { %1502 = vst [vmem:[%s2295_s14 + $0x1c0] sm:$0xff] %v1823_v43  ;;  %v1825_v49 = vpack.c.bf16 %v856_v48, %v854_v45  ;;  %v1049_v50 = vpop.f32.mrb[59].mxu1 }
 0x191   : > { %1503 = vst [vmem:[%s2295_s14 + $0x1c8] sm:$0xff] %v1824_v46  ;;  %v1826_v51 = vpack.c.bf16 %v1049_v50, %v1047_v47 }
 0x192   : > { %1504 = vst [vmem:[%s2295_s14 + $0x1d0] sm:$0xff] %v1825_v49 }
 0x193   : > { %1505 = vst [vmem:[%s2295_s14 + $0x1d8] sm:$0xff] %v1826_v51 }
 0x194   : > { %v860_v52 = vpop.f32.mrb[60].mxu0 }
 0x195   : > { %v1053_v53 = vpop.f32.mrb[60].mxu1  ;;  %v862_v54 = vpop.f32.mrb[61].mxu0 }
 0x196   : > { %v1827_v55 = vpack.c.bf16 %v862_v54, %v860_v52  ;;  %v1055_v56 = vpop.f32.mrb[61].mxu1  ;;  %v864_v57 = vpop.f32.mrb[62].mxu0 }
 0x197   : > { %v1828_v58 = vpack.c.bf16 %v1055_v56, %v1053_v53  ;;  %v1057_v59 = vpop.f32.mrb[62].mxu1  ;;  %v866_v60 = vpop.f32.mrb[63].mxu0 }
 0x198   : > { %1506 = vst [vmem:[%s2295_s14 + $0x1e0] sm:$0xff] %v1827_v55  ;;  %v1829_v61 = vpack.c.bf16 %v866_v60, %v864_v57  ;;  %v1059_v62 = vpop.f32.mrb[63].mxu1 }
 0x199   : > { %1507 = vst [vmem:[%s2295_s14 + $0x1e8] sm:$0xff] %v1828_v58  ;;  %v1830_v63 = vpack.c.bf16 %v1059_v62, %v1057_v59 }
 0x19a   : > { %1508 = vst [vmem:[%s2295_s14 + $0x1f0] sm:$0xff] %v1829_v61 }
 0x19b   : > { %1509 = vst [vmem:[%s2295_s14 + $0x1f8] sm:$0xff] %v1830_v63 }
 0x19c PF: > { %s12_s11 = sadd.s32 1, %s2037_s11   ;;  %s2373_s9 = smov %s2033_s10 }
 0x19d   : > { %p9_p5 = scmp.ge.s32.totalorder %s12_s11, 4   ;;  %s2374_s10 = smov %s2376_s12 }
 0x19f   :  { %11 = sbr.rel (!%p9_p5) target bundleno = 2 (0x2), region = 61 }

// kernel: vgae_forward.4
= control target key start
LH: loop header
LB: loop body
LE: loop exit
PB: predicated region body
PF: predicated region fallthrough
CT: control target
= control target key end

     0   :  { %s2380_s15 = smov 0   ;;  %s2382_s16 = smov 0   ;;  %s2846_s0 = inlined_call_operand.vmem [shape: bf16[512,512], index: 0, kind: input, shape index: {}]   ;;  %s2847_s1 = inlined_call_operand.vmem [shape: bf16[512,32], index: 1, kind: input, shape index: {}]   ;;  %s2848_s2 = inlined_call_operand.vmem [shape: bf16[32,32], index: 2, kind: input, shape index: {}]   ;;  %s2849_s3 = inlined_call_operand.vmem [shape: f32[1,32], index: 3, kind: input, shape index: {}]   ;;  %s2850_s4 = inlined_call_operand.vmem [shape: f32[512,32], index: 4, kind: output, shape index: {}]  }
   0x1   :  { %s2384_s17 = smov 0  }
   0x2 LB: > { %s26_s18 = sadd.s32 1, %s2348_s16  ;;  %p1757_p0 = scmp.ge.s32.totalorder %s2352_s17, 1  ;;  %s2352_s17 = sphi %s2384_s17, %s14_s17   ;;  %s2348_s16 = sphi %s2382_s16, %s2852_s16   ;;  %s2344_s15 = sphi %s2380_s15, %s2851_s15  }
   0x3   : > { %p28_p1 = scmp.ge.s32.totalorder %s26_s18, 2  ;;  %p194_p2 = scmp.lt.s32.totalorder %s2352_s17, 3 }
   0x5   : > { %s2854_s18 = smov (%p28_p1, %s26_s18), 0  ;;  %p195_p3 = pnand %p1757_p0, %p194_p2 }
   0x6   : > { %v2200_v0 = vld [vmem:[%s2847_s1 + $0x40] sm:$0xff] (!%p195_p3)   ;;  %s1758_s21 = sshll.u32 (!%p195_p3), %s2344_s15, 5  ;;  %v2202_v2 = vld [vmem:[%s2847_s1 + $0x48] sm:$0xff] (!%p195_p3)   ;;  %v2204_v4 = vld [vmem:[%s2847_s1 + $0x50] sm:$0xff] (!%p195_p3)   ;;  %vm259_vm0 = vcmask (!%p195_p3), 261120  }
   0x7   : > { %198 = sbr.rel (%p195_p3) target bundleno = 640 (0x280), region = 36  ;;  %v2201_v1 = vld [vmem:[%s2847_s1] sm:$0xff] (!%p195_p3)   ;;  %2159 = vmatprep.subr.bf16.mxu1 (!%p195_p3), %v2200_v0  ;;  %1881 = vmatprep.subr.bf16.mxu0 (!%p195_p3), %v2200_v0  ;;  %v2203_v3 = vld [vmem:[%s2847_s1 + $0x8] sm:$0xff] (!%p195_p3)   ;;  %p232_p4 = scmp.lt.s32.totalorder (!%p195_p3), %s1758_s21, 63  ;;  %v2205_v5 = vld [vmem:[%s2847_s1 + $0x10] sm:$0xff] (!%p195_p3)  }
   0x8   : > { %2167 = vmatpush3.bf16.msra.mxu1 (!%p195_p3), %v2201_v1  ;;  %1882 = vmatpush3.bf16.msra.mxu0 (!%p195_p3), %v2201_v1  ;;  %v2206_v6 = vld [vmem:[%s2847_s1 + $0x58] sm:$0xff] (!%p195_p3)   ;;  %v2208_v8 = vld [vmem:[%s2847_s1 + $0x60] sm:$0xff] (!%p195_p3)   ;;  %v2210_v10 = vld [vmem:[%s2847_s1 + $0x68] sm:$0xff] (!%p195_p3)  }
   0x9   : > { %2160 = vmatprep.subr.bf16.mxu1 (!%p195_p3), %v2202_v2  ;;  %1883 = vmatprep.subr.bf16.mxu0 (!%p195_p3), %v2202_v2  ;;  %v2207_v7 = vld [vmem:[%s2847_s1 + $0x18] sm:$0xff] (!%p195_p3)   ;;  %v2209_v9 = vld [vmem:[%s2847_s1 + $0x20] sm:$0xff] (!%p195_p3)   ;;  %v2211_v12 = vld [vmem:[%s2847_s1 + $0x28] sm:$0xff] (!%p195_p3)  }
   0xa   : > { %v2212_v13 = vld [vmem:[%s2847_s1 + $0x70] sm:$0xff] (!%p195_p3)   ;;  %v2214_v15 = vld [vmem:[%s2847_s1 + $0x78] sm:$0xff] (!%p195_p3)   ;;  %v2219_v17 = vld [vmem:[%s2847_s1 + $0xc0] sm:$0xff] (!%p195_p3)  }
   0xb   : > { %v2213_v14 = vld [vmem:[%s2847_s1 + $0x30] sm:$0xff] (!%p195_p3)   ;;  %v2215_v16 = vld [vmem:[%s2847_s1 + $0x38] sm:$0xff] (!%p195_p3)   ;;  %v2220_v19 = vld [vmem:[%s2847_s1 + $0x80] sm:$0xff] (!%p195_p3)  }
   0xc   : > { %2168 = vmatpush3.bf16.msra.mxu1 (!%p195_p3), %v2203_v3  ;;  %1884 = vmatpush3.bf16.msra.mxu0 (!%p195_p3), %v2203_v3  ;;  %v2221_v21 = vld [vmem:[%s2847_s1 + $0xc8] sm:$0xff] (!%p195_p3)   ;;  %v2226_v24 = vld [vmem:[%s2847_s1 + $0xd0] sm:$0xff] (!%p195_p3)   ;;  %v2228_v28 = vld [vmem:[%s2847_s1 + $0xd8] sm:$0xff] (!%p195_p3)  }
   0xd   : > { %2161 = vmatprep.subr.bf16.mxu1 (!%p195_p3), %v2204_v4  ;;  %1885 = vmatprep.subr.bf16.mxu0 (!%p195_p3), %v2204_v4  ;;  %v2222_v22 = vld [vmem:[%s2847_s1 + $0x88] sm:$0xff] (!%p195_p3)   ;;  %v2227_v25 = vld [vmem:[%s2847_s1 + $0x90] sm:$0xff] (!%p195_p3)   ;;  %v2229_v31 = vld [vmem:[%s2847_s1 + $0x98] sm:$0xff] (!%p195_p3)  }
   0xe   : > { %s2856_s21 = smov (!%p232_p4, %s1758_s21), 63  ;;  %v2233_v33 = vld [vmem:[%s2847_s1 + $0xe0] sm:$0xff]   ;;  %v2235_v38 = vld [vmem:[%s2847_s1 + $0xe8] sm:$0xff]   ;;  %v2240_v41 = vld [vmem:[%s2847_s1 + $0xf0] sm:$0xff]  }
   0xf   : > { %s1880_s10 = sshll.u32 %s2856_s21, 4  ;;  %v2234_v36 = vld [vmem:[%s2847_s1 + $0xa0] sm:$0xff]   ;;  %v2236_v39 = vld [vmem:[%s2847_s1 + $0xa8] sm:$0xff]   ;;  %v2241_v44 = vld [vmem:[%s2847_s1 + $0xb0] sm:$0xff]  }
  0x10   : > { %2169 = vmatpush3.bf16.msra.mxu1 %v2205_v5  ;;  %1886 = vmatpush3.bf16.msra.mxu0 %v2205_v5  ;;  %s2431_s15 = scalar_lea.vmem %s2846_s0, %s1880_s10  ;;  %v2242_v46 = vld [vmem:[%s2847_s1 + $0xf8] sm:$0xff]  }
  0x11   : > { %2162 = vmatprep.subr.bf16.mxu1 %v2206_v6  ;;  %1887 = vmatprep.subr.bf16.mxu0 %v2206_v6  ;;  %v2218_v11 = vld [vmem:[%s2431_s15 + $0x184] ss:$16 sps:$4 sm:$0xff]   ;;  %v2216_v18 = vld [vmem:[%s2431_s15 + $0x180] ss:$16 sps:$4 sm:$0xff]   ;;  %v2249_v45 = vld [vmem:[%s2431_s15 + $0xc] ss:$16 sps:$4 sm:$0xff]  }
  0x12   : > { %1092 = vmatprep.mubr.bf16.mxu1 %v2218_v11  ;;  %v2223_v20 = vld [vmem:[%s2431_s15 + $0x1a4] ss:$16 sps:$4 sm:$0xff]   ;;  %v2225_v23 = vld [vmem:[%s2431_s15 + $0x1a0] ss:$16 sps:$4 sm:$0xff]   ;;  %v2243_v47 = vld [vmem:[%s2847_s1 + $0xb8] sm:$0xff]  }
  0x13   : > { %v2244_v26 = vld [vmem:[%s2431_s15] ss:$16 sps:$4 sm:$0xff]   ;;  %v2246_v27 = vld [vmem:[%s2431_s15 + $0x4] ss:$16 sps:$4 sm:$0xff]   ;;  %v2247_v48 = vld [vmem:[%s2431_s15 + $0x8] ss:$16 sps:$4 sm:$0xff]  }
  0x14   : > { %2170 = vmatpush3.bf16.msra.mxu1 %v2207_v7  ;;  %1888 = vmatpush3.bf16.msra.mxu0 %v2207_v7  ;;  %v2230_v29 = vld [vmem:[%s2431_s15 + $0x1c4] ss:$16 sps:$4 sm:$0xff]   ;;  %v2232_v32 = vld [vmem:[%s2431_s15 + $0x1c0] ss:$16 sps:$4 sm:$0xff]   ;;  %v2252_v51 = vld [vmem:[%s2431_s15 + $0x2c] ss:$16 sps:$4 sm:$0xff]  }
  0x15   : > { %2163 = vmatprep.subr.bf16.mxu1 %v2208_v8  ;;  %1889 = vmatprep.subr.bf16.mxu0 %v2208_v8  ;;  %v2250_v30 = vld [vmem:[%s2431_s15 + $0x24] ss:$16 sps:$4 sm:$0xff]   ;;  %v2254_v34 = vld [vmem:[%s2431_s15 + $0x20] ss:$16 sps:$4 sm:$0xff]   ;;  %v2255_v53 = vld [vmem:[%s2431_s15 + $0x28] ss:$16 sps:$4 sm:$0xff]  }
  0x16   : > { %996 = vmatprep.mubr.bf16.mxu0 %v2246_v27  ;;  %v2256_v35 = vld [vmem:[%s2431_s15 + $0x44] ss:$16 sps:$4 sm:$0xff]   ;;  %v2239_v40 = vld [vmem:[%s2431_s15 + $0x1e0] ss:$16 sps:$4 sm:$0xff]   ;;  %v2258_v55 = vld [vmem:[%s2431_s15 + $0x4c] ss:$16 sps:$4 sm:$0xff]  }
  0x17   : > { %v2237_v37 = vld [vmem:[%s2431_s15 + $0x1e4] ss:$16 sps:$4 sm:$0xff]   ;;  %v2260_v42 = vld [vmem:[%s2431_s15 + $0x40] ss:$16 sps:$4 sm:$0xff]   ;;  %v2261_v57 = vld [vmem:[%s2431_s15 + $0x48] ss:$16 sps:$4 sm:$0xff]  }
  0x18   : > { %2171 = vmatpush3.bf16.msra.mxu1 %v2209_v9  ;;  %1890 = vmatpush3.bf16.msra.mxu0 %v2209_v9  ;;  %v2262_v43 = vld [vmem:[%s2431_s15 + $0x64] ss:$16 sps:$4 sm:$0xff]   ;;  %v2266_v49 = vld [vmem:[%s2431_s15 + $0x60] ss:$16 sps:$4 sm:$0xff]   ;;  %v2264_v59 = vld [vmem:[%s2431_s15 + $0x6c] ss:$16 sps:$4 sm:$0xff]  }
  0x19   : > { %2164 = vmatprep.subr.bf16.mxu1 %v2210_v10  ;;  %1891 = vmatprep.subr.bf16.mxu0 %v2210_v10  ;;  %v2268_v50 = vld [vmem:[%s2431_s15 + $0x84] ss:$16 sps:$4 sm:$0xff]   ;;  %v2272_v52 = vld [vmem:[%s2431_s15 + $0x80] ss:$16 sps:$4 sm:$0xff]   ;;  %v2267_v61 = vld [vmem:[%s2431_s15 + $0x68] ss:$16 sps:$4 sm:$0xff]  }
  0x1a   : > { %v2274_v54 = vld [vmem:[%s2431_s15 + $0xa4] ss:$16 sps:$4 sm:$0xff]   ;;  %v2278_v56 = vld [vmem:[%s2431_s15 + $0xa0] ss:$16 sps:$4 sm:$0xff]   ;;  %v2270_v63 = vld [vmem:[%s2431_s15 + $0x8c] ss:$16 sps:$4 sm:$0xff]  }
  0x1b   : > { %v2280_v58 = vld [vmem:[%s2431_s15 + $0xc4] ss:$16 sps:$4 sm:$0xff]   ;;  %v2284_v60 = vld [vmem:[%s2431_s15 + $0xc0] ss:$16 sps:$4 sm:$0xff]   ;;  %v2273_v1 = vld [vmem:[%s2431_s15 + $0x88] ss:$16 sps:$4 sm:$0xff]  }
  0x1c   : > { %2172 = vmatpush3.bf16.msra.mxu1 %v2211_v12  ;;  %1892 = vmatpush3.bf16.msra.mxu0 %v2211_v12  ;;  %v2286_v62 = vld [vmem:[%s2431_s15 + $0xe4] ss:$16 sps:$4 sm:$0xff]   ;;  %v2290_v0 = vld [vmem:[%s2431_s15 + $0xe0] ss:$16 sps:$4 sm:$0xff]   ;;  %v2276_v3 = vld [vmem:[%s2431_s15 + $0xac] ss:$16 sps:$4 sm:$0xff]  }
  0x1d   : > { %2165 = vmatprep.subr.bf16.mxu1 %v2212_v13  ;;  %1893 = vmatprep.subr.bf16.mxu0 %v2212_v13  ;;  %v2292_v2 = vld [vmem:[%s2431_s15 + $0x104] ss:$16 sps:$4 sm:$0xff]   ;;  %v2296_v4 = vld [vmem:[%s2431_s15 + $0x100] ss:$16 sps:$4 sm:$0xff]   ;;  %v2279_v5 = vld [vmem:[%s2431_s15 + $0xa8] ss:$16 sps:$4 sm:$0xff]  }
  0x1e   : > { %v2298_v6 = vld [vmem:[%s2431_s15 + $0x124] ss:$16 sps:$4 sm:$0xff]   ;;  %v2282_v7 = vld [vmem:[%s2431_s15 + $0xcc] ss:$16 sps:$4 sm:$0xff]   ;;  %v2302_v8 = vld [vmem:[%s2431_s15 + $0x120] ss:$16 sps:$4 sm:$0xff]  }
  0x1f   : > { %v2285_v9 = vld [vmem:[%s2431_s15 + $0xc8] ss:$16 sps:$4 sm:$0xff]   ;;  %v2304_v10 = vld [vmem:[%s2431_s15 + $0x144] ss:$16 sps:$4 sm:$0xff]   ;;  %v2288_v11 = vld [vmem:[%s2431_s15 + $0xec] ss:$16 sps:$4 sm:$0xff]  }
  0x20   : > { %2173 = vmatpush3.bf16.msra.mxu1 %v2213_v14  ;;  %1894 = vmatpush3.bf16.msra.mxu0 %v2213_v14  ;;  %v2308_v12 = vld [vmem:[%s2431_s15 + $0x140] ss:$16 sps:$4 sm:$0xff]   ;;  %v2291_v13 = vld [vmem:[%s2431_s15 + $0xe8] ss:$16 sps:$4 sm:$0xff]   ;;  %v2310_v14 = vld [vmem:[%s2431_s15 + $0x164] ss:$16 sps:$4 sm:$0xff]  }
  0x21   : > { %2166 = vmatprep.subr.bf16.mxu1 %v2214_v15  ;;  %1895 = vmatprep.subr.bf16.mxu0 %v2214_v15  ;;  %v2294_v15 = vld [vmem:[%s2431_s15 + $0x10c] ss:$16 sps:$4 sm:$0xff]   ;;  %v2318_v27 = vld [vmem:[%s2431_s15 + $0x188] ss:$16 sps:$4 sm:$0xff]  }
  0x24   : > { %2174 = vmatpush3.bf16.msra.mxu1 %v2215_v16  ;;  %1896 = vmatpush3.bf16.msra.mxu0 %v2215_v16  ;;  %v2314_v16 = vld [vmem:[%s2431_s15 + $0x160] ss:$16 sps:$4 sm:$0xff]  }
  0x25   : > { %1993 = vmatprep.subr.bf16.mxu1 %v2219_v17  ;;  %v2297_v17 = vld [vmem:[%s2431_s15 + $0x108] ss:$16 sps:$4 sm:$0xff]  }
  0x27   : > { %1093 = vmatmul.mubr.bf16.vlgmr.msra.gmra.mrb[0].mxu1 %v2216_v18  ;;  %997 = vmatmul.mubr.bf16.vlgmr.msra.gmra.mrb[0].mxu0 %v2244_v26  ;;  %v2300_v18 = vld [vmem:[%s2431_s15 + $0x12c] ss:$16 sps:$4 sm:$0xff]  }
  0x28   : > { %1994 = vmatpush3.bf16.msra.mxu1 %v2220_v19  ;;  %1100 = vmatprep.mubr.bf16.mxu1 %v2223_v20  ;;  %v2303_v19 = vld [vmem:[%s2431_s15 + $0x128] ss:$16 sps:$4 sm:$0xff]   ;;  %v2306_v20 = vld [vmem:[%s2431_s15 + $0x14c] ss:$16 sps:$4 sm:$0xff]  }
  0x29   : > { %1995 = vmatprep.subr.bf16.mxu1 %v2221_v21  ;;  %1004 = vmatprep.mubr.bf16.mxu0 %v2250_v30  ;;  %v2328_v21 = vld [vmem:[%s2848_s2] sm:$0xff]   ;;  %v2316_v26 = vld [vmem:[%s2431_s15 + $0x18c] ss:$16 sps:$4 sm:$0xff]  }
  0x2a   : > { %2123 = vmatprep.subr.bf16.mxu0 %v2328_v21  ;;  %v2322_v30 = vld [vmem:[%s2431_s15 + $0x1cc] ss:$16 sps:$4 sm:$0xff]  }
  0x2b   : > { %2124 = vmatpush3.bf16.msra.mxu0 %v2328_v21 }
  0x2c   : > { %1996 = vmatpush3.bf16.msra.mxu1 %v2222_v22  ;;  %v2309_v22 = vld [vmem:[%s2431_s15 + $0x148] ss:$16 sps:$4 sm:$0xff]  }
  0x2d   : > { %1997 = vmatprep.subr.bf16.mxu1 %v2226_v24  ;;  %v2354_v24 = vmov 0.0  }
  0x2e   : > { %260 = vst.msk [vmem:[#allocation2] sm:$0xff] %vm259_vm0, %v2354_v24  ;;  %261 = vst.msk [vmem:[#allocation2 + $0x8] sm:$0xff] %vm259_vm0, %v2354_v24 }
  0x2f   : > { %1101 = vmatmul.mubr.bf16.gmra.mrb[4].mxu1 %v2225_v23  ;;  %1005 = vmatmul.mubr.bf16.gmra.mrb[4].mxu0 %v2254_v34  ;;  %v2312_v23 = vld [vmem:[%s2431_s15 + $0x16c] ss:$16 sps:$4 sm:$0xff]   ;;  %262 = vst.msk [vmem:[#allocation2 + $0x10] sm:$0xff] %vm259_vm0, %v2354_v24  ;;  %263 = vst.msk [vmem:[#allocation2 + $0x18] sm:$0xff] %vm259_vm0, %v2354_v24  ;;  %v2327_v34 = vld [vmem:[%s2431_s15 + $0x1e8] ss:$16 sps:$4 sm:$0xff]  }
  0x30   : > { %1998 = vmatpush3.bf16.msra.mxu1 %v2227_v25  ;;  %1108 = vmatprep.mubr.bf16.mxu1 %v2230_v29  ;;  %264 = vst.msk [vmem:[#allocation2 + $0x20] sm:$0xff] %vm259_vm0, %v2354_v24  ;;  %265 = vst.msk [vmem:[#allocation2 + $0x28] sm:$0xff] %vm259_vm0, %v2354_v24  ;;  %v2315_v25 = vld [vmem:[%s2431_s15 + $0x168] ss:$16 sps:$4 sm:$0xff]  }
  0x31   : > { %1999 = vmatprep.subr.bf16.mxu1 %v2228_v28  ;;  %1012 = vmatprep.mubr.bf16.mxu0 %v2256_v35  ;;  %266 = vst.msk [vmem:[#allocation2 + $0x30] sm:$0xff] %vm259_vm0, %v2354_v24  ;;  %267 = vst.msk [vmem:[#allocation2 + $0x38] sm:$0xff] %vm259_vm0, %v2354_v24  ;;  %v2319_v28 = vld [vmem:[%s2431_s15 + $0x1ac] ss:$16 sps:$4 sm:$0xff]   ;;  %v2321_v29 = vld [vmem:[%s2431_s15 + $0x1a8] ss:$16 sps:$4 sm:$0xff]  }
  0x32   : > { %268 = vst.msk [vmem:[#allocation2 + $0x40] sm:$0xff] %vm259_vm0, %v2354_v24  ;;  %269 = vst.msk [vmem:[#allocation2 + $0x48] sm:$0xff] %vm259_vm0, %v2354_v24 }
  0x33   : > { %270 = vst.msk [vmem:[#allocation2 + $0x50] sm:$0xff] %vm259_vm0, %v2354_v24  ;;  %271 = vst.msk [vmem:[#allocation2 + $0x58] sm:$0xff] %vm259_vm0, %v2354_v24 }
  0x34   : > { %2000 = vmatpush3.bf16.msra.mxu1 %v2229_v31  ;;  %272 = vst.msk [vmem:[#allocation2 + $0x60] sm:$0xff] %vm259_vm0, %v2354_v24  ;;  %273 = vst.msk [vmem:[#allocation2 + $0x68] sm:$0xff] %vm259_vm0, %v2354_v24  ;;  %v2329_v31 = vld [vmem:[%s2848_s2 + $0x8] sm:$0xff]  }
  0x35   : > { %2001 = vmatprep.subr.bf16.mxu1 %v2233_v33  ;;  %274 = vst.msk [vmem:[#allocation2 + $0x70] sm:$0xff] %vm259_vm0, %v2354_v24  ;;  %275 = vst.msk [vmem:[#allocation2 + $0x78] sm:$0xff] %vm259_vm0, %v2354_v24  ;;  %2125 = vmatprep.subr.bf16.mxu0 %v2329_v31  ;;  %v2325_v33 = vld [vmem:[%s2431_s15 + $0x1ec] ss:$16 sps:$4 sm:$0xff]  }
  0x36   : > { %276 = vst.msk [vmem:[#allocation2 + $0x80] sm:$0xff] %vm259_vm0, %v2354_v24  ;;  %277 = vst.msk [vmem:[#allocation2 + $0x88] sm:$0xff] %vm259_vm0, %v2354_v24  ;;  %2126 = vmatpush3.bf16.msra.mxu0 %v2329_v31 }
  0x37   : > { %1109 = vmatmul.mubr.bf16.gmra.mrb[8].mxu1 %v2232_v32  ;;  %1013 = vmatmul.mubr.bf16.gmra.mrb[8].mxu0 %v2260_v42  ;;  %278 = vst.msk [vmem:[#allocation2 + $0x90] sm:$0xff] %vm259_vm0, %v2354_v24  ;;  %279 = vst.msk [vmem:[#allocation2 + $0x98] sm:$0xff] %vm259_vm0, %v2354_v24  ;;  %v2324_v32 = vld [vmem:[%s2431_s15 + $0x1c8] ss:$16 sps:$4 sm:$0xff]   ;;  %s1762_s15 = sshll.u32 %s2856_s21, 3 }
  0x38   : > { %2002 = vmatpush3.bf16.msra.mxu1 %v2234_v36  ;;  %1116 = vmatprep.mubr.bf16.mxu1 %v2237_v37  ;;  %280 = vst.msk [vmem:[#allocation2 + $0xa0] sm:$0xff] %vm259_vm0, %v2354_v24  ;;  %281 = vst.msk [vmem:[#allocation2 + $0xa8] sm:$0xff] %vm259_vm0, %v2354_v24  ;;  %s2739_s6 = scalar_lea.vmem %s2850_s4, %s1762_s15 }
  0x39   : > { %2003 = vmatprep.subr.bf16.mxu1 %v2235_v38  ;;  %1020 = vmatprep.mubr.bf16.mxu0 %v2262_v43  ;;  %282 = vst.msk [vmem:[#allocation2 + $0xb0] sm:$0xff] %vm259_vm0, %v2354_v24  ;;  %283 = vst.msk [vmem:[#allocation2 + $0xb8] sm:$0xff] %vm259_vm0, %v2354_v24 }
  0x3a   : > { %284 = vst.msk [vmem:[#allocation2 + $0xc0] sm:$0xff] %vm259_vm0, %v2354_v24  ;;  %285 = vst.msk [vmem:[#allocation2 + $0xc8] sm:$0xff] %vm259_vm0, %v2354_v24 }
  0x3b   : > { %286 = vst.msk [vmem:[#allocation2 + $0xd0] sm:$0xff] %vm259_vm0, %v2354_v24  ;;  %287 = vst.msk [vmem:[#allocation2 + $0xd8] sm:$0xff] %vm259_vm0, %v2354_v24 }
  0x3c   : > { %2004 = vmatpush3.bf16.msra.mxu1 %v2236_v39  ;;  %288 = vst.msk [vmem:[#allocation2 + $0xe0] sm:$0xff] %vm259_vm0, %v2354_v24  ;;  %289 = vst.msk [vmem:[#allocation2 + $0xe8] sm:$0xff] %vm259_vm0, %v2354_v24 }
  0x3d   : > { %2005 = vmatprep.subr.bf16.mxu1 %v2240_v41  ;;  %290 = vst.msk [vmem:[#allocation2 + $0xf0] sm:$0xff] %vm259_vm0, %v2354_v24  ;;  %291 = vst.msk [vmem:[#allocation2 + $0xf8] sm:$0xff] %vm259_vm0, %v2354_v24 }
  0x3f   : > { %1117 = vmatmul.mubr.bf16.gmra.mrb[12].mxu1 %v2239_v40  ;;  %1021 = vmatmul.mubr.bf16.gmra.mrb[12].mxu0 %v2266_v49 }
  0x40   : > { %2006 = vmatpush3.bf16.msra.mxu1 %v2241_v44  ;;  %1157 = vmatprep.mubr.bf16.mxu1 %v2249_v45 }
  0x41   : > { %2007 = vmatprep.subr.bf16.mxu1 %v2242_v46  ;;  %1028 = vmatprep.mubr.bf16.mxu0 %v2268_v50 }
  0x44   : > { %2008 = vmatpush3.bf16.msra.mxu1 %v2243_v47 }
  0x47   : > { %1158 = vmatmul.mubr.bf16.vlgmr.msra.gmra.mrb[16].mxu1 %v2247_v48  ;;  %1029 = vmatmul.mubr.bf16.gmra.mrb[16].mxu0 %v2272_v52 }
  0x48   : > { %1165 = vmatprep.mubr.bf16.mxu1 %v2252_v51  ;;  %1036 = vmatprep.mubr.bf16.mxu0 %v2274_v54 }
  0x4f   : > { %1166 = vmatmul.mubr.bf16.gmra.mrb[20].mxu1 %v2255_v53  ;;  %1037 = vmatmul.mubr.bf16.gmra.mrb[20].mxu0 %v2278_v56 }
  0x50   : > { %1173 = vmatprep.mubr.bf16.mxu1 %v2258_v55  ;;  %1044 = vmatprep.mubr.bf16.mxu0 %v2280_v58 }
  0x57   : > { %1174 = vmatmul.mubr.bf16.gmra.mrb[24].mxu1 %v2261_v57  ;;  %1045 = vmatmul.mubr.bf16.gmra.mrb[24].mxu0 %v2284_v60 }
  0x58   : > { %1181 = vmatprep.mubr.bf16.mxu1 %v2264_v59  ;;  %1052 = vmatprep.mubr.bf16.mxu0 %v2286_v62 }
  0x5f   : > { %1182 = vmatmul.mubr.bf16.gmra.mrb[28].mxu1 %v2267_v61  ;;  %1053 = vmatmul.mubr.bf16.gmra.mrb[28].mxu0 %v2290_v0 }
  0x60   : > { %1189 = vmatprep.mubr.bf16.mxu1 %v2270_v63  ;;  %1060 = vmatprep.mubr.bf16.mxu0 %v2292_v2 }
  0x67   : > { %1190 = vmatmul.mubr.bf16.gmra.mrb[32].mxu1 %v2273_v1  ;;  %1061 = vmatmul.mubr.bf16.gmra.mrb[32].mxu0 %v2296_v4 }
  0x68   : > { %1197 = vmatprep.mubr.bf16.mxu1 %v2276_v3  ;;  %1068 = vmatprep.mubr.bf16.mxu0 %v2298_v6 }
  0x6f   : > { %1198 = vmatmul.mubr.bf16.gmra.mrb[36].mxu1 %v2279_v5  ;;  %1069 = vmatmul.mubr.bf16.gmra.mrb[36].mxu0 %v2302_v8 }
  0x70   : > { %1205 = vmatprep.mubr.bf16.mxu1 %v2282_v7  ;;  %1076 = vmatprep.mubr.bf16.mxu0 %v2304_v10 }
  0x77   : > { %1206 = vmatmul.mubr.bf16.gmra.mrb[40].mxu1 %v2285_v9  ;;  %1077 = vmatmul.mubr.bf16.gmra.mrb[40].mxu0 %v2308_v12 }
  0x78   : > { %1213 = vmatprep.mubr.bf16.mxu1 %v2288_v11  ;;  %1084 = vmatprep.mubr.bf16.mxu0 %v2310_v14 }
  0x7f   : > { %1214 = vmatmul.mubr.bf16.gmra.mrb[44].mxu1 %v2291_v13  ;;  %1085 = vmatmul.mubr.bf16.gmra.mrb[44].mxu0 %v2314_v16 }
  0x80   : > { %1221 = vmatprep.mubr.bf16.mxu1 %v2294_v15 }
  0x87   : > { %1222 = vmatmul.mubr.bf16.gmra.mrb[48].mxu1 %v2297_v17 }
  0x88   : > { %1229 = vmatprep.mubr.bf16.mxu1 %v2300_v18 }
  0x8f   : > { %1230 = vmatmul.mubr.bf16.gmra.mrb[52].mxu1 %v2303_v19 }
  0x90   : > { %1237 = vmatprep.mubr.bf16.mxu1 %v2306_v20 }
  0x97   : > { %1238 = vmatmul.mubr.bf16.gmra.mrb[56].mxu1 %v2309_v22  ;;  %v292_v22 = vld [vmem:[#allocation2] sm:$0xff] }
  0x98   : > { %1245 = vmatprep.mubr.bf16.mxu1 %v2312_v23 }
  0x9f   : > { %1246 = vmatmul.mubr.bf16.gmra.mrb[60].mxu1 %v2315_v25 }
  0xa0   : > { %1253 = vmatprep.mubr.bf16.mxu1 %v2316_v26 }
  0xa7   : > { %1254 = vmatmul.mubr.bf16.gmra.mrb[64].mxu1 %v2318_v27  ;;  %v293_v27 = vld [vmem:[#allocation2 + $0x8] sm:$0xff] }
  0xa8   : > { %1261 = vmatprep.mubr.bf16.mxu1 %v2319_v28 }
  0xaf   : > { %1262 = vmatmul.mubr.bf16.gmra.mrb[68].mxu1 %v2321_v29 }
  0xb0   : > { %1269 = vmatprep.mubr.bf16.mxu1 %v2322_v30 }
  0xb7   : > { %1270 = vmatmul.mubr.bf16.gmra.mrb[72].mxu1 %v2324_v32 }
  0xb8   : > { %1277 = vmatprep.mubr.bf16.mxu1 %v2325_v33 }
  0xbf   : > { %1278 = vmatmul.mubr.bf16.gmra.mrb[76].mxu1 %v2327_v34 }
  0xfa   : > { %v1969_v35 = vpop.f32.mrb[0].mxu1  ;;  %v1897_v41 = vpop.f32.mrb[0].mxu0 }
  0xfb   : > { %v1970_v36 = vpop.f32.mrb[1].mxu1  ;;  %v1898_v43 = vpop.f32.mrb[1].mxu0 }
  0xfc   : > { %v2604_v37 = vadd.f32 %v1970_v36, %v1969_v35  ;;  %v1972_v38 = vpop.f32.mrb[2].mxu1  ;;  %v1899_v45 = vadd.f32 %v1898_v43, %v1897_v41  ;;  %v1900_v46 = vpop.f32.mrb[2].mxu0 }
  0xfd   : > { %v1973_v39 = vpop.f32.mrb[3].mxu1  ;;  %v1901_v49 = vpop.f32.mrb[3].mxu0 }
  0xfe   : > { %v2606_v40 = vadd.f32 %v1973_v39, %v1972_v38  ;;  %v1902_v51 = vadd.f32 %v1901_v49, %v1900_v46 }
 0x102   : > { %v1975_v42 = vpop.f32.mrb[4].mxu1  ;;  %v1903_v53 = vpop.f32.mrb[4].mxu0 }
 0x103   : > { %v1976_v44 = vpop.f32.mrb[5].mxu1  ;;  %v1904_v55 = vpop.f32.mrb[5].mxu0 }
 0x104   : > { %v2608_v47 = vadd.f32 %v1976_v44, %v1975_v42  ;;  %v1978_v48 = vpop.f32.mrb[6].mxu1  ;;  %v1905_v57 = vadd.f32 %v1904_v55, %v1903_v53  ;;  %v1906_v58 = vpop.f32.mrb[6].mxu0  ;;  %v294_v42 = vld [vmem:[#allocation2 + $0x10] sm:$0xff] }
 0x105   : > { %v1979_v50 = vpop.f32.mrb[7].mxu1  ;;  %v1907_v61 = vpop.f32.mrb[7].mxu0 }
 0x106   : > { %v2610_v52 = vadd.f32 %v1979_v50, %v1978_v48  ;;  %v1908_v63 = vadd.f32 %v1907_v61, %v1906_v58  ;;  %v295_v48 = vld [vmem:[#allocation2 + $0x18] sm:$0xff] }
 0x10a   : > { %v1981_v54 = vpop.f32.mrb[8].mxu1  ;;  %v1909_v1 = vpop.f32.mrb[8].mxu0 }
 0x10b   : > { %v1982_v56 = vpop.f32.mrb[9].mxu1  ;;  %v1910_v3 = vpop.f32.mrb[9].mxu0 }
 0x10c   : > { %v2612_v59 = vadd.f32 %v1982_v56, %v1981_v54  ;;  %v1984_v60 = vpop.f32.mrb[10].mxu1  ;;  %v2616_v5 = vadd.f32 %v1910_v3, %v1909_v1  ;;  %v1912_v6 = vpop.f32.mrb[10].mxu0 }
 0x10d   : > { %v1985_v62 = vpop.f32.mrb[11].mxu1  ;;  %v1913_v9 = vpop.f32.mrb[11].mxu0 }
 0x10e   : > { %v2614_v0 = vadd.f32 %v1985_v62, %v1984_v60  ;;  %v1914_v11 = vadd.f32 %v1913_v9, %v1912_v6 }
 0x112   : > { %v1987_v2 = vpop.f32.mrb[12].mxu1  ;;  %v1915_v13 = vpop.f32.mrb[12].mxu0 }
 0x113   : > { %v1988_v4 = vpop.f32.mrb[13].mxu1  ;;  %v1916_v15 = vpop.f32.mrb[13].mxu0 }
 0x114   : > { %v2618_v7 = vadd.f32 %v1988_v4, %v1987_v2  ;;  %v1990_v8 = vpop.f32.mrb[14].mxu1  ;;  %v2622_v17 = vadd.f32 %v1916_v15, %v1915_v13  ;;  %v1918_v18 = vpop.f32.mrb[14].mxu0  ;;  %v296_v4 = vld [vmem:[#allocation2 + $0x20] sm:$0xff] }
 0x115   : > { %v1991_v10 = vpop.f32.mrb[15].mxu1  ;;  %v1919_v21 = vpop.f32.mrb[15].mxu0 }
 0x116   : > { %v2620_v12 = vadd.f32 %v1991_v10, %v1990_v8  ;;  %v2624_v24 = vadd.f32 %v1919_v21, %v1918_v18  ;;  %v297_v10 = vld [vmem:[#allocation2 + $0x28] sm:$0xff] }
 0x11a   : > { %v2009_v14 = vpop.f32.mrb[16].mxu1  ;;  %v1921_v30 = vpop.f32.mrb[16].mxu0 }
 0x11b   : > { %v2010_v16 = vpop.f32.mrb[17].mxu1  ;;  %v1922_v33 = vpop.f32.mrb[17].mxu0 }
 0x11c   : > { %v2011_v19 = vadd.f32 %v2010_v16, %v2009_v14  ;;  %v2012_v20 = vpop.f32.mrb[18].mxu1  ;;  %v2627_v35 = vadd.f32 %v1922_v33, %v1921_v30  ;;  %v1924_v36 = vpop.f32.mrb[18].mxu0  ;;  %v299_v33 = vld [vmem:[#allocation2 + $0x38] sm:$0xff] }
 0x11d   : > { %v2013_v23 = vpop.f32.mrb[19].mxu1  ;;  %v1925_v41 = vpop.f32.mrb[19].mxu0 }
 0x11e   : > { %v1160_v25 = vadd.f32 %v2011_v19, %v1899_v45  ;;  %v2014_v26 = vadd.f32 %v2013_v23, %v2012_v20  ;;  %v2630_v44 = vadd.f32 %v1925_v41, %v1924_v36 }
 0x120   : > { %v1286_v28 = vadd.f32 %v1160_v25, %v292_v22  ;;  %v1163_v29 = vadd.f32 %v2014_v26, %v1902_v51 }
 0x122   : > { %1319 = vst.msk [vmem:[#allocation2] sm:$0xff] %vm259_vm0, %v1286_v28  ;;  %v1287_v31 = vadd.f32 %v1163_v29, %v293_v27  ;;  %v2015_v32 = vpop.f32.mrb[20].mxu1  ;;  %v1927_v51 = vpop.f32.mrb[20].mxu0  ;;  %v298_v29 = vld [vmem:[#allocation2 + $0x30] sm:$0xff] }
 0x123   : > { %v2016_v34 = vpop.f32.mrb[21].mxu1  ;;  %v1928_v55 = vpop.f32.mrb[21].mxu0 }
 0x124   : > { %1320 = vst.msk [vmem:[#allocation2 + $0x8] sm:$0xff] %vm259_vm0, %v1287_v31  ;;  %v2017_v38 = vadd.f32 %v2016_v34, %v2015_v32  ;;  %v2018_v39 = vpop.f32.mrb[22].mxu1  ;;  %v2633_v61 = vadd.f32 %v1928_v55, %v1927_v51  ;;  %v1930_v62 = vpop.f32.mrb[22].mxu0 }
 0x125   : > { %v2019_v43 = vpop.f32.mrb[23].mxu1  ;;  %v1931_v3 = vpop.f32.mrb[23].mxu0 }
 0x126   : > { %v1168_v45 = vadd.f32 %v2017_v38, %v1905_v57  ;;  %v2020_v46 = vadd.f32 %v2019_v43, %v2018_v39  ;;  %v2636_v6 = vadd.f32 %v1931_v3, %v1930_v62 }
 0x128   : > { %v1288_v49 = vadd.f32 %v1168_v45, %v294_v42  ;;  %v1171_v50 = vadd.f32 %v2020_v46, %v1908_v63 }
 0x129   : > { %v1354_v58 = vld [vmem:[#allocation2] sm:$0xff] }
 0x12a   : > { %1321 = vst.msk [vmem:[#allocation2 + $0x10] sm:$0xff] %vm259_vm0, %v1288_v49  ;;  %v1289_v53 = vadd.f32 %v1171_v50, %v295_v48  ;;  %v2021_v54 = vpop.f32.mrb[24].mxu1  ;;  %v1933_v15 = vpop.f32.mrb[24].mxu0 }
 0x12b   : > { %v2022_v56 = vpop.f32.mrb[25].mxu1  ;;  %v1355_v60 = vld [vmem:[#allocation2 + $0x8] sm:$0xff]  ;;  %v1934_v19 = vpop.f32.mrb[25].mxu0 }
 0x12c   : > { %1322 = vst.msk [vmem:[#allocation2 + $0x18] sm:$0xff] %vm259_vm0, %v1289_v53  ;;  %v2023_v1 = vadd.f32 %v2022_v56, %v2021_v54  ;;  %v2024_v57 = vpop.f32.mrb[26].mxu1  ;;  %v1386_v2 = vpack.c.bf16 %v1355_v60, %v1354_v58  ;;  %v2641_v23 = vadd.f32 %v1934_v19, %v1933_v15  ;;  %v1936_v25 = vpop.f32.mrb[26].mxu0  ;;  %v300_v54 = vld [vmem:[#allocation2 + $0x40] sm:$0xff]  ;;  %v301_v60 = vld [vmem:[#allocation2 + $0x48] sm:$0xff] }
 0x12d   : > { %v2025_v63 = vpop.f32.mrb[27].mxu1  ;;  %v1937_v28 = vpop.f32.mrb[27].mxu0 }
 0x12e   : > { %v1176_v8 = vadd.f32 %v2023_v1, %v2616_v5  ;;  %v2026_v9 = vadd.f32 %v2025_v63, %v2024_v57  ;;  %2127 = vmatprep.mubr.msk.bf16.mxu0 %vm259_vm0, %v1386_v2  ;;  %v2644_v30 = vadd.f32 %v1937_v28, %v1936_v25 }
 0x130   : > { %v1290_v13 = vadd.f32 %v1176_v8, %v296_v4  ;;  %v1179_v14 = vadd.f32 %v2026_v9, %v1914_v11 }
 0x131   : > { %v1356_v21 = vld [vmem:[#allocation2 + $0x10] sm:$0xff] }
 0x132   : > { %1323 = vst.msk [vmem:[#allocation2 + $0x20] sm:$0xff] %vm259_vm0, %v1290_v13  ;;  %v1291_v16 = vadd.f32 %v1179_v14, %v297_v10  ;;  %v2027_v18 = vpop.f32.mrb[28].mxu1  ;;  %v1939_v38 = vpop.f32.mrb[28].mxu0 }
 0x133   : > { %v2028_v20 = vpop.f32.mrb[29].mxu1  ;;  %v1357_v22 = vld [vmem:[#allocation2 + $0x18] sm:$0xff]  ;;  %v1940_v42 = vpop.f32.mrb[29].mxu0 }
 0x134   : > { %1324 = vst.msk [vmem:[#allocation2 + $0x28] sm:$0xff] %vm259_vm0, %v1291_v16  ;;  %v2029_v5 = vadd.f32 %v2028_v20, %v2027_v18  ;;  %v2030_v26 = vpop.f32.mrb[30].mxu1  ;;  %v1387_v27 = vpack.c.bf16 %v1357_v22, %v1356_v21  ;;  %v2650_v48 = vadd.f32 %v1940_v42, %v1939_v38  ;;  %v1942_v49 = vpop.f32.mrb[30].mxu0  ;;  %v302_v18 = vld [vmem:[#allocation2 + $0x50] sm:$0xff]  ;;  %v303_v22 = vld [vmem:[#allocation2 + $0x58] sm:$0xff] }
 0x135   : > { %v2031_v11 = vpop.f32.mrb[31].mxu1  ;;  %v1943_v53 = vpop.f32.mrb[31].mxu0 }
 0x136   : > { %v1184_v31 = vadd.f32 %v2029_v5, %v2622_v17  ;;  %v2032_v32 = vadd.f32 %v2031_v11, %v2030_v26  ;;  %2128 = vmatmul.mubr.msk.bf16.vlgmr.msra.gmra.mrb[48].mxu0 %vm259_vm0, %v1387_v27  ;;  %v2653_v55 = vadd.f32 %v1943_v53, %v1942_v49 }
 0x138   : > { %v1292_v34 = vadd.f32 %v1184_v31, %v298_v29  ;;  %v1187_v36 = vadd.f32 %v2032_v32, %v2624_v24 }
 0x139   : > { %v1358_v45 = vld [vmem:[#allocation2 + $0x20] sm:$0xff] }
 0x13a   : > { %1325 = vst.msk [vmem:[#allocation2 + $0x30] sm:$0xff] %vm259_vm0, %v1292_v34  ;;  %v1293_v39 = vadd.f32 %v1187_v36, %v299_v33  ;;  %v2033_v41 = vpop.f32.mrb[32].mxu1  ;;  %v1945_v57 = vpop.f32.mrb[32].mxu0 }
 0x13b   : > { %v2034_v43 = vpop.f32.mrb[33].mxu1  ;;  %v1359_v46 = vld [vmem:[#allocation2 + $0x28] sm:$0xff]  ;;  %v1946_v4 = vpop.f32.mrb[33].mxu0 }
 0x13c   : > { %1326 = vst.msk [vmem:[#allocation2 + $0x38] sm:$0xff] %vm259_vm0, %v1293_v39  ;;  %v2035_v17 = vadd.f32 %v2034_v43, %v2033_v41  ;;  %v2036_v50 = vpop.f32.mrb[34].mxu1  ;;  %v1388_v51 = vpack.c.bf16 %v1359_v46, %v1358_v45  ;;  %v2659_v10 = vadd.f32 %v1946_v4, %v1945_v57  ;;  %v1948_v13 = vpop.f32.mrb[34].mxu0  ;;  %v304_v41 = vld [vmem:[#allocation2 + $0x60] sm:$0xff]  ;;  %v305_v46 = vld [vmem:[#allocation2 + $0x68] sm:$0xff] }
 0x13d   : > { %v2037_v24 = vpop.f32.mrb[35].mxu1  ;;  %v1949_v16 = vpop.f32.mrb[35].mxu0 }
 0x13e   : > { %v1192_v56 = vadd.f32 %v2035_v17, %v2627_v35  ;;  %v2038_v58 = vadd.f32 %v2037_v24, %v2036_v50  ;;  %2131 = vmatprep.mubr.msk.bf16.mxu0 %vm259_vm0, %v1388_v51  ;;  %v2662_v19 = vadd.f32 %v1949_v16, %v1948_v13 }
 0x140   : > { %v1294_v62 = vadd.f32 %v1192_v56, %v300_v54  ;;  %v1195_v1 = vadd.f32 %v2038_v58, %v2630_v44 }
 0x141   : > { %v1360_v8 = vld [vmem:[#allocation2 + $0x30] sm:$0xff] }
 0x142   : > { %1327 = vst.msk [vmem:[#allocation2 + $0x40] sm:$0xff] %vm259_vm0, %v1294_v62  ;;  %v1295_v2 = vadd.f32 %v1195_v1, %v301_v60  ;;  %v2039_v3 = vpop.f32.mrb[36].mxu1  ;;  %v1951_v26 = vpop.f32.mrb[36].mxu0 }
 0x143   : > { %v2040_v63 = vpop.f32.mrb[37].mxu1  ;;  %v1361_v9 = vld [vmem:[#allocation2 + $0x38] sm:$0xff]  ;;  %v1952_v29 = vpop.f32.mrb[37].mxu0 }
 0x144   : > { %1328 = vst.msk [vmem:[#allocation2 + $0x48] sm:$0xff] %vm259_vm0, %v1295_v2  ;;  %v2041_v35 = vadd.f32 %v2040_v63, %v2039_v3  ;;  %v2042_v14 = vpop.f32.mrb[38].mxu1  ;;  %v1389_v15 = vpack.c.bf16 %v1361_v9, %v1360_v8  ;;  %v2668_v33 = vadd.f32 %v1952_v29, %v1951_v26  ;;  %v1954_v34 = vpop.f32.mrb[38].mxu0  ;;  %v306_v3 = vld [vmem:[#allocation2 + $0x70] sm:$0xff]  ;;  %v307_v9 = vld [vmem:[#allocation2 + $0x78] sm:$0xff] }
 0x145   : > { %v2043_v44 = vpop.f32.mrb[39].mxu1  ;;  %v1955_v39 = vpop.f32.mrb[39].mxu0 }
 0x146   : > { %v1200_v20 = vadd.f32 %v2041_v35, %v2633_v61  ;;  %v2044_v21 = vadd.f32 %v2043_v44, %v2042_v14  ;;  %2132 = vmatmul.mubr.msk.bf16.gmra.mrb[52].mxu0 %vm259_vm0, %v1389_v15  ;;  %v2671_v42 = vadd.f32 %v1955_v39, %v1954_v34 }
 0x148   : > { %v1296_v25 = vadd.f32 %v1200_v20, %v302_v18  ;;  %v1203_v5 = vadd.f32 %v2044_v21, %v2636_v6 }
 0x149   : > { %v1362_v31 = vld [vmem:[#allocation2 + $0x40] sm:$0xff] }
 0x14a   : > { %1329 = vst.msk [vmem:[#allocation2 + $0x50] sm:$0xff] %vm259_vm0, %v1296_v25  ;;  %v1297_v27 = vadd.f32 %v1203_v5, %v303_v22  ;;  %v2045_v28 = vpop.f32.mrb[40].mxu1  ;;  %v1957_v50 = vpop.f32.mrb[40].mxu0 }
 0x14b   : > { %v2046_v11 = vpop.f32.mrb[41].mxu1  ;;  %v1363_v32 = vld [vmem:[#allocation2 + $0x48] sm:$0xff]  ;;  %v1958_v54 = vpop.f32.mrb[41].mxu0 }
 0x14c   : > { %1330 = vst.msk [vmem:[#allocation2 + $0x58] sm:$0xff] %vm259_vm0, %v1297_v27  ;;  %v2047_v61 = vadd.f32 %v2046_v11, %v2045_v28  ;;  %v2048_v36 = vpop.f32.mrb[42].mxu1  ;;  %v1390_v38 = vpack.c.bf16 %v1363_v32, %v1362_v31  ;;  %v2677_v60 = vadd.f32 %v1958_v54, %v1957_v50  ;;  %v1960_v62 = vpop.f32.mrb[42].mxu0  ;;  %v308_v28 = vld [vmem:[#allocation2 + $0x80] sm:$0xff]  ;;  %v309_v32 = vld [vmem:[#allocation2 + $0x88] sm:$0xff] }
 0x14d   : > { %v2049_v6 = vpop.f32.mrb[43].mxu1  ;;  %v1961_v2 = vpop.f32.mrb[43].mxu0 }
 0x14e   : > { %v1208_v43 = vadd.f32 %v2047_v61, %v2641_v23  ;;  %v2050_v45 = vadd.f32 %v2049_v6, %v2048_v36  ;;  %2135 = vmatprep.mubr.msk.bf16.mxu0 %vm259_vm0, %v1390_v38  ;;  %v2680_v4 = vadd.f32 %v1961_v2, %v1960_v62 }
 0x150   : > { %v1298_v49 = vadd.f32 %v1208_v43, %v304_v41  ;;  %v1211_v17 = vadd.f32 %v2050_v45, %v2644_v30 }
 0x151   : > { %v1364_v56 = vld [vmem:[#allocation2 + $0x50] sm:$0xff] }
 0x152   : > { %1331 = vst.msk [vmem:[#allocation2 + $0x60] sm:$0xff] %vm259_vm0, %v1298_v49  ;;  %v1299_v51 = vadd.f32 %v1211_v17, %v305_v46  ;;  %v2051_v53 = vpop.f32.mrb[44].mxu1  ;;  %v1963_v14 = vpop.f32.mrb[44].mxu0 }
 0x153   : > { %v2052_v24 = vpop.f32.mrb[45].mxu1  ;;  %v1365_v58 = vld [vmem:[#allocation2 + $0x58] sm:$0xff]  ;;  %v1964_v18 = vpop.f32.mrb[45].mxu0 }
 0x154   : > { %1332 = vst.msk [vmem:[#allocation2 + $0x68] sm:$0xff] %vm259_vm0, %v1299_v51  ;;  %v2053_v23 = vadd.f32 %v2052_v24, %v2051_v53  ;;  %v2054_v1 = vpop.f32.mrb[46].mxu1  ;;  %v1391_v57 = vpack.c.bf16 %v1365_v58, %v1364_v56  ;;  %v2686_v22 = vadd.f32 %v1964_v18, %v1963_v14  ;;  %v1966_v25 = vpop.f32.mrb[46].mxu0 }
 0x155   : > { %v2055_v30 = vpop.f32.mrb[47].mxu1  ;;  %v1967_v27 = vpop.f32.mrb[47].mxu0 }
 0x156   : > { %v1216_v63 = vadd.f32 %v2053_v23, %v2650_v48  ;;  %v2056_v8 = vadd.f32 %v2055_v30, %v2054_v1  ;;  %2136 = vmatmul.mubr.msk.bf16.gmra.mrb[56].mxu0 %vm259_vm0, %v1391_v57  ;;  %v1968_v29 = vadd.f32 %v1967_v27, %v1966_v25 }
 0x158   : > { %v1300_v13 = vadd.f32 %v1216_v63, %v306_v3  ;;  %v1219_v35 = vadd.f32 %v2056_v8, %v2653_v55 }
 0x159   : > { %v1366_v20 = vld [vmem:[#allocation2 + $0x60] sm:$0xff] }
 0x15a   : > { %1333 = vst.msk [vmem:[#allocation2 + $0x70] sm:$0xff] %vm259_vm0, %v1300_v13  ;;  %v1301_v15 = vadd.f32 %v1219_v35, %v307_v9  ;;  %v2057_v16 = vpop.f32.mrb[48].mxu1 }
 0x15b   : > { %v2058_v44 = vpop.f32.mrb[49].mxu1  ;;  %v1367_v21 = vld [vmem:[#allocation2 + $0x68] sm:$0xff] }
 0x15c   : > { %1334 = vst.msk [vmem:[#allocation2 + $0x78] sm:$0xff] %vm259_vm0, %v1301_v15  ;;  %v2059_v48 = vadd.f32 %v2058_v44, %v2057_v16  ;;  %v2060_v5 = vpop.f32.mrb[50].mxu1  ;;  %v1392_v26 = vpack.c.bf16 %v1367_v21, %v1366_v20 }
 0x15d   : > { %v2061_v55 = vpop.f32.mrb[51].mxu1 }
 0x15e   : > { %v1224_v11 = vadd.f32 %v2059_v48, %v2659_v10  ;;  %v2062_v31 = vadd.f32 %v2061_v55, %v2060_v5  ;;  %2139 = vmatprep.mubr.msk.bf16.mxu0 %vm259_vm0, %v1392_v26  ;;  %v310_v10 = vld [vmem:[#allocation2 + $0x90] sm:$0xff] }
 0x160   : > { %v1302_v34 = vadd.f32 %v1224_v11, %v308_v28  ;;  %v1227_v61 = vadd.f32 %v2062_v31, %v2662_v19  ;;  %v311_v19 = vld [vmem:[#allocation2 + $0x98] sm:$0xff] }
 0x161   : > { %v1368_v41 = vld [vmem:[#allocation2 + $0x70] sm:$0xff] }
 0x162   : > { %1335 = vst.msk [vmem:[#allocation2 + $0x80] sm:$0xff] %vm259_vm0, %v1302_v34  ;;  %v1303_v36 = vadd.f32 %v1227_v61, %v309_v32  ;;  %v2063_v38 = vpop.f32.mrb[52].mxu1  ;;  %v316_v61 = vld [vmem:[#allocation2 + $0xc0] sm:$0xff] }
 0x163   : > { %v2064_v39 = vpop.f32.mrb[53].mxu1  ;;  %v1369_v6 = vld [vmem:[#allocation2 + $0x78] sm:$0xff] }
 0x164   : > { %1336 = vst.msk [vmem:[#allocation2 + $0x88] sm:$0xff] %vm259_vm0, %v1303_v36  ;;  %v2065_v43 = vadd.f32 %v2064_v39, %v2063_v38  ;;  %v2066_v45 = vpop.f32.mrb[54].mxu1  ;;  %v1393_v46 = vpack.c.bf16 %v1369_v6, %v1368_v41 }
 0x165   : > { %v2067_v49 = vpop.f32.mrb[55].mxu1 }
 0x166   : > { %v1232_v17 = vadd.f32 %v2065_v43, %v2668_v33  ;;  %v2068_v50 = vadd.f32 %v2067_v49, %v2066_v45  ;;  %2140 = vmatmul.mubr.msk.bf16.gmra.mrb[60].mxu0 %vm259_vm0, %v1393_v46  ;;  %v312_v33 = vld [vmem:[#allocation2 + $0xa0] sm:$0xff] }
 0x168   : > { %v1304_v51 = vadd.f32 %v1232_v17, %v310_v10  ;;  %v1235_v53 = vadd.f32 %v2068_v50, %v2671_v42  ;;  %v313_v42 = vld [vmem:[#allocation2 + $0xa8] sm:$0xff] }
 0x169   : > { %v1370_v58 = vld [vmem:[#allocation2 + $0x80] sm:$0xff] }
 0x16a   : > { %1337 = vst.msk [vmem:[#allocation2 + $0x90] sm:$0xff] %vm259_vm0, %v1304_v51  ;;  %v1305_v54 = vadd.f32 %v1235_v53, %v311_v19  ;;  %v2069_v24 = vpop.f32.mrb[56].mxu1 }
 0x16b   : > { %v2070_v56 = vpop.f32.mrb[57].mxu1  ;;  %v1371_v62 = vld [vmem:[#allocation2 + $0x88] sm:$0xff] }
 0x16c   : > { %1338 = vst.msk [vmem:[#allocation2 + $0x98] sm:$0xff] %vm259_vm0, %v1305_v54  ;;  %v2071_v23 = vadd.f32 %v2070_v56, %v2069_v24  ;;  %v2072_v1 = vpop.f32.mrb[58].mxu1  ;;  %v1394_v57 = vpack.c.bf16 %v1371_v62, %v1370_v58 }
 0x16d   : > { %v2073_v2 = vpop.f32.mrb[59].mxu1 }
 0x16e   : > { %v1240_v3 = vadd.f32 %v2071_v23, %v2677_v60  ;;  %v2074_v30 = vadd.f32 %v2073_v2, %v2072_v1  ;;  %2143 = vmatprep.mubr.msk.bf16.mxu0 %vm259_vm0, %v1394_v57  ;;  %v314_v60 = vld [vmem:[#allocation2 + $0xb0] sm:$0xff] }
 0x170   : > { %v1306_v63 = vadd.f32 %v1240_v3, %v312_v33  ;;  %v1243_v8 = vadd.f32 %v2074_v30, %v2680_v4  ;;  %v315_v4 = vld [vmem:[#allocation2 + $0xb8] sm:$0xff] }
 0x171   : > { %v1372_v14 = vld [vmem:[#allocation2 + $0x90] sm:$0xff] }
 0x172   : > { %1339 = vst.msk [vmem:[#allocation2 + $0xa0] sm:$0xff] %vm259_vm0, %v1306_v63  ;;  %v1307_v9 = vadd.f32 %v1243_v8, %v313_v42  ;;  %v2075_v13 = vpop.f32.mrb[60].mxu1 }
 0x173   : > { %v2076_v35 = vpop.f32.mrb[61].mxu1  ;;  %v1373_v15 = vld [vmem:[#allocation2 + $0x98] sm:$0xff] }
 0x174   : > { %1340 = vst.msk [vmem:[#allocation2 + $0xa8] sm:$0xff] %vm259_vm0, %v1307_v9  ;;  %v2077_v16 = vadd.f32 %v2076_v35, %v2075_v13  ;;  %v2078_v18 = vpop.f32.mrb[62].mxu1  ;;  %v1395_v44 = vpack.c.bf16 %v1373_v15, %v1372_v14 }
 0x175   : > { %v2079_v20 = vpop.f32.mrb[63].mxu1 }
 0x176   : > { %v1248_v21 = vadd.f32 %v2077_v16, %v2686_v22  ;;  %v2080_v25 = vadd.f32 %v2079_v20, %v2078_v18  ;;  %2144 = vmatmul.mubr.msk.bf16.gmra.mrb[64].mxu0 %vm259_vm0, %v1395_v44 }
 0x178   : > { %v1308_v48 = vadd.f32 %v1248_v21, %v314_v60  ;;  %v1251_v5 = vadd.f32 %v2080_v25, %v1968_v29  ;;  %v317_v29 = vld [vmem:[#allocation2 + $0xc8] sm:$0xff] }
 0x179   : > { %v1374_v55 = vld [vmem:[#allocation2 + $0xa0] sm:$0xff] }
 0x17a   : > { %1341 = vst.msk [vmem:[#allocation2 + $0xb0] sm:$0xff] %vm259_vm0, %v1308_v48  ;;  %v1309_v26 = vadd.f32 %v1251_v5, %v315_v4  ;;  %v2081_v27 = vpop.f32.mrb[64].mxu1 }
 0x17b   : > { %v2082_v28 = vpop.f32.mrb[65].mxu1  ;;  %v1375_v11 = vld [vmem:[#allocation2 + $0xa8] sm:$0xff] }
 0x17c   : > { %1342 = vst.msk [vmem:[#allocation2 + $0xb8] sm:$0xff] %vm259_vm0, %v1309_v26  ;;  %v2083_v31 = vadd.f32 %v2082_v28, %v2081_v27  ;;  %v2084_v32 = vpop.f32.mrb[66].mxu1  ;;  %v1396_v34 = vpack.c.bf16 %v1375_v11, %v1374_v55 }
 0x17d   : > { %v2085_v22 = vpop.f32.mrb[67].mxu1 }
 0x17e   : > { %v1256_v36 = vadd.f32 %v2083_v31, %v2604_v37  ;;  %v2086_v38 = vadd.f32 %v2085_v22, %v2084_v32  ;;  %2147 = vmatprep.mubr.msk.bf16.mxu0 %vm259_vm0, %v1396_v34  ;;  %v318_v37 = vld [vmem:[#allocation2 + $0xd0] sm:$0xff] }
 0x180   : > { %v1310_v39 = vadd.f32 %v1256_v36, %v316_v61  ;;  %v1259_v41 = vadd.f32 %v2086_v38, %v2606_v40  ;;  %v319_v40 = vld [vmem:[#allocation2 + $0xd8] sm:$0xff] }
 0x181   : > { %v1376_v46 = vld [vmem:[#allocation2 + $0xb0] sm:$0xff] }
 0x182   : > { %1343 = vst.msk [vmem:[#allocation2 + $0xc0] sm:$0xff] %vm259_vm0, %v1310_v39  ;;  %v1311_v6 = vadd.f32 %v1259_v41, %v317_v29  ;;  %v2087_v43 = vpop.f32.mrb[68].mxu1 }
 0x183   : > { %v2088_v45 = vpop.f32.mrb[69].mxu1  ;;  %v1377_v10 = vld [vmem:[#allocation2 + $0xb8] sm:$0xff] }
 0x184   : > { %1344 = vst.msk [vmem:[#allocation2 + $0xc8] sm:$0xff] %vm259_vm0, %v1311_v6  ;;  %v2089_v49 = vadd.f32 %v2088_v45, %v2087_v43  ;;  %v2090_v17 = vpop.f32.mrb[70].mxu1  ;;  %v1397_v50 = vpack.c.bf16 %v1377_v10, %v1376_v46 }
 0x185   : > { %v2091_v19 = vpop.f32.mrb[71].mxu1 }
 0x186   : > { %v1264_v51 = vadd.f32 %v2089_v49, %v2608_v47  ;;  %v2092_v53 = vadd.f32 %v2091_v19, %v2090_v17  ;;  %2148 = vmatmul.mubr.msk.bf16.gmra.mrb[68].mxu0 %vm259_vm0, %v1397_v50  ;;  %v320_v47 = vld [vmem:[#allocation2 + $0xe0] sm:$0xff] }
 0x188   : > { %v1312_v54 = vadd.f32 %v1264_v51, %v318_v37  ;;  %v1267_v24 = vadd.f32 %v2092_v53, %v2610_v52  ;;  %v321_v52 = vld [vmem:[#allocation2 + $0xe8] sm:$0xff] }
 0x189   : > { %v1378_v23 = vld [vmem:[#allocation2 + $0xc0] sm:$0xff] }
 0x18a   : > { %1345 = vst.msk [vmem:[#allocation2 + $0xd0] sm:$0xff] %vm259_vm0, %v1312_v54  ;;  %v1313_v56 = vadd.f32 %v1267_v24, %v319_v40  ;;  %v2093_v58 = vpop.f32.mrb[72].mxu1 }
 0x18b   : > { %v2094_v62 = vpop.f32.mrb[73].mxu1  ;;  %v1379_v1 = vld [vmem:[#allocation2 + $0xc8] sm:$0xff] }
 0x18c   : > { %1346 = vst.msk [vmem:[#allocation2 + $0xd8] sm:$0xff] %vm259_vm0, %v1313_v56  ;;  %v2095_v57 = vadd.f32 %v2094_v62, %v2093_v58  ;;  %v2096_v33 = vpop.f32.mrb[74].mxu1  ;;  %v1398_v2 = vpack.c.bf16 %v1379_v1, %v1378_v23 }
 0x18d   : > { %v2097_v3 = vpop.f32.mrb[75].mxu1 }
 0x18e   : > { %v1272_v30 = vadd.f32 %v2095_v57, %v2612_v59  ;;  %v2098_v42 = vadd.f32 %v2097_v3, %v2096_v33  ;;  %2151 = vmatprep.mubr.msk.bf16.mxu0 %vm259_vm0, %v1398_v2  ;;  %v322_v59 = vld [vmem:[#allocation2 + $0xf0] sm:$0xff] }
 0x190   : > { %v1314_v63 = vadd.f32 %v1272_v30, %v320_v47  ;;  %v1275_v8 = vadd.f32 %v2098_v42, %v2614_v0  ;;  %v323_v0 = vld [vmem:[#allocation2 + $0xf8] sm:$0xff] }
 0x191   : > { %v1380_v14 = vld [vmem:[#allocation2 + $0xd0] sm:$0xff] }
 0x192   : > { %1347 = vst.msk [vmem:[#allocation2 + $0xe0] sm:$0xff] %vm259_vm0, %v1314_v63  ;;  %v1315_v9 = vadd.f32 %v1275_v8, %v321_v52  ;;  %v2099_v13 = vpop.f32.mrb[76].mxu1 }
 0x193   : > { %v2100_v35 = vpop.f32.mrb[77].mxu1  ;;  %v1381_v15 = vld [vmem:[#allocation2 + $0xd8] sm:$0xff] }
 0x194   : > { %1348 = vst.msk [vmem:[#allocation2 + $0xe8] sm:$0xff] %vm259_vm0, %v1315_v9  ;;  %v2101_v16 = vadd.f32 %v2100_v35, %v2099_v13  ;;  %v2102_v18 = vpop.f32.mrb[78].mxu1  ;;  %v1399_v44 = vpack.c.bf16 %v1381_v15, %v1380_v14 }
 0x195   : > { %v2103_v60 = vpop.f32.mrb[79].mxu1 }
 0x196   : > { %v1280_v20 = vadd.f32 %v2101_v16, %v2618_v7  ;;  %v2104_v21 = vadd.f32 %v2103_v60, %v2102_v18  ;;  %2152 = vmatmul.mubr.msk.bf16.gmra.mrb[72].mxu0 %vm259_vm0, %v1399_v44 }
 0x198   : > { %v1316_v25 = vadd.f32 %v1280_v20, %v322_v59  ;;  %v1283_v4 = vadd.f32 %v2104_v21, %v2620_v12  ;;  %v2734_v12 = vld [vmem:[%s2849_s3] ss:$0 sm:$0xff] }
 0x199   : > { %v1382_v5 = vld [vmem:[#allocation2 + $0xe0] sm:$0xff] }
 0x19a   : > { %1349 = vst.msk [vmem:[#allocation2 + $0xf0] sm:$0xff] %vm259_vm0, %v1316_v25  ;;  %v1317_v48 = vadd.f32 %v1283_v4, %v323_v0 }
 0x19b   : > { %v1383_v26 = vld [vmem:[#allocation2 + $0xe8] sm:$0xff] }
 0x19c   : > { %1350 = vst.msk [vmem:[#allocation2 + $0xf8] sm:$0xff] %vm259_vm0, %v1317_v48  ;;  %v1400_v27 = vpack.c.bf16 %v1383_v26, %v1382_v5 }
 0x19e   : > { %2155 = vmatprep.mubr.msk.bf16.mxu0 %vm259_vm0, %v1400_v27 }
 0x1a1   : > { %v1384_v28 = vld [vmem:[#allocation2 + $0xf0] sm:$0xff] }
 0x1a3   : > { %v1385_v7 = vld [vmem:[#allocation2 + $0xf8] sm:$0xff] }
 0x1a4   : > { %v1401_v55 = vpack.c.bf16 %v1385_v7, %v1384_v28 }
 0x1a6   : > { %2156 = vmatmul.mubr.msk.bf16.gmra.mrb[76].mxu0 %vm259_vm0, %v1401_v55 }
 0x209   : > { %v2129_v11 = vpop.f32.mrb[48].mxu0 }
 0x20a   : > { %v1516_v31 = vadd.f32 %v2129_v11, %v2734_v12  ;;  %v1507_v32 = vpop.f32.mrb[49].mxu0 }
 0x20b   : > { %v1508_v34 = vadd.f32 %v2734_v12, %v1507_v32  ;;  %v2130_v61 = vpop.f32.mrb[50].mxu0 }
 0x20c   : > { %1636 = vst.msk [vmem:[%s2739_s6 + $0x10] sm:$0xff] %vm259_vm0, %v1516_v31  ;;  %v1519_v22 = vadd.f32 %v2130_v61, %v2734_v12  ;;  %v1510_v36 = vpop.f32.mrb[51].mxu0 }
 0x20d   : > { %1634 = vst.msk [vmem:[%s2739_s6] sm:$0xff] %vm259_vm0, %v1508_v34  ;;  %v1511_v38 = vadd.f32 %v2734_v12, %v1510_v36 }
 0x20e   : > { %1637 = vst.msk [vmem:[%s2739_s6 + $0x18] sm:$0xff] %vm259_vm0, %v1519_v22 }
 0x20f   : > { %1635 = vst.msk [vmem:[%s2739_s6 + $0x8] sm:$0xff] %vm259_vm0, %v1511_v38 }
 0x219   : > { %v2133_v29 = vpop.f32.mrb[52].mxu0 }
 0x21a   : > { %v1532_v39 = vadd.f32 %v2133_v29, %v2734_v12  ;;  %v1523_v41 = vpop.f32.mrb[53].mxu0 }
 0x21b   : > { %v1524_v6 = vadd.f32 %v2734_v12, %v1523_v41  ;;  %v2134_v43 = vpop.f32.mrb[54].mxu0 }
 0x21c   : > { %1640 = vst.msk [vmem:[%s2739_s6 + $0x30] sm:$0xff] %vm259_vm0, %v1532_v39  ;;  %v1535_v45 = vadd.f32 %v2134_v43, %v2734_v12  ;;  %v1526_v46 = vpop.f32.mrb[55].mxu0 }
 0x21d   : > { %1638 = vst.msk [vmem:[%s2739_s6 + $0x20] sm:$0xff] %vm259_vm0, %v1524_v6  ;;  %v1527_v10 = vadd.f32 %v2734_v12, %v1526_v46 }
 0x21e   : > { %1641 = vst.msk [vmem:[%s2739_s6 + $0x38] sm:$0xff] %vm259_vm0, %v1535_v45 }
 0x21f   : > { %1639 = vst.msk [vmem:[%s2739_s6 + $0x28] sm:$0xff] %vm259_vm0, %v1527_v10 }
 0x229   : > { %v2137_v49 = vpop.f32.mrb[56].mxu0 }
 0x22a   : > { %v1548_v17 = vadd.f32 %v2137_v49, %v2734_v12  ;;  %v1539_v50 = vpop.f32.mrb[57].mxu0 }
 0x22b   : > { %v1540_v37 = vadd.f32 %v2734_v12, %v1539_v50  ;;  %v2138_v19 = vpop.f32.mrb[58].mxu0 }
 0x22c   : > { %1644 = vst.msk [vmem:[%s2739_s6 + $0x50] sm:$0xff] %vm259_vm0, %v1548_v17  ;;  %v1551_v51 = vadd.f32 %v2138_v19, %v2734_v12  ;;  %v1542_v53 = vpop.f32.mrb[59].mxu0 }
 0x22d   : > { %1642 = vst.msk [vmem:[%s2739_s6 + $0x40] sm:$0xff] %vm259_vm0, %v1540_v37  ;;  %v1543_v40 = vadd.f32 %v2734_v12, %v1542_v53 }
 0x22e   : > { %1645 = vst.msk [vmem:[%s2739_s6 + $0x58] sm:$0xff] %vm259_vm0, %v1551_v51 }
 0x22f   : > { %1643 = vst.msk [vmem:[%s2739_s6 + $0x48] sm:$0xff] %vm259_vm0, %v1543_v40 }
 0x239   : > { %v2141_v54 = vpop.f32.mrb[60].mxu0 }
 0x23a   : > { %v1564_v24 = vadd.f32 %v2141_v54, %v2734_v12  ;;  %v1555_v56 = vpop.f32.mrb[61].mxu0 }
 0x23b   : > { %v1556_v58 = vadd.f32 %v2734_v12, %v1555_v56  ;;  %v2142_v62 = vpop.f32.mrb[62].mxu0 }
 0x23c   : > { %1648 = vst.msk [vmem:[%s2739_s6 + $0x70] sm:$0xff] %vm259_vm0, %v1564_v24  ;;  %v1567_v23 = vadd.f32 %v2142_v62, %v2734_v12  ;;  %v1558_v1 = vpop.f32.mrb[63].mxu0 }
 0x23d   : > { %1646 = vst.msk [vmem:[%s2739_s6 + $0x60] sm:$0xff] %vm259_vm0, %v1556_v58  ;;  %v1559_v57 = vadd.f32 %v2734_v12, %v1558_v1 }
 0x23e   : > { %1649 = vst.msk [vmem:[%s2739_s6 + $0x78] sm:$0xff] %vm259_vm0, %v1567_v23 }
 0x23f   : > { %1647 = vst.msk [vmem:[%s2739_s6 + $0x68] sm:$0xff] %vm259_vm0, %v1559_v57 }
 0x249   : > { %v2145_v33 = vpop.f32.mrb[64].mxu0 }
 0x24a   : > { %v1580_v2 = vadd.f32 %v2145_v33, %v2734_v12  ;;  %v1571_v47 = vpop.f32.mrb[65].mxu0 }
 0x24b   : > { %v1572_v3 = vadd.f32 %v2734_v12, %v1571_v47  ;;  %v2146_v30 = vpop.f32.mrb[66].mxu0 }
 0x24c   : > { %1652 = vst.msk [vmem:[%s2739_s6 + $0x90] sm:$0xff] %vm259_vm0, %v1580_v2  ;;  %v1583_v42 = vadd.f32 %v2146_v30, %v2734_v12  ;;  %v1574_v52 = vpop.f32.mrb[67].mxu0 }
 0x24d   : > { %1650 = vst.msk [vmem:[%s2739_s6 + $0x80] sm:$0xff] %vm259_vm0, %v1572_v3  ;;  %v1575_v63 = vadd.f32 %v2734_v12, %v1574_v52 }
 0x24e   : > { %1653 = vst.msk [vmem:[%s2739_s6 + $0x98] sm:$0xff] %vm259_vm0, %v1583_v42 }
 0x24f   : > { %1651 = vst.msk [vmem:[%s2739_s6 + $0x88] sm:$0xff] %vm259_vm0, %v1575_v63 }
 0x259   : > { %v2149_v8 = vpop.f32.mrb[68].mxu0 }
 0x25a   : > { %v1596_v9 = vadd.f32 %v2149_v8, %v2734_v12  ;;  %v1587_v13 = vpop.f32.mrb[69].mxu0 }
 0x25b   : > { %v1588_v35 = vadd.f32 %v2734_v12, %v1587_v13  ;;  %v2150_v14 = vpop.f32.mrb[70].mxu0 }
 0x25c   : > { %1656 = vst.msk [vmem:[%s2739_s6 + $0xb0] sm:$0xff] %vm259_vm0, %v1596_v9  ;;  %v1599_v15 = vadd.f32 %v2150_v14, %v2734_v12  ;;  %v1590_v16 = vpop.f32.mrb[71].mxu0 }
 0x25d   : > { %1654 = vst.msk [vmem:[%s2739_s6 + $0xa0] sm:$0xff] %vm259_vm0, %v1588_v35  ;;  %v1591_v18 = vadd.f32 %v2734_v12, %v1590_v16 }
 0x25e   : > { %1657 = vst.msk [vmem:[%s2739_s6 + $0xb8] sm:$0xff] %vm259_vm0, %v1599_v15 }
 0x25f   : > { %1655 = vst.msk [vmem:[%s2739_s6 + $0xa8] sm:$0xff] %vm259_vm0, %v1591_v18 }
 0x269   : > { %v2153_v44 = vpop.f32.mrb[72].mxu0 }
 0x26a   : > { %v1612_v59 = vadd.f32 %v2153_v44, %v2734_v12  ;;  %v1603_v60 = vpop.f32.mrb[73].mxu0 }
 0x26b   : > { %v1604_v20 = vadd.f32 %v2734_v12, %v1603_v60  ;;  %v2154_v21 = vpop.f32.mrb[74].mxu0 }
 0x26c   : > { %1660 = vst.msk [vmem:[%s2739_s6 + $0xd0] sm:$0xff] %vm259_vm0, %v1612_v59  ;;  %v1615_v0 = vadd.f32 %v2154_v21, %v2734_v12  ;;  %v1606_v25 = vpop.f32.mrb[75].mxu0 }
 0x26d   : > { %1658 = vst.msk [vmem:[%s2739_s6 + $0xc0] sm:$0xff] %vm259_vm0, %v1604_v20  ;;  %v1607_v4 = vadd.f32 %v2734_v12, %v1606_v25 }
 0x26e   : > { %1661 = vst.msk [vmem:[%s2739_s6 + $0xd8] sm:$0xff] %vm259_vm0, %v1615_v0 }
 0x26f   : > { %1659 = vst.msk [vmem:[%s2739_s6 + $0xc8] sm:$0xff] %vm259_vm0, %v1607_v4 }
 0x279   : > { %v2157_v48 = vpop.f32.mrb[76].mxu0 }
 0x27a   : > { %v1628_v5 = vadd.f32 %v2157_v48, %v2734_v12  ;;  %v1619_v26 = vpop.f32.mrb[77].mxu0 }
 0x27b   : > { %v1620_v27 = vadd.f32 %v2734_v12, %v1619_v26  ;;  %v2158_v28 = vpop.f32.mrb[78].mxu0 }
 0x27c   : > { %1664 = vst.msk [vmem:[%s2739_s6 + $0xf0] sm:$0xff] %vm259_vm0, %v1628_v5  ;;  %v1631_v7 = vadd.f32 %v2158_v28, %v2734_v12  ;;  %v1622_v55 = vpop.f32.mrb[79].mxu0 }
 0x27d   : > { %1662 = vst.msk [vmem:[%s2739_s6 + $0xe0] sm:$0xff] %vm259_vm0, %v1620_v27  ;;  %v1623_v11 = vadd.f32 %v2734_v12, %v1622_v55 }
 0x27e   : > { %1665 = vst.msk [vmem:[%s2739_s6 + $0xf8] sm:$0xff] %vm259_vm0, %v1631_v7 }
 0x27f   : > { %1663 = vst.msk [vmem:[%s2739_s6 + $0xe8] sm:$0xff] %vm259_vm0, %v1623_v11 }
 0x280 PF: > { %s14_s17 = sadd.s32 1, %s2352_s17   ;;  %s2851_s15 = smov %s2348_s16 }
 0x281   : > { %p11_p5 = scmp.ge.s32.totalorder %s14_s17, 4   ;;  %s2852_s16 = smov %s2854_s18 }
 0x283   :  { %13 = sbr.rel (!%p11_p5) target bundleno = 2 (0x2), region = 77 }

// kernel: vgae_forward.3
= control target key start
LH: loop header
LB: loop body
LE: loop exit
PB: predicated region body
PF: predicated region fallthrough
CT: control target
= control target key end

     0   :  { %s2835_s15 = smov 0   ;;  %s2837_s16 = smov 0   ;;  %s3353_s0 = inlined_call_operand.vmem [shape: bf16[512,512], index: 0, kind: input, shape index: {}]   ;;  %s3354_s1 = inlined_call_operand.vmem [shape: bf16[512,16], index: 1, kind: input, shape index: {}]   ;;  %s3355_s2 = inlined_call_operand.vmem [shape: bf16[16,32], index: 2, kind: input, shape index: {}]   ;;  %s3356_s3 = inlined_call_operand.vmem [shape: f32[1,32], index: 3, kind: input, shape index: {}]   ;;  %s3357_s4 = inlined_call_operand.vmem [shape: bf16[512,32], index: 4, kind: output, shape index: {}]  }
   0x1   :  { %s2839_s17 = smov 0  }
   0x2 LB: > { %s26_s18 = sadd.s32 1, %s2803_s16  ;;  %p2103_p0 = scmp.ge.s32.totalorder %s2807_s17, 1  ;;  %s2807_s17 = sphi %s2839_s17, %s14_s17   ;;  %s2803_s16 = sphi %s2837_s16, %s3359_s16   ;;  %s2799_s15 = sphi %s2835_s15, %s3358_s15  }
   0x3   : > { %p28_p1 = scmp.ge.s32.totalorder %s26_s18, 2  ;;  %p194_p2 = scmp.lt.s32.totalorder %s2807_s17, 3 }
   0x5   : > { %s3361_s18 = smov (%p28_p1, %s26_s18), 0  ;;  %p195_p3 = pnand %p2103_p0, %p194_p2 }
   0x6   : > { %v2656_v0 = vld [vmem:[%s3355_s2] sm:$0xff] (!%p195_p3)   ;;  %vm524_vm0 = vcmask (!%p195_p3), 130048   ;;  %v2659_v3 = vld [vmem:[%s3354_s1 + $0x8] sm:$0xff] (!%p195_p3)   ;;  %v2661_v5 = vld [vmem:[%s3354_s1 + $0x10] sm:$0xff] (!%p195_p3)   ;;  %s2104_s19 = sshll.u32 (!%p195_p3), %s2799_s15, 5  ;;  %vm259_vm1 = vcmask (!%p195_p3), 261120  }
   0x7   : > { %198 = sbr.rel (%p195_p3) target bundleno = 649 (0x289), region = 36  ;;  %v2657_v1 = vld [vmem:[%s3354_s1] sm:$0xff] (!%p195_p3)   ;;  %2563 = vmatprep.subr.bf16.mxu0 (!%p195_p3), %v2656_v0  ;;  %2629 = vmatprep.subr.bf16.mxu1 (!%p195_p3), %v2656_v0  ;;  %v2660_v4 = vld [vmem:[%s3354_s1 + $0x88] sm:$0xff] (!%p195_p3)   ;;  %v2662_v6 = vld [vmem:[%s3354_s1 + $0x90] sm:$0xff] (!%p195_p3)   ;;  %p232_p4 = scmp.lt.s32.totalorder (!%p195_p3), %s2104_s19, 63  ;;  %vm1979_vm2 = vcmask (!%p195_p3), 257024  }
   0x8   : > { %v2658_v2 = vld [vmem:[%s3354_s1 + $0x80] sm:$0xff] (!%p195_p3)   ;;  %2564 = vmatpush3.bf16.msra.mxu0 (!%p195_p3), %v2656_v0  ;;  %2630 = vmatpush3.bf16.msra.mxu1 (!%p195_p3), %v2656_v0  ;;  %v2663_v7 = vld [vmem:[%s3354_s1 + $0x18] sm:$0xff] (!%p195_p3)   ;;  %v2667_v11 = vld [vmem:[%s3354_s1 + $0x28] sm:$0xff] (!%p195_p3)  }
   0x9   : > { %2565 = vmatprep.mubr.msk.bf16.mxu0 (!%p195_p3), %vm524_vm0, %v2657_v1  ;;  %2597 = vmatprep.mubr.msk.bf16.mxu1 (!%p195_p3), %vm524_vm0, %v2658_v2  ;;  %v2664_v8 = vld [vmem:[%s3354_s1 + $0x98] sm:$0xff] (!%p195_p3)   ;;  %v2665_v9 = vld [vmem:[%s3354_s1 + $0x20] sm:$0xff] (!%p195_p3)   ;;  %v2668_v12 = vld [vmem:[%s3354_s1 + $0xa8] sm:$0xff] (!%p195_p3)  }
   0xa   : > { %v2666_v10 = vld [vmem:[%s3354_s1 + $0xa0] sm:$0xff] (!%p195_p3)   ;;  %v2669_v13 = vld [vmem:[%s3354_s1 + $0x30] sm:$0xff] (!%p195_p3)   ;;  %v2671_v15 = vld [vmem:[%s3354_s1 + $0x38] sm:$0xff] (!%p195_p3)  }
   0xb   : > { %2566 = vmatmul.mubr.msk.bf16.vlgmr.msra.gmra.mrb[0].mxu0 (!%p195_p3), %vm524_vm0, %v2659_v3  ;;  %2598 = vmatmul.mubr.msk.bf16.vlgmr.msra.gmra.mrb[0].mxu1 (!%p195_p3), %vm524_vm0, %v2660_v4  ;;  %v2670_v14 = vld [vmem:[%s3354_s1 + $0xb0] sm:$0xff] (!%p195_p3)   ;;  %v2672_v16 = vld [vmem:[%s3354_s1 + $0xb8] sm:$0xff] (!%p195_p3)   ;;  %v2673_v17 = vld [vmem:[%s3354_s1 + $0x40] sm:$0xff] (!%p195_p3)  }
   0xc   : > { %2569 = vmatprep.mubr.msk.bf16.mxu0 (!%p195_p3), %vm524_vm0, %v2661_v5  ;;  %2601 = vmatprep.mubr.msk.bf16.mxu1 (!%p195_p3), %vm524_vm0, %v2662_v6  ;;  %v2674_v18 = vld [vmem:[%s3354_s1 + $0xc0] sm:$0xff] (!%p195_p3)   ;;  %v2675_v19 = vld [vmem:[%s3354_s1 + $0x48] sm:$0xff] (!%p195_p3)   ;;  %v2677_v21 = vld [vmem:[%s3354_s1 + $0x50] sm:$0xff] (!%p195_p3)  }
   0xd   : > { %v2676_v20 = vld [vmem:[%s3354_s1 + $0xc8] sm:$0xff] (!%p195_p3)   ;;  %v2678_v22 = vld [vmem:[%s3354_s1 + $0xd0] sm:$0xff] (!%p195_p3)   ;;  %v2679_v23 = vld [vmem:[%s3354_s1 + $0x58] sm:$0xff] (!%p195_p3)  }
   0xe   : > { %v2680_v24 = vld [vmem:[%s3354_s1 + $0xd8] sm:$0xff]   ;;  %v2681_v25 = vld [vmem:[%s3354_s1 + $0x60] sm:$0xff]   ;;  %v2683_v27 = vld [vmem:[%s3354_s1 + $0x68] sm:$0xff]   ;;  %s3363_s19 = smov (!%p232_p4, %s2104_s19), 63 }
   0xf   : > { %v2682_v26 = vld [vmem:[%s3354_s1 + $0xe0] sm:$0xff]   ;;  %v2684_v28 = vld [vmem:[%s3354_s1 + $0xe8] sm:$0xff]   ;;  %v2685_v29 = vld [vmem:[%s3354_s1 + $0x70] sm:$0xff]   ;;  %s2273_s20 = sshll.u32 %s3363_s19, 4  ;;  %s2108_s25 = sshll.u32 %s3363_s19, 2 }
  0x10   : > { %v2686_v30 = vld [vmem:[%s3354_s1 + $0xf0] sm:$0xff]   ;;  %v2687_v31 = vld [vmem:[%s3354_s1 + $0x78] sm:$0xff]   ;;  %s2993_s23 = scalar_lea.vmem %s3353_s0, %s2273_s20  ;;  %s3220_s28 = scalar_lea.vmem %s3357_s4, %s2108_s25 }
  0x11   : > { %v2688_v32 = vld [vmem:[%s3354_s1 + $0xf8] sm:$0xff]   ;;  %v2691_v33 = vld [vmem:[%s2993_s23 + $0x4] ss:$16 sps:$4 sm:$0xff]  }
  0x12   : > { %v2694_v34 = vld [vmem:[%s2993_s23 + $0xc] ss:$16 sps:$4 sm:$0xff]  }
  0x13   : > { %2570 = vmatmul.mubr.msk.bf16.gmra.mrb[4].mxu0 %vm524_vm0, %v2663_v7  ;;  %2602 = vmatmul.mubr.msk.bf16.gmra.mrb[4].mxu1 %vm524_vm0, %v2664_v8 }
  0x14   : > { %2573 = vmatprep.mubr.msk.bf16.mxu0 %vm524_vm0, %v2665_v9  ;;  %2605 = vmatprep.mubr.msk.bf16.mxu1 %vm524_vm0, %v2666_v10 }
  0x1b   : > { %2574 = vmatmul.mubr.msk.bf16.gmra.mrb[8].mxu0 %vm524_vm0, %v2667_v11  ;;  %2606 = vmatmul.mubr.msk.bf16.gmra.mrb[8].mxu1 %vm524_vm0, %v2668_v12 }
  0x1c   : > { %2577 = vmatprep.mubr.msk.bf16.mxu0 %vm524_vm0, %v2669_v13  ;;  %2609 = vmatprep.mubr.msk.bf16.mxu1 %vm524_vm0, %v2670_v14 }
  0x23   : > { %2578 = vmatmul.mubr.msk.bf16.gmra.mrb[12].mxu0 %vm524_vm0, %v2671_v15  ;;  %2610 = vmatmul.mubr.msk.bf16.gmra.mrb[12].mxu1 %vm524_vm0, %v2672_v16 }
  0x24   : > { %2581 = vmatprep.mubr.msk.bf16.mxu0 %vm524_vm0, %v2673_v17  ;;  %2613 = vmatprep.mubr.msk.bf16.mxu1 %vm524_vm0, %v2674_v18 }
  0x2b   : > { %2582 = vmatmul.mubr.msk.bf16.gmra.mrb[16].mxu0 %vm524_vm0, %v2675_v19  ;;  %2614 = vmatmul.mubr.msk.bf16.gmra.mrb[16].mxu1 %vm524_vm0, %v2676_v20 }
  0x2c   : > { %2585 = vmatprep.mubr.msk.bf16.mxu0 %vm524_vm0, %v2677_v21  ;;  %2617 = vmatprep.mubr.msk.bf16.mxu1 %vm524_vm0, %v2678_v22 }
  0x33   : > { %2586 = vmatmul.mubr.msk.bf16.gmra.mrb[20].mxu0 %vm524_vm0, %v2679_v23  ;;  %2618 = vmatmul.mubr.msk.bf16.gmra.mrb[20].mxu1 %vm524_vm0, %v2680_v24 }
  0x34   : > { %2589 = vmatprep.mubr.msk.bf16.mxu0 %vm524_vm0, %v2681_v25  ;;  %2621 = vmatprep.mubr.msk.bf16.mxu1 %vm524_vm0, %v2682_v26 }
  0x3b   : > { %2590 = vmatmul.mubr.msk.bf16.gmra.mrb[24].mxu0 %vm524_vm0, %v2683_v27  ;;  %2622 = vmatmul.mubr.msk.bf16.gmra.mrb[24].mxu1 %vm524_vm0, %v2684_v28 }
  0x3c   : > { %2593 = vmatprep.mubr.msk.bf16.mxu0 %vm524_vm0, %v2685_v29  ;;  %2625 = vmatprep.mubr.msk.bf16.mxu1 %vm524_vm0, %v2686_v30 }
  0x43   : > { %2594 = vmatmul.mubr.msk.bf16.gmra.mrb[28].mxu0 %vm524_vm0, %v2687_v31  ;;  %2626 = vmatmul.mubr.msk.bf16.gmra.mrb[28].mxu1 %vm524_vm0, %v2688_v32 }
  0x44   : > { %1390 = vmatprep.mubr.bf16.mxu1 %v2691_v33  ;;  %1551 = vmatprep.mubr.bf16.mxu0 %v2694_v34 }
  0xde   : > { %v2997_v35 = vpop.f32.mrb[0].mxu0  ;;  %v2999_v36 = vpop.f32.mrb[0].mxu1 }
  0xdf   : > { %v655_v37 = vpop.f32.mrb[1].mxu0  ;;  %v783_v38 = vpop.f32.mrb[1].mxu1 }
  0xe0   : > { %v3001_v39 = vpop.f32.mrb[2].mxu0  ;;  %v3003_v40 = vpop.f32.mrb[2].mxu1 }
  0xe1   : > { %v911_v41 = vpack.c.bf16 %v3001_v39, %v2997_v35  ;;  %v927_v42 = vpack.c.bf16 %v3003_v40, %v2999_v36  ;;  %v658_v43 = vpop.f32.mrb[3].mxu0  ;;  %v786_v44 = vpop.f32.mrb[3].mxu1 }
  0xe2   : > { %v910_v45 = vpack.c.bf16 %v658_v43, %v655_v37  ;;  %v926_v46 = vpack.c.bf16 %v786_v44, %v783_v38 }
  0xe6   : > { %v3009_v47 = vpop.f32.mrb[4].mxu0  ;;  %v3011_v48 = vpop.f32.mrb[4].mxu1 }
  0xe7   : > { %v3013_v49 = vpop.f32.mrb[5].mxu0  ;;  %v3015_v50 = vpop.f32.mrb[5].mxu1 }
  0xe8   : > { %v3017_v51 = vpop.f32.mrb[6].mxu0  ;;  %v3019_v52 = vpop.f32.mrb[6].mxu1 }
  0xe9   : > { %v913_v53 = vpack.c.bf16 %v3017_v51, %v3009_v47  ;;  %v929_v54 = vpack.c.bf16 %v3019_v52, %v3011_v48  ;;  %v674_v55 = vpop.f32.mrb[7].mxu0  ;;  %v802_v56 = vpop.f32.mrb[7].mxu1 }
  0xea   : > { %v912_v57 = vpack.c.bf16 %v674_v55, %v3013_v49  ;;  %v928_v58 = vpack.c.bf16 %v802_v56, %v3015_v50 }
  0xee   : > { %v3027_v59 = vpop.f32.mrb[8].mxu0  ;;  %v3029_v60 = vpop.f32.mrb[8].mxu1 }
  0xef   : > { %v3031_v61 = vpop.f32.mrb[9].mxu0  ;;  %v3033_v62 = vpop.f32.mrb[9].mxu1 }
  0xf0   : > { %v3035_v63 = vpop.f32.mrb[10].mxu0  ;;  %v3037_v0 = vpop.f32.mrb[10].mxu1 }
  0xf1   : > { %v915_v1 = vpack.c.bf16 %v3035_v63, %v3027_v59  ;;  %v931_v2 = vpack.c.bf16 %v3037_v0, %v3029_v60  ;;  %v3043_v3 = vpop.f32.mrb[11].mxu0  ;;  %v3045_v4 = vpop.f32.mrb[11].mxu1  ;;  %v2689_v59 = vld [vmem:[%s2993_s23] ss:$16 sps:$4 sm:$0xff]   ;;  %v2692_v60 = vld [vmem:[%s2993_s23 + $0x8] ss:$16 sps:$4 sm:$0xff]  }
  0xf2   : > { %v914_v5 = vpack.c.bf16 %v3043_v3, %v3031_v61  ;;  %v930_v6 = vpack.c.bf16 %v3045_v4, %v3033_v62  ;;  %v2695_v63 = vld [vmem:[%s2993_s23 + $0x24] ss:$16 sps:$4 sm:$0xff]   ;;  %v2697_v0 = vld [vmem:[%s2993_s23 + $0x2c] ss:$16 sps:$4 sm:$0xff]  }
  0xf3   : > { %v2701_v4 = vld [vmem:[%s2993_s23 + $0x44] ss:$16 sps:$4 sm:$0xff]  }
  0xf6   : > { %v3051_v7 = vpop.f32.mrb[12].mxu0  ;;  %v3053_v8 = vpop.f32.mrb[12].mxu1 }
  0xf7   : > { %v3055_v9 = vpop.f32.mrb[13].mxu0  ;;  %v3057_v10 = vpop.f32.mrb[13].mxu1 }
  0xf8   : > { %v3059_v11 = vpop.f32.mrb[14].mxu0  ;;  %v3061_v12 = vpop.f32.mrb[14].mxu1 }
  0xf9   : > { %v917_v13 = vpack.c.bf16 %v3059_v11, %v3051_v7  ;;  %v933_v14 = vpack.c.bf16 %v3061_v12, %v3053_v8  ;;  %v3067_v15 = vpop.f32.mrb[15].mxu0  ;;  %v3069_v16 = vpop.f32.mrb[15].mxu1  ;;  %v2706_v7 = vld [vmem:[%s2993_s23 + $0x48] ss:$16 sps:$4 sm:$0xff]   ;;  %v2707_v8 = vld [vmem:[%s2993_s23 + $0x64] ss:$16 sps:$4 sm:$0xff]  }
  0xfa   : > { %v916_v17 = vpack.c.bf16 %v3067_v15, %v3055_v9  ;;  %v932_v18 = vpack.c.bf16 %v3069_v16, %v3057_v10  ;;  %v2709_v9 = vld [vmem:[%s2993_s23 + $0x6c] ss:$16 sps:$4 sm:$0xff]   ;;  %v2711_v10 = vld [vmem:[%s2993_s23 + $0x60] ss:$16 sps:$4 sm:$0xff]   ;;  %v2712_v11 = vld [vmem:[%s2993_s23 + $0x68] ss:$16 sps:$4 sm:$0xff]  }
  0xfb   : > { %v2713_v12 = vld [vmem:[%s2993_s23 + $0x84] ss:$16 sps:$4 sm:$0xff]   ;;  %v2718_v15 = vld [vmem:[%s2993_s23 + $0x88] ss:$16 sps:$4 sm:$0xff]  }
  0xfc   : > { %v2719_v16 = vld [vmem:[%s2993_s23 + $0xa4] ss:$16 sps:$4 sm:$0xff]  }
  0xfe   : > { %v2583_v19 = vpop.f32.mrb[16].mxu0  ;;  %v2615_v20 = vpop.f32.mrb[16].mxu1 }
  0xff   : > { %v719_v21 = vpop.f32.mrb[17].mxu0  ;;  %v847_v22 = vpop.f32.mrb[17].mxu1 }
 0x100   : > { %v2584_v23 = vpop.f32.mrb[18].mxu0  ;;  %v2616_v24 = vpop.f32.mrb[18].mxu1 }
 0x101   : > { %v919_v25 = vpack.c.bf16 %v2584_v23, %v2583_v19  ;;  %v935_v26 = vpack.c.bf16 %v2616_v24, %v2615_v20  ;;  %v722_v27 = vpop.f32.mrb[19].mxu0  ;;  %v850_v28 = vpop.f32.mrb[19].mxu1  ;;  %v2724_v24 = vld [vmem:[%s2993_s23 + $0xa8] ss:$16 sps:$4 sm:$0xff]  }
 0x102   : > { %v918_v29 = vpack.c.bf16 %v722_v27, %v719_v21  ;;  %v934_v30 = vpack.c.bf16 %v850_v28, %v847_v22  ;;  %v2729_v27 = vld [vmem:[%s2993_s23 + $0xc0] ss:$16 sps:$4 sm:$0xff]   ;;  %v2730_v28 = vld [vmem:[%s2993_s23 + $0xc8] ss:$16 sps:$4 sm:$0xff]  }
 0x104   : > { %2339 = vmatprep.subr.bf16.mxu1 %v918_v29  ;;  %2451 = vmatprep.subr.bf16.mxu0 %v934_v30  ;;  %v2731_v29 = vld [vmem:[%s2993_s23 + $0xe4] ss:$16 sps:$4 sm:$0xff]   ;;  %v2733_v30 = vld [vmem:[%s2993_s23 + $0xec] ss:$16 sps:$4 sm:$0xff]  }
 0x105   : > { %2340 = vmatpush3.bf16.msra.mxu1 %v910_v45  ;;  %2452 = vmatpush3.bf16.msra.mxu0 %v926_v46 }
 0x106   : > { %v2587_v31 = vpop.f32.mrb[20].mxu0  ;;  %v2619_v32 = vpop.f32.mrb[20].mxu1  ;;  %2341 = vmatprep.subr.bf16.mxu1 %v919_v25  ;;  %2453 = vmatprep.subr.bf16.mxu0 %v935_v26  ;;  %v2725_v25 = vld [vmem:[%s2993_s23 + $0xc4] ss:$16 sps:$4 sm:$0xff]   ;;  %v2727_v26 = vld [vmem:[%s2993_s23 + $0xcc] ss:$16 sps:$4 sm:$0xff]  }
 0x107   : > { %v735_v33 = vpop.f32.mrb[21].mxu0  ;;  %v863_v34 = vpop.f32.mrb[21].mxu1 }
 0x108   : > { %v2588_v37 = vpop.f32.mrb[22].mxu0  ;;  %v2620_v38 = vpop.f32.mrb[22].mxu1 }
 0x109   : > { %v921_v43 = vpack.c.bf16 %v2588_v37, %v2587_v31  ;;  %v937_v44 = vpack.c.bf16 %v2620_v38, %v2619_v32  ;;  %v738_v49 = vpop.f32.mrb[23].mxu0  ;;  %v866_v50 = vpop.f32.mrb[23].mxu1  ;;  %2342 = vmatpush3.bf16.msra.mxu1 %v911_v41  ;;  %2454 = vmatpush3.bf16.msra.mxu0 %v927_v42  ;;  %v2735_v31 = vld [vmem:[%s2993_s23 + $0xe0] ss:$16 sps:$4 sm:$0xff]   ;;  %v2736_v32 = vld [vmem:[%s2993_s23 + $0xe8] ss:$16 sps:$4 sm:$0xff]  }
 0x10a   : > { %v920_v45 = vpack.c.bf16 %v738_v49, %v735_v33  ;;  %v936_v46 = vpack.c.bf16 %v866_v50, %v863_v34  ;;  %v2737_v33 = vld [vmem:[%s2993_s23 + $0x104] ss:$16 sps:$4 sm:$0xff]   ;;  %v2739_v34 = vld [vmem:[%s2993_s23 + $0x10c] ss:$16 sps:$4 sm:$0xff]   ;;  %v2741_v37 = vld [vmem:[%s2993_s23 + $0x100] ss:$16 sps:$4 sm:$0xff]  }
 0x10b   : > { %v2742_v38 = vld [vmem:[%s2993_s23 + $0x108] ss:$16 sps:$4 sm:$0xff]   ;;  %v2747_v49 = vld [vmem:[%s2993_s23 + $0x120] ss:$16 sps:$4 sm:$0xff]  }
 0x10c   : > { %2343 = vmatprep.subr.bf16.mxu1 %v920_v45  ;;  %2455 = vmatprep.subr.bf16.mxu0 %v936_v46  ;;  %v2748_v50 = vld [vmem:[%s2993_s23 + $0x128] ss:$16 sps:$4 sm:$0xff]   ;;  %v2749_v45 = vld [vmem:[%s2993_s23 + $0x144] ss:$16 sps:$4 sm:$0xff]   ;;  %v2751_v46 = vld [vmem:[%s2993_s23 + $0x14c] ss:$16 sps:$4 sm:$0xff]  }
 0x10d   : > { %2344 = vmatpush3.bf16.msra.mxu1 %v912_v57  ;;  %2456 = vmatpush3.bf16.msra.mxu0 %v928_v58 }
 0x10e   : > { %v2591_v55 = vpop.f32.mrb[24].mxu0  ;;  %v2623_v56 = vpop.f32.mrb[24].mxu1  ;;  %2345 = vmatprep.subr.bf16.mxu1 %v921_v43  ;;  %2457 = vmatprep.subr.bf16.mxu0 %v937_v44  ;;  %v2743_v43 = vld [vmem:[%s2993_s23 + $0x124] ss:$16 sps:$4 sm:$0xff]   ;;  %v2745_v44 = vld [vmem:[%s2993_s23 + $0x12c] ss:$16 sps:$4 sm:$0xff]  }
 0x10f   : > { %v751_v19 = vpop.f32.mrb[25].mxu0  ;;  %v879_v20 = vpop.f32.mrb[25].mxu1 }
 0x110   : > { %v2592_v21 = vpop.f32.mrb[26].mxu0  ;;  %v2624_v22 = vpop.f32.mrb[26].mxu1 }
 0x111   : > { %v923_v35 = vpack.c.bf16 %v2592_v21, %v2591_v55  ;;  %v939_v39 = vpack.c.bf16 %v2624_v22, %v2623_v56  ;;  %v754_v41 = vpop.f32.mrb[27].mxu0  ;;  %v882_v23 = vpop.f32.mrb[27].mxu1  ;;  %2346 = vmatpush3.bf16.msra.mxu1 %v913_v53  ;;  %2458 = vmatpush3.bf16.msra.mxu0 %v929_v54  ;;  %v2753_v55 = vld [vmem:[%s2993_s23 + $0x140] ss:$16 sps:$4 sm:$0xff]   ;;  %v2754_v56 = vld [vmem:[%s2993_s23 + $0x148] ss:$16 sps:$4 sm:$0xff]  }
 0x112   : > { %v922_v36 = vpack.c.bf16 %v754_v41, %v751_v19  ;;  %v938_v40 = vpack.c.bf16 %v882_v23, %v879_v20  ;;  %v2755_v19 = vld [vmem:[%s2993_s23 + $0x164] ss:$16 sps:$4 sm:$0xff]   ;;  %v2757_v20 = vld [vmem:[%s2993_s23 + $0x16c] ss:$16 sps:$4 sm:$0xff]   ;;  %v2809_v21 = vmov 0.0  }
 0x113   : > { %260 = vst.msk [vmem:[#allocation2] sm:$0xff] %vm259_vm1, %v2809_v21  ;;  %261 = vst.msk [vmem:[#allocation2 + $0x8] sm:$0xff] %vm259_vm1, %v2809_v21  ;;  %v2759_v22 = vld [vmem:[%s2993_s23 + $0x160] ss:$16 sps:$4 sm:$0xff]   ;;  %v2763_v41 = vld [vmem:[%s2993_s23 + $0x18c] ss:$16 sps:$4 sm:$0xff]  }
 0x114   : > { %2347 = vmatprep.subr.bf16.mxu1 %v922_v36  ;;  %2459 = vmatprep.subr.bf16.mxu0 %v938_v40  ;;  %262 = vst.msk [vmem:[#allocation2 + $0x10] sm:$0xff] %vm259_vm1, %v2809_v21  ;;  %263 = vst.msk [vmem:[#allocation2 + $0x18] sm:$0xff] %vm259_vm1, %v2809_v21  ;;  %v2765_v23 = vld [vmem:[%s2993_s23 + $0x180] ss:$16 sps:$4 sm:$0xff]   ;;  %v2766_v36 = vld [vmem:[%s2993_s23 + $0x188] ss:$16 sps:$4 sm:$0xff]  }
 0x115   : > { %2348 = vmatpush3.bf16.msra.mxu1 %v914_v5  ;;  %2460 = vmatpush3.bf16.msra.mxu0 %v930_v6  ;;  %v2703_v5 = vld [vmem:[%s2993_s23 + $0x4c] ss:$16 sps:$4 sm:$0xff]   ;;  %v2705_v6 = vld [vmem:[%s2993_s23 + $0x40] ss:$16 sps:$4 sm:$0xff]   ;;  %264 = vst.msk [vmem:[#allocation2 + $0x20] sm:$0xff] %vm259_vm1, %v2809_v21  ;;  %265 = vst.msk [vmem:[#allocation2 + $0x28] sm:$0xff] %vm259_vm1, %v2809_v21 }
 0x116   : > { %v2595_v42 = vpop.f32.mrb[28].mxu0  ;;  %v2627_v57 = vpop.f32.mrb[28].mxu1  ;;  %2349 = vmatprep.subr.bf16.mxu1 %v923_v35  ;;  %2461 = vmatprep.subr.bf16.mxu0 %v939_v39  ;;  %266 = vst.msk [vmem:[#allocation2 + $0x30] sm:$0xff] %vm259_vm1, %v2809_v21  ;;  %267 = vst.msk [vmem:[#allocation2 + $0x38] sm:$0xff] %vm259_vm1, %v2809_v21  ;;  %v2760_v35 = vld [vmem:[%s2993_s23 + $0x168] ss:$16 sps:$4 sm:$0xff]  }
 0x117   : > { %v767_v47 = vpop.f32.mrb[29].mxu0  ;;  %v895_v51 = vpop.f32.mrb[29].mxu1  ;;  %268 = vst.msk [vmem:[#allocation2 + $0x40] sm:$0xff] %vm259_vm1, %v2809_v21  ;;  %269 = vst.msk [vmem:[#allocation2 + $0x48] sm:$0xff] %vm259_vm1, %v2809_v21  ;;  %v2761_v39 = vld [vmem:[%s2993_s23 + $0x184] ss:$16 sps:$4 sm:$0xff]  }
 0x118   : > { %v2596_v48 = vpop.f32.mrb[30].mxu0  ;;  %v2628_v52 = vpop.f32.mrb[30].mxu1  ;;  %270 = vst.msk [vmem:[#allocation2 + $0x50] sm:$0xff] %vm259_vm1, %v2809_v21  ;;  %271 = vst.msk [vmem:[#allocation2 + $0x58] sm:$0xff] %vm259_vm1, %v2809_v21  ;;  %v2767_v40 = vld [vmem:[%s2993_s23 + $0x1a4] ss:$16 sps:$4 sm:$0xff]  }
 0x119   : > { %v925_v53 = vpack.c.bf16 %v2596_v48, %v2595_v42  ;;  %v941_v54 = vpack.c.bf16 %v2628_v52, %v2627_v57  ;;  %v770_v58 = vpop.f32.mrb[31].mxu0  ;;  %v898_v61 = vpop.f32.mrb[31].mxu1  ;;  %2350 = vmatpush3.bf16.msra.mxu1 %v915_v1  ;;  %2462 = vmatpush3.bf16.msra.mxu0 %v931_v2  ;;  %v2699_v1 = vld [vmem:[%s2993_s23 + $0x20] ss:$16 sps:$4 sm:$0xff]   ;;  %v2700_v2 = vld [vmem:[%s2993_s23 + $0x28] ss:$16 sps:$4 sm:$0xff]  }
 0x11a   : > { %v924_v62 = vpack.c.bf16 %v770_v58, %v767_v47  ;;  %v940_v3 = vpack.c.bf16 %v898_v61, %v895_v51  ;;  %272 = vst.msk [vmem:[#allocation2 + $0x60] sm:$0xff] %vm259_vm1, %v2809_v21  ;;  %273 = vst.msk [vmem:[#allocation2 + $0x68] sm:$0xff] %vm259_vm1, %v2809_v21  ;;  %v2769_v42 = vld [vmem:[%s2993_s23 + $0x1ac] ss:$16 sps:$4 sm:$0xff]   ;;  %v2771_v57 = vld [vmem:[%s2993_s23 + $0x1a0] ss:$16 sps:$4 sm:$0xff]  }
 0x11b   : > { %274 = vst.msk [vmem:[#allocation2 + $0x70] sm:$0xff] %vm259_vm1, %v2809_v21  ;;  %275 = vst.msk [vmem:[#allocation2 + $0x78] sm:$0xff] %vm259_vm1, %v2809_v21  ;;  %v2772_v47 = vld [vmem:[%s2993_s23 + $0x1a8] ss:$16 sps:$4 sm:$0xff]   ;;  %v2773_v51 = vld [vmem:[%s2993_s23 + $0x1c4] ss:$16 sps:$4 sm:$0xff]  }
 0x11c   : > { %2351 = vmatprep.subr.bf16.mxu1 %v924_v62  ;;  %2463 = vmatprep.subr.bf16.mxu0 %v940_v3  ;;  %276 = vst.msk [vmem:[#allocation2 + $0x80] sm:$0xff] %vm259_vm1, %v2809_v21  ;;  %277 = vst.msk [vmem:[#allocation2 + $0x88] sm:$0xff] %vm259_vm1, %v2809_v21  ;;  %v2775_v48 = vld [vmem:[%s2993_s23 + $0x1cc] ss:$16 sps:$4 sm:$0xff]   ;;  %v2777_v52 = vld [vmem:[%s2993_s23 + $0x1c0] ss:$16 sps:$4 sm:$0xff]  }
 0x11d   : > { %2352 = vmatpush3.bf16.msra.mxu1 %v916_v17  ;;  %2464 = vmatpush3.bf16.msra.mxu0 %v932_v18  ;;  %v2721_v17 = vld [vmem:[%s2993_s23 + $0xac] ss:$16 sps:$4 sm:$0xff]   ;;  %v2723_v18 = vld [vmem:[%s2993_s23 + $0xa0] ss:$16 sps:$4 sm:$0xff]   ;;  %278 = vst.msk [vmem:[#allocation2 + $0x90] sm:$0xff] %vm259_vm1, %v2809_v21  ;;  %279 = vst.msk [vmem:[#allocation2 + $0x98] sm:$0xff] %vm259_vm1, %v2809_v21 }
 0x11e   : > { %2353 = vmatprep.subr.bf16.mxu1 %v925_v53  ;;  %2465 = vmatprep.subr.bf16.mxu0 %v941_v54  ;;  %280 = vst.msk [vmem:[#allocation2 + $0xa0] sm:$0xff] %vm259_vm1, %v2809_v21  ;;  %281 = vst.msk [vmem:[#allocation2 + $0xa8] sm:$0xff] %vm259_vm1, %v2809_v21  ;;  %v2778_v53 = vld [vmem:[%s2993_s23 + $0x1c8] ss:$16 sps:$4 sm:$0xff]   ;;  %v2779_v54 = vld [vmem:[%s2993_s23 + $0x1e4] ss:$16 sps:$4 sm:$0xff]  }
 0x11f   : > { %282 = vst.msk [vmem:[#allocation2 + $0xb0] sm:$0xff] %vm259_vm1, %v2809_v21  ;;  %283 = vst.msk [vmem:[#allocation2 + $0xb8] sm:$0xff] %vm259_vm1, %v2809_v21  ;;  %v2781_v58 = vld [vmem:[%s2993_s23 + $0x1ec] ss:$16 sps:$4 sm:$0xff]   ;;  %v2783_v61 = vld [vmem:[%s2993_s23 + $0x1e0] ss:$16 sps:$4 sm:$0xff]  }
 0x120   : > { %284 = vst.msk [vmem:[#allocation2 + $0xc0] sm:$0xff] %vm259_vm1, %v2809_v21  ;;  %285 = vst.msk [vmem:[#allocation2 + $0xc8] sm:$0xff] %vm259_vm1, %v2809_v21  ;;  %v2784_v62 = vld [vmem:[%s2993_s23 + $0x1e8] ss:$16 sps:$4 sm:$0xff]  }
 0x121   : > { %2354 = vmatpush3.bf16.msra.mxu1 %v917_v13  ;;  %2466 = vmatpush3.bf16.msra.mxu0 %v933_v14  ;;  %v2715_v13 = vld [vmem:[%s2993_s23 + $0x8c] ss:$16 sps:$4 sm:$0xff]   ;;  %v2717_v14 = vld [vmem:[%s2993_s23 + $0x80] ss:$16 sps:$4 sm:$0xff]   ;;  %286 = vst.msk [vmem:[#allocation2 + $0xd0] sm:$0xff] %vm259_vm1, %v2809_v21  ;;  %287 = vst.msk [vmem:[#allocation2 + $0xd8] sm:$0xff] %vm259_vm1, %v2809_v21 }
 0x122   : > { %288 = vst.msk [vmem:[#allocation2 + $0xe0] sm:$0xff] %vm259_vm1, %v2809_v21  ;;  %289 = vst.msk [vmem:[#allocation2 + $0xe8] sm:$0xff] %vm259_vm1, %v2809_v21 }
 0x123   : > { %290 = vst.msk [vmem:[#allocation2 + $0xf0] sm:$0xff] %vm259_vm1, %v2809_v21  ;;  %291 = vst.msk [vmem:[#allocation2 + $0xf8] sm:$0xff] %vm259_vm1, %v2809_v21 }
 0x124   : > { %1391 = vmatmul.mubr.bf16.vlgmr.msra.gmra.mrb[32].mxu1 %v2689_v59  ;;  %1552 = vmatmul.mubr.bf16.vlgmr.msra.gmra.mrb[32].mxu0 %v2692_v60 }
 0x125   : > { %1398 = vmatprep.mubr.bf16.mxu1 %v2695_v63  ;;  %1559 = vmatprep.mubr.bf16.mxu0 %v2697_v0 }
 0x12c   : > { %1399 = vmatmul.mubr.bf16.gmra.mrb[36].mxu1 %v2699_v1  ;;  %1560 = vmatmul.mubr.bf16.gmra.mrb[36].mxu0 %v2700_v2 }
 0x12d   : > { %1406 = vmatprep.mubr.bf16.mxu1 %v2701_v4  ;;  %1567 = vmatprep.mubr.bf16.mxu0 %v2703_v5  ;;  %v942_v5 = vld [vmem:[#allocation2] sm:$0xff] }
 0x134   : > { %1407 = vmatmul.mubr.bf16.gmra.mrb[40].mxu1 %v2705_v6  ;;  %1568 = vmatmul.mubr.bf16.gmra.mrb[40].mxu0 %v2706_v7 }
 0x135   : > { %1414 = vmatprep.mubr.bf16.mxu1 %v2707_v8  ;;  %1575 = vmatprep.mubr.bf16.mxu0 %v2709_v9 }
 0x13c   : > { %1415 = vmatmul.mubr.bf16.gmra.mrb[44].mxu1 %v2711_v10  ;;  %1576 = vmatmul.mubr.bf16.gmra.mrb[44].mxu0 %v2712_v11  ;;  %v943_v11 = vld [vmem:[#allocation2 + $0x8] sm:$0xff] }
 0x13d   : > { %1422 = vmatprep.mubr.bf16.mxu1 %v2713_v12  ;;  %1583 = vmatprep.mubr.bf16.mxu0 %v2715_v13 }
 0x144   : > { %1423 = vmatmul.mubr.bf16.gmra.mrb[48].mxu1 %v2717_v14  ;;  %1584 = vmatmul.mubr.bf16.gmra.mrb[48].mxu0 %v2718_v15 }
 0x145   : > { %1430 = vmatprep.mubr.bf16.mxu1 %v2719_v16  ;;  %1591 = vmatprep.mubr.bf16.mxu0 %v2721_v17 }
 0x14c   : > { %1431 = vmatmul.mubr.bf16.gmra.mrb[52].mxu1 %v2723_v18  ;;  %1592 = vmatmul.mubr.bf16.gmra.mrb[52].mxu0 %v2724_v24 }
 0x14d   : > { %1438 = vmatprep.mubr.bf16.mxu1 %v2725_v25  ;;  %1599 = vmatprep.mubr.bf16.mxu0 %v2727_v26 }
 0x154   : > { %1439 = vmatmul.mubr.bf16.gmra.mrb[56].mxu1 %v2729_v27  ;;  %1600 = vmatmul.mubr.bf16.gmra.mrb[56].mxu0 %v2730_v28  ;;  %v944_v28 = vld [vmem:[#allocation2 + $0x10] sm:$0xff] }
 0x155   : > { %1446 = vmatprep.mubr.bf16.mxu1 %v2731_v29  ;;  %1607 = vmatprep.mubr.bf16.mxu0 %v2733_v30 }
 0x15c   : > { %1447 = vmatmul.mubr.bf16.gmra.mrb[60].mxu1 %v2735_v31  ;;  %1608 = vmatmul.mubr.bf16.gmra.mrb[60].mxu0 %v2736_v32 }
 0x15d   : > { %1454 = vmatprep.mubr.bf16.mxu1 %v2737_v33  ;;  %1615 = vmatprep.mubr.bf16.mxu0 %v2739_v34  ;;  %v3210_v34 = vld [vmem:[%s3356_s3] ss:$0 sm:$0xff] }
 0x164   : > { %1455 = vmatmul.mubr.bf16.gmra.mrb[64].mxu1 %v2741_v37  ;;  %1616 = vmatmul.mubr.bf16.gmra.mrb[64].mxu0 %v2742_v38  ;;  %v945_v37 = vld [vmem:[#allocation2 + $0x18] sm:$0xff] }
 0x165   : > { %1462 = vmatprep.mubr.bf16.mxu1 %v2743_v43  ;;  %1623 = vmatprep.mubr.bf16.mxu0 %v2745_v44 }
 0x16c   : > { %1463 = vmatmul.mubr.bf16.gmra.mrb[68].mxu1 %v2747_v49  ;;  %1624 = vmatmul.mubr.bf16.gmra.mrb[68].mxu0 %v2748_v50 }
 0x16d   : > { %1470 = vmatprep.mubr.bf16.mxu1 %v2749_v45  ;;  %1631 = vmatprep.mubr.bf16.mxu0 %v2751_v46 }
 0x174   : > { %1471 = vmatmul.mubr.bf16.gmra.mrb[72].mxu1 %v2753_v55  ;;  %1632 = vmatmul.mubr.bf16.gmra.mrb[72].mxu0 %v2754_v56 }
 0x175   : > { %1478 = vmatprep.mubr.bf16.mxu1 %v2755_v19  ;;  %1639 = vmatprep.mubr.bf16.mxu0 %v2757_v20 }
 0x17c   : > { %1479 = vmatmul.mubr.bf16.gmra.mrb[76].mxu1 %v2759_v22  ;;  %1640 = vmatmul.mubr.bf16.gmra.mrb[76].mxu0 %v2760_v35 }
 0x17d   : > { %1486 = vmatprep.mubr.bf16.mxu1 %v2761_v39  ;;  %1647 = vmatprep.mubr.bf16.mxu0 %v2763_v41 }
 0x184   : > { %1487 = vmatmul.mubr.bf16.gmra.mrb[80].mxu1 %v2765_v23  ;;  %1648 = vmatmul.mubr.bf16.gmra.mrb[80].mxu0 %v2766_v36  ;;  %v946_v23 = vld [vmem:[#allocation2 + $0x20] sm:$0xff] }
 0x185   : > { %1494 = vmatprep.mubr.bf16.mxu1 %v2767_v40  ;;  %1655 = vmatprep.mubr.bf16.mxu0 %v2769_v42 }
 0x18c   : > { %1495 = vmatmul.mubr.bf16.gmra.mrb[84].mxu1 %v2771_v57  ;;  %1656 = vmatmul.mubr.bf16.gmra.mrb[84].mxu0 %v2772_v47 }
 0x18d   : > { %1502 = vmatprep.mubr.bf16.mxu1 %v2773_v51  ;;  %1663 = vmatprep.mubr.bf16.mxu0 %v2775_v48 }
 0x194   : > { %1503 = vmatmul.mubr.bf16.gmra.mrb[88].mxu1 %v2777_v52  ;;  %1664 = vmatmul.mubr.bf16.gmra.mrb[88].mxu0 %v2778_v53 }
 0x195   : > { %1510 = vmatprep.mubr.bf16.mxu1 %v2779_v54  ;;  %1671 = vmatprep.mubr.bf16.mxu0 %v2781_v58  ;;  %v947_v54 = vld [vmem:[#allocation2 + $0x28] sm:$0xff] }
 0x19c   : > { %1511 = vmatmul.mubr.bf16.gmra.mrb[92].mxu1 %v2783_v61  ;;  %1672 = vmatmul.mubr.bf16.gmra.mrb[92].mxu0 %v2784_v62 }
 0x1f7   : > { %v2355_v3 = vpop.f32.mrb[32].mxu1  ;;  %v2467_v59 = vpop.f32.mrb[32].mxu0 }
 0x1f8   : > { %v2356_v60 = vpop.f32.mrb[33].mxu1  ;;  %v2468_v63 = vpop.f32.mrb[33].mxu0 }
 0x1f9   : > { %v2357_v0 = vadd.f32 %v2356_v60, %v2355_v3  ;;  %v2469_v1 = vadd.f32 %v2468_v63, %v2467_v59  ;;  %v2358_v2 = vpop.f32.mrb[34].mxu1  ;;  %v2470_v4 = vpop.f32.mrb[34].mxu0 }
 0x1fa   : > { %v2359_v6 = vpop.f32.mrb[35].mxu1  ;;  %v2471_v7 = vpop.f32.mrb[35].mxu0 }
 0x1fb   : > { %v1554_v8 = vadd.f32 %v2469_v1, %v2357_v0  ;;  %v2360_v9 = vadd.f32 %v2359_v6, %v2358_v2  ;;  %v2472_v10 = vadd.f32 %v2471_v7, %v2470_v4 }
 0x1fd   : > { %v1680_v12 = vadd.f32 %v1554_v8, %v942_v5  ;;  %v1557_v13 = vadd.f32 %v2472_v10, %v2360_v9  ;;  %v948_v9 = vld [vmem:[#allocation2 + $0x30] sm:$0xff] }
 0x1ff   : > { %1713 = vst.msk [vmem:[#allocation2] sm:$0xff] %vm259_vm1, %v1680_v12  ;;  %v1681_v14 = vadd.f32 %v1557_v13, %v943_v11  ;;  %v2361_v15 = vpop.f32.mrb[36].mxu1  ;;  %v2473_v16 = vpop.f32.mrb[36].mxu0 }
 0x200   : > { %v2362_v17 = vpop.f32.mrb[37].mxu1  ;;  %v2474_v18 = vpop.f32.mrb[37].mxu0 }
 0x201   : > { %1714 = vst.msk [vmem:[#allocation2 + $0x8] sm:$0xff] %vm259_vm1, %v1681_v14  ;;  %v2363_v24 = vadd.f32 %v2362_v17, %v2361_v15  ;;  %v2475_v25 = vadd.f32 %v2474_v18, %v2473_v16  ;;  %v2364_v26 = vpop.f32.mrb[38].mxu1  ;;  %v2476_v27 = vpop.f32.mrb[38].mxu0 }
 0x202   : > { %v2365_v29 = vpop.f32.mrb[39].mxu1  ;;  %v2477_v30 = vpop.f32.mrb[39].mxu0 }
 0x203   : > { %v1562_v31 = vadd.f32 %v2475_v25, %v2363_v24  ;;  %v2366_v32 = vadd.f32 %v2365_v29, %v2364_v26  ;;  %v2478_v33 = vadd.f32 %v2477_v30, %v2476_v27  ;;  %v949_v24 = vld [vmem:[#allocation2 + $0x38] sm:$0xff] }
 0x205   : > { %v1682_v38 = vadd.f32 %v1562_v31, %v944_v28  ;;  %v1565_v43 = vadd.f32 %v2478_v33, %v2366_v32 }
 0x206   : > { %v1748_v44 = vld [vmem:[#allocation2] sm:$0xff] }
 0x207   : > { %v1787_v49 = vadd.f32 %v3210_v34, %v1748_v44  ;;  %1715 = vst.msk [vmem:[#allocation2 + $0x10] sm:$0xff] %vm259_vm1, %v1682_v38  ;;  %v1683_v50 = vadd.f32 %v1565_v43, %v945_v37  ;;  %v2367_v45 = vpop.f32.mrb[40].mxu1  ;;  %v2479_v46 = vpop.f32.mrb[40].mxu0 }
 0x208   : > { %v1749_v55 = vld [vmem:[#allocation2 + $0x8] sm:$0xff]  ;;  %v2368_v56 = vpop.f32.mrb[41].mxu1  ;;  %v2480_v19 = vpop.f32.mrb[41].mxu0 }
 0x209   : > { %v1819_v20 = vmax.f32 %v1787_v49, 0.0  ;;  %v1788_v21 = vadd.f32 %v3210_v34, %v1749_v55  ;;  %1716 = vst.msk [vmem:[#allocation2 + $0x18] sm:$0xff] %vm259_vm1, %v1683_v50  ;;  %v2369_v22 = vadd.f32 %v2368_v56, %v2367_v45  ;;  %v2481_v35 = vadd.f32 %v2480_v19, %v2479_v46  ;;  %v2370_v39 = vpop.f32.mrb[42].mxu1  ;;  %v2482_v41 = vpop.f32.mrb[42].mxu0  ;;  %v950_v45 = vld [vmem:[#allocation2 + $0x40] sm:$0xff] }
 0x20a   : > { %v2371_v36 = vpop.f32.mrb[43].mxu1  ;;  %v2483_v40 = vpop.f32.mrb[43].mxu0 }
 0x20b   : > { %v2274_v42 = vpack.c.bf16 %v1819_v20, %v1819_v20  ;;  %v1820_v57 = vmax.f32 %v1788_v21, 0.0  ;;  %v1570_v47 = vadd.f32 %v2481_v35, %v2369_v22  ;;  %v2372_v51 = vadd.f32 %v2371_v36, %v2370_v39  ;;  %v951_v35 = vld [vmem:[#allocation2 + $0x48] sm:$0xff] }
 0x20c   : > { %v2484_v48 = vadd.f32 %v2483_v40, %v2482_v41 }
 0x20d   : > { %1980 = vst.msk [vmem:[%s3220_s28] sm:$0xf] %vm1979_vm2, %v2274_v42  ;;  %v2275_v52 = vpack.c.bf16 %v1820_v57, %v1820_v57  ;;  %v1684_v53 = vadd.f32 %v1570_v47, %v946_v23 }
 0x20e   : > { %v1750_v58 = vld [vmem:[#allocation2 + $0x10] sm:$0xff]  ;;  %v1573_v61 = vadd.f32 %v2484_v48, %v2372_v51 }
 0x20f   : > { %1981 = vst.msk [vmem:[%s3220_s28 + $0x4] sm:$0xf] %vm1979_vm2, %v2275_v52  ;;  %v1789_v62 = vadd.f32 %v3210_v34, %v1750_v58  ;;  %v2373_v3 = vpop.f32.mrb[44].mxu1  ;;  %v2485_v59 = vpop.f32.mrb[44].mxu0 }
 0x210   : > { %1717 = vst.msk [vmem:[#allocation2 + $0x20] sm:$0xff] %vm259_vm1, %v1684_v53  ;;  %v1751_v60 = vld [vmem:[#allocation2 + $0x18] sm:$0xff]  ;;  %v1685_v63 = vadd.f32 %v1573_v61, %v947_v54  ;;  %v2374_v0 = vpop.f32.mrb[45].mxu1  ;;  %v2486_v1 = vpop.f32.mrb[45].mxu0 }
 0x211   : > { %v1821_v2 = vmax.f32 %v1789_v62, 0.0  ;;  %v1790_v4 = vadd.f32 %v3210_v34, %v1751_v60  ;;  %v2375_v5 = vadd.f32 %v2374_v0, %v2373_v3  ;;  %v2487_v6 = vadd.f32 %v2486_v1, %v2485_v59  ;;  %v2376_v7 = vpop.f32.mrb[46].mxu1  ;;  %v2488_v8 = vpop.f32.mrb[46].mxu0  ;;  %v952_v59 = vld [vmem:[#allocation2 + $0x50] sm:$0xff] }
 0x212   : > { %1718 = vst.msk [vmem:[#allocation2 + $0x28] sm:$0xff] %vm259_vm1, %v1685_v63  ;;  %v2377_v10 = vpop.f32.mrb[47].mxu1  ;;  %v2489_v11 = vpop.f32.mrb[47].mxu0 }
 0x213   : > { %v2276_v12 = vpack.c.bf16 %v1821_v2, %v1821_v2  ;;  %v1822_v13 = vmax.f32 %v1790_v4, 0.0  ;;  %v1578_v14 = vadd.f32 %v2487_v6, %v2375_v5  ;;  %v2378_v15 = vadd.f32 %v2377_v10, %v2376_v7  ;;  %v953_v6 = vld [vmem:[#allocation2 + $0x58] sm:$0xff] }
 0x214   : > { %v2490_v16 = vadd.f32 %v2489_v11, %v2488_v8 }
 0x215   : > { %1982 = vst.msk [vmem:[%s3220_s28 + $0x8] sm:$0xf] %vm1979_vm2, %v2276_v12  ;;  %v2277_v17 = vpack.c.bf16 %v1822_v13, %v1822_v13  ;;  %v1686_v18 = vadd.f32 %v1578_v14, %v948_v9 }
 0x216   : > { %v1581_v26 = vadd.f32 %v2490_v16, %v2378_v15 }
 0x217   : > { %v1752_v25 = vld [vmem:[#allocation2 + $0x20] sm:$0xff]  ;;  %1983 = vst.msk [vmem:[%s3220_s28 + $0xc] sm:$0xf] %vm1979_vm2, %v2277_v17  ;;  %v2379_v28 = vpop.f32.mrb[48].mxu1  ;;  %v2491_v29 = vpop.f32.mrb[48].mxu0 }
 0x218   : > { %v1791_v27 = vadd.f32 %v3210_v34, %v1752_v25  ;;  %1719 = vst.msk [vmem:[#allocation2 + $0x30] sm:$0xff] %vm259_vm1, %v1686_v18  ;;  %v1687_v30 = vadd.f32 %v1581_v26, %v949_v24  ;;  %v2380_v31 = vpop.f32.mrb[49].mxu1  ;;  %v2492_v32 = vpop.f32.mrb[49].mxu0 }
 0x219   : > { %v1753_v37 = vld [vmem:[#allocation2 + $0x28] sm:$0xff]  ;;  %v2381_v38 = vadd.f32 %v2380_v31, %v2379_v28  ;;  %v2493_v43 = vadd.f32 %v2492_v32, %v2491_v29  ;;  %v2382_v44 = vpop.f32.mrb[50].mxu1  ;;  %v2494_v49 = vpop.f32.mrb[50].mxu0  ;;  %v954_v29 = vld [vmem:[#allocation2 + $0x60] sm:$0xff] }
 0x21a   : > { %v1823_v33 = vmax.f32 %v1791_v27, 0.0  ;;  %v1792_v50 = vadd.f32 %v3210_v34, %v1753_v37  ;;  %1720 = vst.msk [vmem:[#allocation2 + $0x38] sm:$0xff] %vm259_vm1, %v1687_v30  ;;  %v2383_v46 = vpop.f32.mrb[51].mxu1  ;;  %v2495_v55 = vpop.f32.mrb[51].mxu0 }
 0x21b   : > { %v1586_v19 = vadd.f32 %v2493_v43, %v2381_v38  ;;  %v2384_v20 = vadd.f32 %v2383_v46, %v2382_v44  ;;  %v2496_v21 = vadd.f32 %v2495_v55, %v2494_v49 }
 0x21c   : > { %v2278_v56 = vpack.c.bf16 %v1823_v33, %v1823_v33  ;;  %v1824_v22 = vmax.f32 %v1792_v50, 0.0  ;;  %v955_v50 = vld [vmem:[#allocation2 + $0x68] sm:$0xff] }
 0x21d   : > { %v1688_v39 = vadd.f32 %v1586_v19, %v950_v45  ;;  %v1589_v41 = vadd.f32 %v2496_v21, %v2384_v20 }
 0x21e   : > { %1984 = vst.msk [vmem:[%s3220_s28 + $0x10] sm:$0xf] %vm1979_vm2, %v2278_v56  ;;  %v2279_v23 = vpack.c.bf16 %v1824_v22, %v1824_v22 }
 0x21f   : > { %v1754_v36 = vld [vmem:[#allocation2 + $0x30] sm:$0xff]  ;;  %1721 = vst.msk [vmem:[#allocation2 + $0x40] sm:$0xff] %vm259_vm1, %v1688_v39  ;;  %v1689_v42 = vadd.f32 %v1589_v41, %v951_v35  ;;  %v2385_v57 = vpop.f32.mrb[52].mxu1  ;;  %v2497_v47 = vpop.f32.mrb[52].mxu0 }
 0x220   : > { %v1793_v40 = vadd.f32 %v3210_v34, %v1754_v36  ;;  %1985 = vst.msk [vmem:[%s3220_s28 + $0x14] sm:$0xf] %vm1979_vm2, %v2279_v23  ;;  %v2386_v51 = vpop.f32.mrb[53].mxu1  ;;  %v2498_v48 = vpop.f32.mrb[53].mxu0 }
 0x221   : > { %v1755_v53 = vld [vmem:[#allocation2 + $0x38] sm:$0xff]  ;;  %1722 = vst.msk [vmem:[#allocation2 + $0x48] sm:$0xff] %vm259_vm1, %v1689_v42  ;;  %v2387_v54 = vadd.f32 %v2386_v51, %v2385_v57  ;;  %v2499_v58 = vadd.f32 %v2498_v48, %v2497_v47  ;;  %v2388_v61 = vpop.f32.mrb[54].mxu1  ;;  %v2500_v62 = vpop.f32.mrb[54].mxu0  ;;  %v956_v57 = vld [vmem:[#allocation2 + $0x70] sm:$0xff] }
 0x222   : > { %v1825_v52 = vmax.f32 %v1793_v40, 0.0  ;;  %v1794_v3 = vadd.f32 %v3210_v34, %v1755_v53  ;;  %v2389_v60 = vpop.f32.mrb[55].mxu1  ;;  %v2501_v63 = vpop.f32.mrb[55].mxu0 }
 0x223   : > { %v1594_v1 = vadd.f32 %v2499_v58, %v2387_v54  ;;  %v2390_v2 = vadd.f32 %v2389_v60, %v2388_v61  ;;  %v2502_v4 = vadd.f32 %v2501_v63, %v2500_v62 }
 0x224   : > { %v2280_v0 = vpack.c.bf16 %v1825_v52, %v1825_v52  ;;  %v1826_v5 = vmax.f32 %v1794_v3, 0.0  ;;  %v957_v3 = vld [vmem:[#allocation2 + $0x78] sm:$0xff] }
 0x225   : > { %v1690_v7 = vadd.f32 %v1594_v1, %v952_v59  ;;  %v1597_v8 = vadd.f32 %v2502_v4, %v2390_v2 }
 0x226   : > { %1986 = vst.msk [vmem:[%s3220_s28 + $0x18] sm:$0xf] %vm1979_vm2, %v2280_v0  ;;  %v2281_v9 = vpack.c.bf16 %v1826_v5, %v1826_v5  ;;  %v1756_v10 = vld [vmem:[#allocation2 + $0x40] sm:$0xff] }
 0x227   : > { %v1795_v11 = vadd.f32 %v3210_v34, %v1756_v10  ;;  %1723 = vst.msk [vmem:[#allocation2 + $0x50] sm:$0xff] %vm259_vm1, %v1690_v7  ;;  %v1691_v12 = vadd.f32 %v1597_v8, %v953_v6  ;;  %v2391_v13 = vpop.f32.mrb[56].mxu1  ;;  %v2503_v14 = vpop.f32.mrb[56].mxu0 }
 0x228   : > { %1987 = vst.msk [vmem:[%s3220_s28 + $0x1c] sm:$0xf] %vm1979_vm2, %v2281_v9  ;;  %v1757_v15 = vld [vmem:[#allocation2 + $0x48] sm:$0xff]  ;;  %v2392_v16 = vpop.f32.mrb[57].mxu1  ;;  %v2504_v17 = vpop.f32.mrb[57].mxu0 }
 0x229   : > { %v1827_v18 = vmax.f32 %v1795_v11, 0.0  ;;  %v1796_v24 = vadd.f32 %v3210_v34, %v1757_v15  ;;  %1724 = vst.msk [vmem:[#allocation2 + $0x58] sm:$0xff] %vm259_vm1, %v1691_v12  ;;  %v2393_v25 = vadd.f32 %v2392_v16, %v2391_v13  ;;  %v2505_v26 = vadd.f32 %v2504_v17, %v2503_v14  ;;  %v2394_v27 = vpop.f32.mrb[58].mxu1  ;;  %v2506_v28 = vpop.f32.mrb[58].mxu0  ;;  %v958_v13 = vld [vmem:[#allocation2 + $0x80] sm:$0xff] }
 0x22a   : > { %v2395_v30 = vpop.f32.mrb[59].mxu1  ;;  %v2507_v31 = vpop.f32.mrb[59].mxu0 }
 0x22b   : > { %v2282_v32 = vpack.c.bf16 %v1827_v18, %v1827_v18  ;;  %v1828_v33 = vmax.f32 %v1796_v24, 0.0  ;;  %v1602_v37 = vadd.f32 %v2505_v26, %v2393_v25  ;;  %v2396_v38 = vadd.f32 %v2395_v30, %v2394_v27  ;;  %v959_v26 = vld [vmem:[#allocation2 + $0x88] sm:$0xff] }
 0x22c   : > { %v2508_v43 = vadd.f32 %v2507_v31, %v2506_v28 }
 0x22d   : > { %1988 = vst.msk [vmem:[%s3220_s28 + $0x20] sm:$0xf] %vm1979_vm2, %v2282_v32  ;;  %v2283_v44 = vpack.c.bf16 %v1828_v33, %v1828_v33  ;;  %v1692_v49 = vadd.f32 %v1602_v37, %v954_v29 }
 0x22e   : > { %v1758_v45 = vld [vmem:[#allocation2 + $0x50] sm:$0xff]  ;;  %v1605_v46 = vadd.f32 %v2508_v43, %v2396_v38 }
 0x22f   : > { %1989 = vst.msk [vmem:[%s3220_s28 + $0x24] sm:$0xf] %vm1979_vm2, %v2283_v44  ;;  %v1797_v55 = vadd.f32 %v3210_v34, %v1758_v45  ;;  %v2397_v56 = vpop.f32.mrb[60].mxu1  ;;  %v2509_v19 = vpop.f32.mrb[60].mxu0 }
 0x230   : > { %1725 = vst.msk [vmem:[#allocation2 + $0x60] sm:$0xff] %vm259_vm1, %v1692_v49  ;;  %v1759_v20 = vld [vmem:[#allocation2 + $0x58] sm:$0xff]  ;;  %v1693_v21 = vadd.f32 %v1605_v46, %v955_v50  ;;  %v2398_v22 = vpop.f32.mrb[61].mxu1  ;;  %v2510_v35 = vpop.f32.mrb[61].mxu0 }
 0x231   : > { %v1829_v39 = vmax.f32 %v1797_v55, 0.0  ;;  %v1798_v41 = vadd.f32 %v3210_v34, %v1759_v20  ;;  %v2399_v23 = vadd.f32 %v2398_v22, %v2397_v56  ;;  %v2511_v36 = vadd.f32 %v2510_v35, %v2509_v19  ;;  %v2400_v40 = vpop.f32.mrb[62].mxu1  ;;  %v2512_v42 = vpop.f32.mrb[62].mxu0  ;;  %v960_v19 = vld [vmem:[#allocation2 + $0x90] sm:$0xff] }
 0x232   : > { %1726 = vst.msk [vmem:[#allocation2 + $0x68] sm:$0xff] %vm259_vm1, %v1693_v21  ;;  %v2401_v47 = vpop.f32.mrb[63].mxu1  ;;  %v2513_v51 = vpop.f32.mrb[63].mxu0 }
 0x233   : > { %v2284_v48 = vpack.c.bf16 %v1829_v39, %v1829_v39  ;;  %v1830_v52 = vmax.f32 %v1798_v41, 0.0  ;;  %v1610_v53 = vadd.f32 %v2511_v36, %v2399_v23  ;;  %v2402_v54 = vadd.f32 %v2401_v47, %v2400_v40  ;;  %v961_v36 = vld [vmem:[#allocation2 + $0x98] sm:$0xff] }
 0x234   : > { %v2514_v58 = vadd.f32 %v2513_v51, %v2512_v42 }
 0x235   : > { %1990 = vst.msk [vmem:[%s3220_s28 + $0x28] sm:$0xf] %vm1979_vm2, %v2284_v48  ;;  %v2285_v61 = vpack.c.bf16 %v1830_v52, %v1830_v52  ;;  %v1694_v62 = vadd.f32 %v1610_v53, %v956_v57 }
 0x236   : > { %v1613_v60 = vadd.f32 %v2514_v58, %v2402_v54 }
 0x237   : > { %v1760_v59 = vld [vmem:[#allocation2 + $0x60] sm:$0xff]  ;;  %1991 = vst.msk [vmem:[%s3220_s28 + $0x2c] sm:$0xf] %vm1979_vm2, %v2285_v61  ;;  %v2403_v0 = vpop.f32.mrb[64].mxu1  ;;  %v2515_v1 = vpop.f32.mrb[64].mxu0 }
 0x238   : > { %v1799_v63 = vadd.f32 %v3210_v34, %v1760_v59  ;;  %1727 = vst.msk [vmem:[#allocation2 + $0x70] sm:$0xff] %vm259_vm1, %v1694_v62  ;;  %v1695_v2 = vadd.f32 %v1613_v60, %v957_v3  ;;  %v2404_v4 = vpop.f32.mrb[65].mxu1  ;;  %v2516_v5 = vpop.f32.mrb[65].mxu0 }
 0x239   : > { %v1761_v7 = vld [vmem:[#allocation2 + $0x68] sm:$0xff]  ;;  %v2405_v8 = vadd.f32 %v2404_v4, %v2403_v0  ;;  %v2517_v9 = vadd.f32 %v2516_v5, %v2515_v1  ;;  %v2406_v10 = vpop.f32.mrb[66].mxu1  ;;  %v2518_v11 = vpop.f32.mrb[66].mxu0  ;;  %v962_v1 = vld [vmem:[#allocation2 + $0xa0] sm:$0xff] }
 0x23a   : > { %v1831_v6 = vmax.f32 %v1799_v63, 0.0  ;;  %v1800_v12 = vadd.f32 %v3210_v34, %v1761_v7  ;;  %1728 = vst.msk [vmem:[#allocation2 + $0x78] sm:$0xff] %vm259_vm1, %v1695_v2  ;;  %v2407_v14 = vpop.f32.mrb[67].mxu1  ;;  %v2519_v15 = vpop.f32.mrb[67].mxu0 }
 0x23b   : > { %v1618_v17 = vadd.f32 %v2517_v9, %v2405_v8  ;;  %v2408_v18 = vadd.f32 %v2407_v14, %v2406_v10  ;;  %v2520_v24 = vadd.f32 %v2519_v15, %v2518_v11 }
 0x23c   : > { %v2286_v16 = vpack.c.bf16 %v1831_v6, %v1831_v6  ;;  %v1832_v25 = vmax.f32 %v1800_v12, 0.0  ;;  %v963_v12 = vld [vmem:[#allocation2 + $0xa8] sm:$0xff] }
 0x23d   : > { %v1696_v27 = vadd.f32 %v1618_v17, %v958_v13  ;;  %v1621_v28 = vadd.f32 %v2520_v24, %v2408_v18 }
 0x23e   : > { %1992 = vst.msk [vmem:[%s3220_s28 + $0x30] sm:$0xf] %vm1979_vm2, %v2286_v16  ;;  %v2287_v29 = vpack.c.bf16 %v1832_v25, %v1832_v25 }
 0x23f   : > { %v1762_v30 = vld [vmem:[#allocation2 + $0x70] sm:$0xff]  ;;  %1729 = vst.msk [vmem:[#allocation2 + $0x80] sm:$0xff] %vm259_vm1, %v1696_v27  ;;  %v1697_v32 = vadd.f32 %v1621_v28, %v959_v26  ;;  %v2409_v33 = vpop.f32.mrb[68].mxu1  ;;  %v2521_v37 = vpop.f32.mrb[68].mxu0 }
 0x240   : > { %v1801_v31 = vadd.f32 %v3210_v34, %v1762_v30  ;;  %1993 = vst.msk [vmem:[%s3220_s28 + $0x34] sm:$0xf] %vm1979_vm2, %v2287_v29  ;;  %v2410_v38 = vpop.f32.mrb[69].mxu1  ;;  %v2522_v43 = vpop.f32.mrb[69].mxu0 }
 0x241   : > { %v1763_v49 = vld [vmem:[#allocation2 + $0x78] sm:$0xff]  ;;  %1730 = vst.msk [vmem:[#allocation2 + $0x88] sm:$0xff] %vm259_vm1, %v1697_v32  ;;  %v2411_v50 = vadd.f32 %v2410_v38, %v2409_v33  ;;  %v2523_v45 = vadd.f32 %v2522_v43, %v2521_v37  ;;  %v2412_v46 = vpop.f32.mrb[70].mxu1  ;;  %v2524_v55 = vpop.f32.mrb[70].mxu0  ;;  %v964_v33 = vld [vmem:[#allocation2 + $0xb0] sm:$0xff] }
 0x242   : > { %v1833_v44 = vmax.f32 %v1801_v31, 0.0  ;;  %v1802_v56 = vadd.f32 %v3210_v34, %v1763_v49  ;;  %v2413_v20 = vpop.f32.mrb[71].mxu1  ;;  %v2525_v21 = vpop.f32.mrb[71].mxu0 }
 0x243   : > { %v1626_v35 = vadd.f32 %v2523_v45, %v2411_v50  ;;  %v2414_v39 = vadd.f32 %v2413_v20, %v2412_v46  ;;  %v2526_v41 = vadd.f32 %v2525_v21, %v2524_v55 }
 0x244   : > { %v2288_v22 = vpack.c.bf16 %v1833_v44, %v1833_v44  ;;  %v1834_v23 = vmax.f32 %v1802_v56, 0.0  ;;  %v965_v56 = vld [vmem:[#allocation2 + $0xb8] sm:$0xff] }
 0x245   : > { %v1698_v40 = vadd.f32 %v1626_v35, %v960_v19  ;;  %v1629_v42 = vadd.f32 %v2526_v41, %v2414_v39 }
 0x246   : > { %1994 = vst.msk [vmem:[%s3220_s28 + $0x38] sm:$0xf] %vm1979_vm2, %v2288_v22  ;;  %v2289_v57 = vpack.c.bf16 %v1834_v23, %v1834_v23  ;;  %v1764_v47 = vld [vmem:[#allocation2 + $0x80] sm:$0xff] }
 0x247   : > { %v1803_v51 = vadd.f32 %v3210_v34, %v1764_v47  ;;  %1731 = vst.msk [vmem:[#allocation2 + $0x90] sm:$0xff] %vm259_vm1, %v1698_v40  ;;  %v1699_v48 = vadd.f32 %v1629_v42, %v961_v36  ;;  %v2415_v52 = vpop.f32.mrb[72].mxu1  ;;  %v2527_v53 = vpop.f32.mrb[72].mxu0 }
 0x248   : > { %1995 = vst.msk [vmem:[%s3220_s28 + $0x3c] sm:$0xf] %vm1979_vm2, %v2289_v57  ;;  %v1765_v54 = vld [vmem:[#allocation2 + $0x88] sm:$0xff]  ;;  %v2416_v58 = vpop.f32.mrb[73].mxu1  ;;  %v2528_v61 = vpop.f32.mrb[73].mxu0 }
 0x249   : > { %v1835_v62 = vmax.f32 %v1803_v51, 0.0  ;;  %v1804_v3 = vadd.f32 %v3210_v34, %v1765_v54  ;;  %1732 = vst.msk [vmem:[#allocation2 + $0x98] sm:$0xff] %vm259_vm1, %v1699_v48  ;;  %v2417_v59 = vadd.f32 %v2416_v58, %v2415_v52  ;;  %v2529_v60 = vadd.f32 %v2528_v61, %v2527_v53  ;;  %v2418_v63 = vpop.f32.mrb[74].mxu1  ;;  %v2530_v0 = vpop.f32.mrb[74].mxu0  ;;  %v966_v52 = vld [vmem:[#allocation2 + $0xc0] sm:$0xff] }
 0x24a   : > { %v2419_v2 = vpop.f32.mrb[75].mxu1  ;;  %v2531_v4 = vpop.f32.mrb[75].mxu0 }
 0x24b   : > { %v2290_v5 = vpack.c.bf16 %v1835_v62, %v1835_v62  ;;  %v1836_v6 = vmax.f32 %v1804_v3, 0.0  ;;  %v1634_v7 = vadd.f32 %v2529_v60, %v2417_v59  ;;  %v2420_v8 = vadd.f32 %v2419_v2, %v2418_v63  ;;  %v967_v60 = vld [vmem:[#allocation2 + $0xc8] sm:$0xff] }
 0x24c   : > { %v2532_v9 = vadd.f32 %v2531_v4, %v2530_v0 }
 0x24d   : > { %1996 = vst.msk [vmem:[%s3220_s28 + $0x40] sm:$0xf] %vm1979_vm2, %v2290_v5  ;;  %v2291_v10 = vpack.c.bf16 %v1836_v6, %v1836_v6  ;;  %v1700_v11 = vadd.f32 %v1634_v7, %v962_v1 }
 0x24e   : > { %v1766_v13 = vld [vmem:[#allocation2 + $0x90] sm:$0xff]  ;;  %v1637_v14 = vadd.f32 %v2532_v9, %v2420_v8 }
 0x24f   : > { %1997 = vst.msk [vmem:[%s3220_s28 + $0x44] sm:$0xf] %vm1979_vm2, %v2291_v10  ;;  %v1805_v15 = vadd.f32 %v3210_v34, %v1766_v13  ;;  %v2421_v16 = vpop.f32.mrb[76].mxu1  ;;  %v2533_v17 = vpop.f32.mrb[76].mxu0 }
 0x250   : > { %1733 = vst.msk [vmem:[#allocation2 + $0xa0] sm:$0xff] %vm259_vm1, %v1700_v11  ;;  %v1767_v18 = vld [vmem:[#allocation2 + $0x98] sm:$0xff]  ;;  %v1701_v24 = vadd.f32 %v1637_v14, %v963_v12  ;;  %v2422_v25 = vpop.f32.mrb[77].mxu1  ;;  %v2534_v26 = vpop.f32.mrb[77].mxu0 }
 0x251   : > { %v1837_v27 = vmax.f32 %v1805_v15, 0.0  ;;  %v1806_v28 = vadd.f32 %v3210_v34, %v1767_v18  ;;  %v2423_v29 = vadd.f32 %v2422_v25, %v2421_v16  ;;  %v2535_v30 = vadd.f32 %v2534_v26, %v2533_v17  ;;  %v2424_v31 = vpop.f32.mrb[78].mxu1  ;;  %v2536_v32 = vpop.f32.mrb[78].mxu0  ;;  %v968_v17 = vld [vmem:[#allocation2 + $0xd0] sm:$0xff] }
 0x252   : > { %1734 = vst.msk [vmem:[#allocation2 + $0xa8] sm:$0xff] %vm259_vm1, %v1701_v24  ;;  %v2425_v37 = vpop.f32.mrb[79].mxu1  ;;  %v2537_v38 = vpop.f32.mrb[79].mxu0 }
 0x253   : > { %v2292_v43 = vpack.c.bf16 %v1837_v27, %v1837_v27  ;;  %v1838_v44 = vmax.f32 %v1806_v28, 0.0  ;;  %v1642_v49 = vadd.f32 %v2535_v30, %v2423_v29  ;;  %v2426_v50 = vadd.f32 %v2425_v37, %v2424_v31  ;;  %v969_v30 = vld [vmem:[#allocation2 + $0xd8] sm:$0xff] }
 0x254   : > { %v2538_v45 = vadd.f32 %v2537_v38, %v2536_v32 }
 0x255   : > { %1998 = vst.msk [vmem:[%s3220_s28 + $0x48] sm:$0xf] %vm1979_vm2, %v2292_v43  ;;  %v2293_v46 = vpack.c.bf16 %v1838_v44, %v1838_v44  ;;  %v1702_v55 = vadd.f32 %v1642_v49, %v964_v33 }
 0x256   : > { %v1645_v20 = vadd.f32 %v2538_v45, %v2426_v50 }
 0x257   : > { %v1768_v19 = vld [vmem:[#allocation2 + $0xa0] sm:$0xff]  ;;  %1999 = vst.msk [vmem:[%s3220_s28 + $0x4c] sm:$0xf] %vm1979_vm2, %v2293_v46  ;;  %v2427_v22 = vpop.f32.mrb[80].mxu1  ;;  %v2539_v35 = vpop.f32.mrb[80].mxu0 }
 0x258   : > { %v1807_v21 = vadd.f32 %v3210_v34, %v1768_v19  ;;  %1735 = vst.msk [vmem:[#allocation2 + $0xb0] sm:$0xff] %vm259_vm1, %v1702_v55  ;;  %v1703_v39 = vadd.f32 %v1645_v20, %v965_v56  ;;  %v2428_v41 = vpop.f32.mrb[81].mxu1  ;;  %v2540_v23 = vpop.f32.mrb[81].mxu0 }
 0x259   : > { %v1769_v40 = vld [vmem:[#allocation2 + $0xa8] sm:$0xff]  ;;  %v2429_v42 = vadd.f32 %v2428_v41, %v2427_v22  ;;  %v2541_v57 = vadd.f32 %v2540_v23, %v2539_v35  ;;  %v2430_v47 = vpop.f32.mrb[82].mxu1  ;;  %v2542_v51 = vpop.f32.mrb[82].mxu0  ;;  %v970_v35 = vld [vmem:[#allocation2 + $0xe0] sm:$0xff] }
 0x25a   : > { %v1839_v36 = vmax.f32 %v1807_v21, 0.0  ;;  %v1808_v48 = vadd.f32 %v3210_v34, %v1769_v40  ;;  %1736 = vst.msk [vmem:[#allocation2 + $0xb8] sm:$0xff] %vm259_vm1, %v1703_v39  ;;  %v2431_v53 = vpop.f32.mrb[83].mxu1  ;;  %v2543_v54 = vpop.f32.mrb[83].mxu0 }
 0x25b   : > { %v1650_v61 = vadd.f32 %v2541_v57, %v2429_v42  ;;  %v2432_v62 = vadd.f32 %v2431_v53, %v2430_v47  ;;  %v2544_v3 = vadd.f32 %v2543_v54, %v2542_v51 }
 0x25c   : > { %v2294_v58 = vpack.c.bf16 %v1839_v36, %v1839_v36  ;;  %v1840_v59 = vmax.f32 %v1808_v48, 0.0  ;;  %v971_v48 = vld [vmem:[#allocation2 + $0xe8] sm:$0xff] }
 0x25d   : > { %v1704_v63 = vadd.f32 %v1650_v61, %v966_v52  ;;  %v1653_v0 = vadd.f32 %v2544_v3, %v2432_v62 }
 0x25e   : > { %2000 = vst.msk [vmem:[%s3220_s28 + $0x50] sm:$0xf] %vm1979_vm2, %v2294_v58  ;;  %v2295_v1 = vpack.c.bf16 %v1840_v59, %v1840_v59 }
 0x25f   : > { %v1770_v2 = vld [vmem:[#allocation2 + $0xb0] sm:$0xff]  ;;  %1737 = vst.msk [vmem:[#allocation2 + $0xc0] sm:$0xff] %vm259_vm1, %v1704_v63  ;;  %v1705_v5 = vadd.f32 %v1653_v0, %v967_v60  ;;  %v2433_v6 = vpop.f32.mrb[84].mxu1  ;;  %v2545_v7 = vpop.f32.mrb[84].mxu0 }
 0x260   : > { %v1809_v4 = vadd.f32 %v3210_v34, %v1770_v2  ;;  %2001 = vst.msk [vmem:[%s3220_s28 + $0x54] sm:$0xf] %vm1979_vm2, %v2295_v1  ;;  %v2434_v8 = vpop.f32.mrb[85].mxu1  ;;  %v2546_v9 = vpop.f32.mrb[85].mxu0 }
 0x261   : > { %v1771_v11 = vld [vmem:[#allocation2 + $0xb8] sm:$0xff]  ;;  %1738 = vst.msk [vmem:[#allocation2 + $0xc8] sm:$0xff] %vm259_vm1, %v1705_v5  ;;  %v2435_v12 = vadd.f32 %v2434_v8, %v2433_v6  ;;  %v2547_v13 = vadd.f32 %v2546_v9, %v2545_v7  ;;  %v2436_v14 = vpop.f32.mrb[86].mxu1  ;;  %v2548_v15 = vpop.f32.mrb[86].mxu0  ;;  %v972_v6 = vld [vmem:[#allocation2 + $0xf0] sm:$0xff] }
 0x262   : > { %v1841_v10 = vmax.f32 %v1809_v4, 0.0  ;;  %v1810_v16 = vadd.f32 %v3210_v34, %v1771_v11  ;;  %v2437_v18 = vpop.f32.mrb[87].mxu1  ;;  %v2549_v24 = vpop.f32.mrb[87].mxu0 }
 0x263   : > { %v1658_v26 = vadd.f32 %v2547_v13, %v2435_v12  ;;  %v2438_v27 = vadd.f32 %v2437_v18, %v2436_v14  ;;  %v2550_v28 = vadd.f32 %v2549_v24, %v2548_v15 }
 0x264   : > { %v2296_v25 = vpack.c.bf16 %v1841_v10, %v1841_v10  ;;  %v1842_v29 = vmax.f32 %v1810_v16, 0.0  ;;  %v973_v16 = vld [vmem:[#allocation2 + $0xf8] sm:$0xff] }
 0x265   : > { %v1706_v31 = vadd.f32 %v1658_v26, %v968_v17  ;;  %v1661_v32 = vadd.f32 %v2550_v28, %v2438_v27 }
 0x266   : > { %2002 = vst.msk [vmem:[%s3220_s28 + $0x58] sm:$0xf] %vm1979_vm2, %v2296_v25  ;;  %v2297_v33 = vpack.c.bf16 %v1842_v29, %v1842_v29  ;;  %v1772_v37 = vld [vmem:[#allocation2 + $0xc0] sm:$0xff] }
 0x267   : > { %v1811_v38 = vadd.f32 %v3210_v34, %v1772_v37  ;;  %1739 = vst.msk [vmem:[#allocation2 + $0xd0] sm:$0xff] %vm259_vm1, %v1706_v31  ;;  %v1707_v43 = vadd.f32 %v1661_v32, %v969_v30  ;;  %v2439_v44 = vpop.f32.mrb[88].mxu1  ;;  %v2551_v49 = vpop.f32.mrb[88].mxu0 }
 0x268   : > { %2003 = vst.msk [vmem:[%s3220_s28 + $0x5c] sm:$0xf] %vm1979_vm2, %v2297_v33  ;;  %v1773_v50 = vld [vmem:[#allocation2 + $0xc8] sm:$0xff]  ;;  %v2440_v45 = vpop.f32.mrb[89].mxu1  ;;  %v2552_v46 = vpop.f32.mrb[89].mxu0 }
 0x269   : > { %v1843_v55 = vmax.f32 %v1811_v38, 0.0  ;;  %v1812_v56 = vadd.f32 %v3210_v34, %v1773_v50  ;;  %1740 = vst.msk [vmem:[#allocation2 + $0xd8] sm:$0xff] %vm259_vm1, %v1707_v43  ;;  %v2441_v19 = vadd.f32 %v2440_v45, %v2439_v44  ;;  %v2553_v20 = vadd.f32 %v2552_v46, %v2551_v49  ;;  %v2442_v21 = vpop.f32.mrb[90].mxu1  ;;  %v2554_v22 = vpop.f32.mrb[90].mxu0 }
 0x26a   : > { %v2443_v39 = vpop.f32.mrb[91].mxu1  ;;  %v2555_v41 = vpop.f32.mrb[91].mxu0 }
 0x26b   : > { %v2298_v23 = vpack.c.bf16 %v1843_v55, %v1843_v55  ;;  %v1844_v36 = vmax.f32 %v1812_v56, 0.0  ;;  %v1666_v40 = vadd.f32 %v2553_v20, %v2441_v19  ;;  %v2444_v42 = vadd.f32 %v2443_v39, %v2442_v21 }
 0x26c   : > { %v2556_v57 = vadd.f32 %v2555_v41, %v2554_v22 }
 0x26d   : > { %2004 = vst.msk [vmem:[%s3220_s28 + $0x60] sm:$0xf] %vm1979_vm2, %v2298_v23  ;;  %v2299_v47 = vpack.c.bf16 %v1844_v36, %v1844_v36  ;;  %v1708_v51 = vadd.f32 %v1666_v40, %v970_v35 }
 0x26e   : > { %v1774_v52 = vld [vmem:[#allocation2 + $0xd0] sm:$0xff]  ;;  %v1669_v53 = vadd.f32 %v2556_v57, %v2444_v42 }
 0x26f   : > { %2005 = vst.msk [vmem:[%s3220_s28 + $0x64] sm:$0xf] %vm1979_vm2, %v2299_v47  ;;  %v1813_v54 = vadd.f32 %v3210_v34, %v1774_v52  ;;  %v2445_v58 = vpop.f32.mrb[92].mxu1  ;;  %v2557_v61 = vpop.f32.mrb[92].mxu0 }
 0x270   : > { %1741 = vst.msk [vmem:[#allocation2 + $0xe0] sm:$0xff] %vm259_vm1, %v1708_v51  ;;  %v1775_v62 = vld [vmem:[#allocation2 + $0xd8] sm:$0xff]  ;;  %v1709_v3 = vadd.f32 %v1669_v53, %v971_v48  ;;  %v2446_v59 = vpop.f32.mrb[93].mxu1  ;;  %v2558_v60 = vpop.f32.mrb[93].mxu0 }
 0x271   : > { %v1845_v63 = vmax.f32 %v1813_v54, 0.0  ;;  %v1814_v0 = vadd.f32 %v3210_v34, %v1775_v62  ;;  %v2447_v1 = vadd.f32 %v2446_v59, %v2445_v58  ;;  %v2559_v2 = vadd.f32 %v2558_v60, %v2557_v61  ;;  %v2448_v4 = vpop.f32.mrb[94].mxu1  ;;  %v2560_v5 = vpop.f32.mrb[94].mxu0 }
 0x272   : > { %1742 = vst.msk [vmem:[#allocation2 + $0xe8] sm:$0xff] %vm259_vm1, %v1709_v3  ;;  %v2449_v7 = vpop.f32.mrb[95].mxu1  ;;  %v2561_v8 = vpop.f32.mrb[95].mxu0 }
 0x273   : > { %v2300_v9 = vpack.c.bf16 %v1845_v63, %v1845_v63  ;;  %v1846_v10 = vmax.f32 %v1814_v0, 0.0  ;;  %v1674_v11 = vadd.f32 %v2559_v2, %v2447_v1  ;;  %v2450_v12 = vadd.f32 %v2449_v7, %v2448_v4 }
 0x274   : > { %v2562_v13 = vadd.f32 %v2561_v8, %v2560_v5 }
 0x275   : > { %2006 = vst.msk [vmem:[%s3220_s28 + $0x68] sm:$0xf] %vm1979_vm2, %v2300_v9  ;;  %v2301_v14 = vpack.c.bf16 %v1846_v10, %v1846_v10  ;;  %v1710_v15 = vadd.f32 %v1674_v11, %v972_v6 }
 0x276   : > { %v1677_v18 = vadd.f32 %v2562_v13, %v2450_v12 }
 0x277   : > { %v1776_v17 = vld [vmem:[#allocation2 + $0xe0] sm:$0xff]  ;;  %2007 = vst.msk [vmem:[%s3220_s28 + $0x6c] sm:$0xf] %vm1979_vm2, %v2301_v14 }
 0x278   : > { %v1815_v24 = vadd.f32 %v3210_v34, %v1776_v17  ;;  %1743 = vst.msk [vmem:[#allocation2 + $0xf0] sm:$0xff] %vm259_vm1, %v1710_v15  ;;  %v1711_v25 = vadd.f32 %v1677_v18, %v973_v16 }
 0x279   : > { %v1777_v27 = vld [vmem:[#allocation2 + $0xe8] sm:$0xff] }
 0x27a   : > { %v1847_v26 = vmax.f32 %v1815_v24, 0.0  ;;  %v1816_v28 = vadd.f32 %v3210_v34, %v1777_v27  ;;  %1744 = vst.msk [vmem:[#allocation2 + $0xf8] sm:$0xff] %vm259_vm1, %v1711_v25 }
 0x27c   : > { %v2302_v29 = vpack.c.bf16 %v1847_v26, %v1847_v26  ;;  %v1848_v30 = vmax.f32 %v1816_v28, 0.0 }
 0x27e   : > { %2008 = vst.msk [vmem:[%s3220_s28 + $0x70] sm:$0xf] %vm1979_vm2, %v2302_v29  ;;  %v2303_v31 = vpack.c.bf16 %v1848_v30, %v1848_v30 }
 0x27f   : > { %v1778_v32 = vld [vmem:[#allocation2 + $0xf0] sm:$0xff] }
 0x280   : > { %v1817_v33 = vadd.f32 %v3210_v34, %v1778_v32  ;;  %2009 = vst.msk [vmem:[%s3220_s28 + $0x74] sm:$0xf] %vm1979_vm2, %v2303_v31 }
 0x281   : > { %v1779_v38 = vld [vmem:[#allocation2 + $0xf8] sm:$0xff] }
 0x282   : > { %v1849_v37 = vmax.f32 %v1817_v33, 0.0  ;;  %v1818_v43 = vadd.f32 %v3210_v34, %v1779_v38 }
 0x284   : > { %v2304_v44 = vpack.c.bf16 %v1849_v37, %v1849_v37  ;;  %v1850_v49 = vmax.f32 %v1818_v43, 0.0 }
 0x286   : > { %2010 = vst.msk [vmem:[%s3220_s28 + $0x78] sm:$0xf] %vm1979_vm2, %v2304_v44  ;;  %v2305_v50 = vpack.c.bf16 %v1850_v49, %v1850_v49 }
 0x288   : > { %2011 = vst.msk [vmem:[%s3220_s28 + $0x7c] sm:$0xf] %vm1979_vm2, %v2305_v50 }
 0x289 PF: > { %s14_s17 = sadd.s32 1, %s2807_s17   ;;  %s3358_s15 = smov %s2803_s16 }
 0x28a   : > { %p11_p5 = scmp.ge.s32.totalorder %s14_s17, 4   ;;  %s3359_s16 = smov %s3361_s18 }
 0x28c   :  { %13 = sbr.rel (!%p11_p5) target bundleno = 2 (0x2), region = 77 }

</bundles_post_ra>
